<compile_context>
chip_gen: v5e
topology: v5e:2x2
jax: 0.10.0
libtpu: 0.0.40
codegen_flags: <defaults>
</compile_context>

<pallas_src>
import math

import jax
import jax.numpy as jnp
import numpy as np
from jax.experimental import pallas as pl
from jax.experimental.pallas import tpu as pltpu

DIMS = (784, 100, 100, 50, 10)   # fc1..fc4 feature sizes
D_IN = DIMS[0]                   # raw input / eigenvector dimension (784)
D_PROJ = 896                     # 784 rounded up to a lane multiple (fc1 input width)
H = 128                          # padded hidden / output lane width


def _round_up(x, m):
    return (x + m - 1) // m * m


def _eigennet1_kernel(x_ref, e_ref, w1_ref, b1_ref, w2_ref, b2_ref,
                      w3_ref, b3_ref, w4_ref, b4_ref, o_ref):
    bf16 = jnp.bfloat16
    # getProjections: p = x @ evecs  (bf16 operands, f32 accumulation on MXU)
    p = jnp.dot(x_ref[...], e_ref[...], preferred_element_type=jnp.float32)
    # fc1 + ReLU
    h = jnp.dot(p.astype(bf16), w1_ref[...], preferred_element_type=jnp.float32)
    h = jnp.maximum(h + b1_ref[...], 0.0)
    # (dropout = identity in eval mode)
    # fc2 + ReLU
    h = jnp.dot(h.astype(bf16), w2_ref[...], preferred_element_type=jnp.float32)
    h = jnp.maximum(h + b2_ref[...], 0.0)
    # fc3 + ReLU
    h = jnp.dot(h.astype(bf16), w3_ref[...], preferred_element_type=jnp.float32)
    h = jnp.maximum(h + b3_ref[...], 0.0)
    # fc4 + ReLU (eigenNet1 applies actFunc to the output layer as well)
    h = jnp.dot(h.astype(bf16), w4_ref[...], preferred_element_type=jnp.float32)
    o_ref[...] = jnp.maximum(h + b4_ref[...], 0.0).astype(o_ref.dtype)


def prepare_eigennet1_params(evecs, params):
    """Pad to lane multiples and cast MXU operands to bf16 ONCE (cache the result)."""
    prepared = {}
    e_pad = jnp.zeros((D_IN, D_PROJ), jnp.float32).at[:, :D_IN].set(
        jnp.asarray(evecs, jnp.float32))
    prepared["E"] = e_pad.astype(jnp.bfloat16)
    for li in range(4):
        W, b = params[f"fc{li + 1}"]                   # W: [in, out], b: [out]
        din, dout = DIMS[li], DIMS[li + 1]
        din_p = D_PROJ if li == 0 else H
        w_pad = jnp.zeros((din_p, H), jnp.float32).at[:din, :dout].set(W)
        b_pad = jnp.zeros((1, H), jnp.float32).at[0, :dout].set(b)
        prepared[f"W{li + 1}"] = w_pad.astype(jnp.bfloat16)
        prepared[f"b{li + 1}"] = b_pad                 # biases stay f32
    return prepared


@jax.jit
def eigennet1_forward(x, prepared):
    """x: [B, 784] float32. prepared: output of prepare_eigennet1_params."""
    B, d_in = x.shape
    assert d_in == D_IN

    # Batch tile: 512 rows for large batches (good DMA/MXU overlap, modest VMEM
    # footprint even on v7x's 64 MiB); shrink for tiny batches.
    TB = min(512, _round_up(B, 8))
    B_pad = _round_up(B, TB)

    x_bf = x.astype(jnp.bfloat16)
    if B_pad != B:
        x_bf = jnp.pad(x_bf, ((0, B_pad - B), (0, 0)))   # zero tail rows (sliced off later)

    grid = (B_pad // TB,)
    const = lambda i: (0, 0)

    in_specs = [
        pl.BlockSpec((TB, D_IN), lambda i: (i, 0)),      # x tile (full 784-wide block)
        pl.BlockSpec((D_IN, D_PROJ), const),             # evecs (VMEM-resident)
        pl.BlockSpec((D_PROJ, H), const),                # W1
        pl.BlockSpec((1, H), const),                     # b1
        pl.BlockSpec((H, H), const),                     # W2
        pl.BlockSpec((1, H), const),                     # b2
        pl.BlockSpec((H, H), const),                     # W3
        pl.BlockSpec((1, H), const),                     # b3
        pl.BlockSpec((H, H), const),                     # W4
        pl.BlockSpec((1, H), const),                     # b4
    ]
    out_specs = pl.BlockSpec((TB, H), lambda i: (i, 0))

    matmul_terms = D_IN * D_PROJ + D_PROJ * H + 3 * H * H
    weight_bytes = 2 * matmul_terms + 4 * 4 * H
    cost = pl.CostEstimate(
        flops=2 * B_pad * matmul_terms,
        transcendentals=0,
        bytes_accessed=B_pad * D_IN * 2 + B_pad * H * 4 + weight_bytes,
    )

    out_pad = pl.pallas_call(
        _eigennet1_kernel,
        out_shape=jax.ShapeDtypeStruct((B_pad, H), jnp.float32),
        grid=grid,
        in_specs=in_specs,
        out_specs=out_specs,
        compiler_params=pltpu.CompilerParams(
            dimension_semantics=("parallel",)),
        cost_estimate=cost,
    )(x_bf, prepared["E"],
      prepared["W1"], prepared["b1"], prepared["W2"], prepared["b2"],
      prepared["W3"], prepared["b3"], prepared["W4"], prepared["b4"])

    return out_pad[:B, :DIMS[-1]]


def init_eigennet1_params(key):
    """nn.Linear-style uniform init; W stored as [in, out] so the kernel does x @ W."""
    params = {}
    for li in range(4):
        fan_in, fan_out = DIMS[li], DIMS[li + 1]
        key, kw, kb = jax.random.split(key, 3)
        bound = 1.0 / math.sqrt(fan_in)
        W = jax.random.uniform(kw, (fan_in, fan_out), jnp.float32, -bound, bound)
        b = jax.random.uniform(kb, (fan_out,), jnp.float32, -bound, bound)
        params[f"fc{li + 1}"] = (W, b)
    return params


def make_eigenbasis(key, n_samples=256):
    """Mirror eigenNet1.doEig on synthetic 'dataloader' data (host-side setup)."""
    data = jax.random.normal(key, (n_samples, D_IN), jnp.float32)
    cov = np.cov(np.asarray(data).T)                     # [784, 784]
    evals, evecs = np.linalg.eigh(cov)
    order = np.argsort(evals)[::-1]
    return (jnp.asarray(evals[order], jnp.float32),
            jnp.asarray(evecs[:, order], jnp.float32))


def eigennet1_reference(x, evecs, params):
    """Plain-JAX reference with the same bf16-operand / f32-accumulate math."""
    bf16 = jnp.bfloat16
    h = jnp.dot(x.astype(bf16), evecs.astype(bf16),
                preferred_element_type=jnp.float32)
    for li in range(4):
        W, b = params[f"fc{li + 1}"]
        h = jnp.dot(h.astype(bf16), W.astype(bf16),
                    preferred_element_type=jnp.float32)
        h = jnp.maximum(h + b, 0.0)
    return h


if __name__ == "__main__":
    key = jax.random.PRNGKey(0)
    kd, kp, kx = jax.random.split(key, 3)

    _, evecs = make_eigenbasis(kd)
    params = init_eigennet1_params(kp)
    prepared = prepare_eigennet1_params(evecs, params)   # padded + bf16, cached

    B = 2
    x = jax.random.normal(kx, (B, D_IN), jnp.float32)

    out = eigennet1_forward(x, prepared)
    out = jax.block_until_ready(out)
    assert out.shape == (B, DIMS[-1]), out.shape

    ref = eigennet1_reference(x, evecs, params)
    err = float(jnp.max(jnp.abs(out - ref)))
    assert jnp.allclose(out, ref, atol=1e-2, rtol=1e-2), err

    print("KERNEL_OK")
</pallas_src>

<mosaic_0001>
module attributes {stable_mosaic.version = 11 : i64} {
  func.func @_eigennet1_kernel(%arg0: i32, %arg1: memref<8x784xbf16, #tpu.memory_space<vmem>>, %arg2: memref<784x896xbf16, #tpu.memory_space<vmem>>, %arg3: memref<896x128xbf16, #tpu.memory_space<vmem>>, %arg4: memref<1x128xf32, #tpu.memory_space<vmem>>, %arg5: memref<128x128xbf16, #tpu.memory_space<vmem>>, %arg6: memref<1x128xf32, #tpu.memory_space<vmem>>, %arg7: memref<128x128xbf16, #tpu.memory_space<vmem>>, %arg8: memref<1x128xf32, #tpu.memory_space<vmem>>, %arg9: memref<128x128xbf16, #tpu.memory_space<vmem>>, %arg10: memref<1x128xf32, #tpu.memory_space<vmem>>, %arg11: memref<8x128xf32, #tpu.memory_space<vmem>>) attributes {dimension_semantics = [#tpu.dimension_semantics<parallel>], iteration_bounds = array<i64: 1>, scalar_prefetch = 0 : i64, scratch_operands = 0 : i64, tpu.core_type = #tpu.core_type<tc>, window_params = [{transform_indices = @transform_0, window_bounds = array<i64: 8, 784>}, {pipeline_mode = #tpu.pipeline_mode<synchronous>, transform_indices = @transform_1, window_bounds = array<i64: 784, 896>}, {pipeline_mode = #tpu.pipeline_mode<synchronous>, transform_indices = @transform_2, window_bounds = array<i64: 896, 128>}, {pipeline_mode = #tpu.pipeline_mode<synchronous>, transform_indices = @transform_3, window_bounds = array<i64: 1, 128>}, {pipeline_mode = #tpu.pipeline_mode<synchronous>, transform_indices = @transform_4, window_bounds = array<i64: 128, 128>}, {pipeline_mode = #tpu.pipeline_mode<synchronous>, transform_indices = @transform_5, window_bounds = array<i64: 1, 128>}, {pipeline_mode = #tpu.pipeline_mode<synchronous>, transform_indices = @transform_6, window_bounds = array<i64: 128, 128>}, {pipeline_mode = #tpu.pipeline_mode<synchronous>, transform_indices = @transform_7, window_bounds = array<i64: 1, 128>}, {pipeline_mode = #tpu.pipeline_mode<synchronous>, transform_indices = @transform_8, window_bounds = array<i64: 128, 128>}, {pipeline_mode = #tpu.pipeline_mode<synchronous>, transform_indices = @transform_9, window_bounds = array<i64: 1, 128>}, {transform_indices = @transform_10, window_bounds = array<i64: 8, 128>}]} {
    %c0 = arith.constant 0 : index
    %c0_0 = arith.constant 0 : index
    %0 = vector.load %arg1[%c0, %c0_0] : memref<8x784xbf16, #tpu.memory_space<vmem>>, vector<8x784xbf16>
    %c0_1 = arith.constant 0 : index
    %c0_2 = arith.constant 0 : index
    %1 = vector.load %arg2[%c0_1, %c0_2] : memref<784x896xbf16, #tpu.memory_space<vmem>>, vector<784x896xbf16>
    %cst = arith.constant dense<0.000000e+00> : vector<8x896xf32>
    %2 = tpu.matmul %0, %1, %cst {dimension_numbers = #tpu.dot_dimension_numbers<[1], [0], [0], [1], [0, 0, 1, 1], [], []>} : vector<8x784xbf16>, vector<784x896xbf16>, vector<8x896xf32> -> vector<8x896xf32>
    %3 = arith.truncf %2 : vector<8x896xf32> to vector<8x896xbf16>
    %c0_3 = arith.constant 0 : index
    %c0_4 = arith.constant 0 : index
    %4 = vector.load %arg3[%c0_3, %c0_4] : memref<896x128xbf16, #tpu.memory_space<vmem>>, vector<896x128xbf16>
    %cst_5 = arith.constant dense<0.000000e+00> : vector<8x128xf32>
    %5 = tpu.matmul %3, %4, %cst_5 {dimension_numbers = #tpu.dot_dimension_numbers<[1], [0], [0], [1], [0, 0, 1, 1], [], []>} : vector<8x896xbf16>, vector<896x128xbf16>, vector<8x128xf32> -> vector<8x128xf32>
    %c0_6 = arith.constant 0 : index
    %c0_7 = arith.constant 0 : index
    %6 = vector.load %arg4[%c0_6, %c0_7] : memref<1x128xf32, #tpu.memory_space<vmem>>, vector<1x128xf32>
    %7 = vector.broadcast %6 : vector<1x128xf32> to vector<8x128xf32>
    %8 = arith.addf %5, %7 : vector<8x128xf32>
    %cst_8 = arith.constant 0.000000e+00 : f32
    %9 = vector.broadcast %cst_8 : f32 to vector<8x128xf32>
    %10 = arith.maximumf %8, %9 : vector<8x128xf32>
    %11 = arith.truncf %10 : vector<8x128xf32> to vector<8x128xbf16>
    %c0_9 = arith.constant 0 : index
    %c0_10 = arith.constant 0 : index
    %12 = vector.load %arg5[%c0_9, %c0_10] : memref<128x128xbf16, #tpu.memory_space<vmem>>, vector<128x128xbf16>
    %cst_11 = arith.constant dense<0.000000e+00> : vector<8x128xf32>
    %13 = tpu.matmul %11, %12, %cst_11 {dimension_numbers = #tpu.dot_dimension_numbers<[1], [0], [0], [1], [0, 0, 1, 1], [], []>} : vector<8x128xbf16>, vector<128x128xbf16>, vector<8x128xf32> -> vector<8x128xf32>
    %c0_12 = arith.constant 0 : index
    %c0_13 = arith.constant 0 : index
    %14 = vector.load %arg6[%c0_12, %c0_13] : memref<1x128xf32, #tpu.memory_space<vmem>>, vector<1x128xf32>
    %15 = vector.broadcast %14 : vector<1x128xf32> to vector<8x128xf32>
    %16 = arith.addf %13, %15 : vector<8x128xf32>
    %cst_14 = arith.constant 0.000000e+00 : f32
    %17 = vector.broadcast %cst_14 : f32 to vector<8x128xf32>
    %18 = arith.maximumf %16, %17 : vector<8x128xf32>
    %19 = arith.truncf %18 : vector<8x128xf32> to vector<8x128xbf16>
    %c0_15 = arith.constant 0 : index
    %c0_16 = arith.constant 0 : index
    %20 = vector.load %arg7[%c0_15, %c0_16] : memref<128x128xbf16, #tpu.memory_space<vmem>>, vector<128x128xbf16>
    %cst_17 = arith.constant dense<0.000000e+00> : vector<8x128xf32>
    %21 = tpu.matmul %19, %20, %cst_17 {dimension_numbers = #tpu.dot_dimension_numbers<[1], [0], [0], [1], [0, 0, 1, 1], [], []>} : vector<8x128xbf16>, vector<128x128xbf16>, vector<8x128xf32> -> vector<8x128xf32>
    %c0_18 = arith.constant 0 : index
    %c0_19 = arith.constant 0 : index
    %22 = vector.load %arg8[%c0_18, %c0_19] : memref<1x128xf32, #tpu.memory_space<vmem>>, vector<1x128xf32>
    %23 = vector.broadcast %22 : vector<1x128xf32> to vector<8x128xf32>
    %24 = arith.addf %21, %23 : vector<8x128xf32>
    %cst_20 = arith.constant 0.000000e+00 : f32
    %25 = vector.broadcast %cst_20 : f32 to vector<8x128xf32>
    %26 = arith.maximumf %24, %25 : vector<8x128xf32>
    %27 = arith.truncf %26 : vector<8x128xf32> to vector<8x128xbf16>
    %c0_21 = arith.constant 0 : index
    %c0_22 = arith.constant 0 : index
    %28 = vector.load %arg9[%c0_21, %c0_22] : memref<128x128xbf16, #tpu.memory_space<vmem>>, vector<128x128xbf16>
    %cst_23 = arith.constant dense<0.000000e+00> : vector<8x128xf32>
    %29 = tpu.matmul %27, %28, %cst_23 {dimension_numbers = #tpu.dot_dimension_numbers<[1], [0], [0], [1], [0, 0, 1, 1], [], []>} : vector<8x128xbf16>, vector<128x128xbf16>, vector<8x128xf32> -> vector<8x128xf32>
    %c0_24 = arith.constant 0 : index
    %c0_25 = arith.constant 0 : index
    %30 = vector.load %arg10[%c0_24, %c0_25] : memref<1x128xf32, #tpu.memory_space<vmem>>, vector<1x128xf32>
    %31 = vector.broadcast %30 : vector<1x128xf32> to vector<8x128xf32>
    %32 = arith.addf %29, %31 : vector<8x128xf32>
    %cst_26 = arith.constant 0.000000e+00 : f32
    %33 = vector.broadcast %cst_26 : f32 to vector<8x128xf32>
    %34 = arith.maximumf %32, %33 : vector<8x128xf32>
    %c0_27 = arith.constant 0 : index
    %c0_28 = arith.constant 0 : index
    %35 = vector.load %arg11[%c0_27, %c0_28] : memref<8x128xf32, #tpu.memory_space<vmem>>, vector<8x128xf32>
    tpu.vector_store %arg11[%c0_27, %c0_28], %34 {strides = array<i32>} : memref<8x128xf32, #tpu.memory_space<vmem>>, vector<8x128xf32>,
    return
  }
  func.func @transform_0(%arg0: i32) -> (i32, i32) {
    %c0_i32 = arith.constant 0 : i32
    %c0_i32_0 = arith.constant 0 : i32
    return %arg0, %c0_i32 : i32, i32
  }
  func.func @transform_1(%arg0: i32) -> (i32, i32) {
    %c0_i32 = arith.constant 0 : i32
    %c0_i32_0 = arith.constant 0 : i32
    %c0_i32_1 = arith.constant 0 : i32
    return %c0_i32, %c0_i32_0 : i32, i32
  }
  func.func @transform_2(%arg0: i32) -> (i32, i32) {
    %c0_i32 = arith.constant 0 : i32
    %c0_i32_0 = arith.constant 0 : i32
    %c0_i32_1 = arith.constant 0 : i32
    return %c0_i32, %c0_i32_0 : i32, i32
  }
  func.func @transform_3(%arg0: i32) -> (i32, i32) {
    %c0_i32 = arith.constant 0 : i32
    %c0_i32_0 = arith.constant 0 : i32
    %c0_i32_1 = arith.constant 0 : i32
    return %c0_i32, %c0_i32_0 : i32, i32
  }
  func.func @transform_4(%arg0: i32) -> (i32, i32) {
    %c0_i32 = arith.constant 0 : i32
    %c0_i32_0 = arith.constant 0 : i32
    %c0_i32_1 = arith.constant 0 : i32
    return %c0_i32, %c0_i32_0 : i32, i32
  }
  func.func @transform_5(%arg0: i32) -> (i32, i32) {
    %c0_i32 = arith.constant 0 : i32
    %c0_i32_0 = arith.constant 0 : i32
    %c0_i32_1 = arith.constant 0 : i32
    return %c0_i32, %c0_i32_0 : i32, i32
  }
  func.func @transform_6(%arg0: i32) -> (i32, i32) {
    %c0_i32 = arith.constant 0 : i32
    %c0_i32_0 = arith.constant 0 : i32
    %c0_i32_1 = arith.constant 0 : i32
    return %c0_i32, %c0_i32_0 : i32, i32
  }
  func.func @transform_7(%arg0: i32) -> (i32, i32) {
    %c0_i32 = arith.constant 0 : i32
    %c0_i32_0 = arith.constant 0 : i32
    %c0_i32_1 = arith.constant 0 : i32
    return %c0_i32, %c0_i32_0 : i32, i32
  }
  func.func @transform_8(%arg0: i32) -> (i32, i32) {
    %c0_i32 = arith.constant 0 : i32
    %c0_i32_0 = arith.constant 0 : i32
    %c0_i32_1 = arith.constant 0 : i32
    return %c0_i32, %c0_i32_0 : i32, i32
  }
  func.func @transform_9(%arg0: i32) -> (i32, i32) {
    %c0_i32 = arith.constant 0 : i32
    %c0_i32_0 = arith.constant 0 : i32
    %c0_i32_1 = arith.constant 0 : i32
    return %c0_i32, %c0_i32_0 : i32, i32
  }
  func.func @transform_10(%arg0: i32) -> (i32, i32) {
    %c0_i32 = arith.constant 0 : i32
    %c0_i32_0 = arith.constant 0 : i32
    return %arg0, %c0_i32 : i32, i32
  }
}

</mosaic_0001>

<bundles_post_ra>
// kernel: eigennet1_forward.1
= control target key start
LH: loop header
LB: loop body
LE: loop exit
PB: predicated region body
PF: predicated region fallthrough
CT: control target
= control target key end

     0   :  { %15 = vsyncpa [#allocation3], 0  ;;  %s6393_s0 = inlined_call_operand.vmem [shape: bf16[8,784], index: 0, kind: input, shape index: {}]   ;;  %s6394_s1 = inlined_call_operand.hbm [shape: bf16[784,896], index: 1, kind: input, shape index: {}]   ;;  %s6395_s2 = inlined_call_operand.hbm [shape: bf16[896,128], index: 2, kind: input, shape index: {}]   ;;  %s6396_s3 = inlined_call_operand.hbm [shape: f32[1,128], index: 3, kind: input, shape index: {}]   ;;  %s6397_s4 = inlined_call_operand.hbm [shape: bf16[128,128], index: 4, kind: input, shape index: {}]   ;;  %s6398_s5 = inlined_call_operand.hbm [shape: f32[1,128], index: 5, kind: input, shape index: {}]   ;;  %s6399_s6 = inlined_call_operand.hbm [shape: bf16[128,128], index: 6, kind: input, shape index: {}]   ;;  %s6400_s7 = inlined_call_operand.hbm [shape: f32[1,128], index: 7, kind: input, shape index: {}]   ;;  %s6401_s8 = inlined_call_operand.hbm [shape: bf16[128,128], index: 8, kind: input, shape index: {}]   ;;  %s6402_s9 = inlined_call_operand.hbm [shape: f32[1,128], index: 9, kind: input, shape index: {}]   ;;  %s6403_s10 = inlined_call_operand.vmem [shape: f32[8,128], index: 10, kind: output, shape index: {}]  }
   0x1   :  { %16 = vsyncpa [#allocation5], 0 }
   0x2   :  { %17 = vsyncpa [#allocation8], 0 }
   0x3   :  { %18 = vsyncpa [#allocation11], 0  ;;  %s39_s15 = sshll.u32 %s6395_s2, 4  ;;  %s40_s15 = int_to_ptr.hbm [resolvable:$true] %s39_s15 }
   0x4   :  { %19 = vsyncpa [#allocation14], 0  ;;  %s6168_s16 = smov [#allocation4]   ;;  %s63_s20 = sshll.u32 %s6397_s4, 4  ;;  %s64_s20 = int_to_ptr.hbm [resolvable:$true] %s63_s20 }
   0x5   :  { %s41_s17 = sshll.u32 %s6168_s16, 4  ;;  %s6169_s21 = smov 64   ;;  %s42_s17 = int_to_ptr.vmem [resolvable:$true] %s41_s17 }
   0x6   :  { %s6170_s22 = smov 4   ;;  %s6171_s23 = smov [#allocation7]  }
   0x7   :  { %47 = dma.hbm_to_vmem [thread:$0]  %s40_s15, 7168, %s42_s17, [#allocation5], %s6169_s21, %s6169_s21, %s6170_s22  }
   0x8   :  { %s65_s24 = sshll.u32 %s6171_s23, 4  ;;  %s87_s27 = sshll.u32 %s6399_s6, 4  ;;  %s66_s24 = int_to_ptr.vmem [resolvable:$true] %s65_s24  ;;  %s88_s27 = int_to_ptr.hbm [resolvable:$true] %s87_s27 }
   0x9   :  { %71 = dma.hbm_to_vmem [thread:$0]  %s64_s20, 1024, %s66_s24, [#allocation8], %s6169_s21, %s6169_s21, %s6170_s22  }
   0xa   :  { %s111_s29 = sshll.u32 %s6401_s8, 4  ;;  %s6172_s30 = smov [#allocation10]   ;;  %s112_s29 = int_to_ptr.hbm [resolvable:$true] %s111_s29 }
   0xb   :  { %s89_s11 = sshll.u32 %s6172_s30, 4  ;;  %s6173_s4 = smov [#allocation13]   ;;  %s90_s11 = int_to_ptr.vmem [resolvable:$true] %s89_s11 }
   0xc   :  { %95 = dma.hbm_to_vmem [thread:$0]  %s88_s27, 1024, %s90_s11, [#allocation11], %s6169_s21, %s6169_s21, %s6170_s22  }
   0xd   :  { %s113_s12 = sshll.u32 %s6173_s4, 4  ;;  %s26_s15 = sshll.u32 %s6394_s1, 4  ;;  %s114_s12 = int_to_ptr.vmem [resolvable:$true] %s113_s12  ;;  %s27_s15 = int_to_ptr.hbm [resolvable:$true] %s26_s15 }
   0xe   :  { %119 = dma.hbm_to_vmem [thread:$0]  %s112_s29, 1024, %s114_s12, [#allocation14], %s6169_s21, %s6169_s21, %s6170_s22  }
   0xf   :  { %s6174_s6 = smov [#allocation2]   ;;  %s53_s8 = sshll.u32 %s6396_s3, 4  ;;  %s54_s8 = int_to_ptr.hbm [resolvable:$true] %s53_s8 }
  0x10   :  { %s28_s16 = sshll.u32 %s6174_s6, 4  ;;  %s6175_s19 = smov 448   ;;  %s29_s16 = int_to_ptr.vmem [resolvable:$true] %s28_s16 }
  0x11   :  { %s6176_s20 = smov 28   ;;  %s6177_s23 = smov [#allocation6]  }
  0x12   :  { %34 = dma.hbm_to_vmem [thread:$0]  %s27_s15, 43904, %s29_s16, [#allocation3], %s6175_s19, %s6175_s19, %s6176_s20  }
  0x13   :  { %s55_s24 = sshll.u32 %s6177_s23, 4  ;;  %s77_s1 = sshll.u32 %s6398_s5, 4  ;;  %s56_s24 = int_to_ptr.vmem [resolvable:$true] %s55_s24  ;;  %s78_s1 = int_to_ptr.hbm [resolvable:$true] %s77_s1 }
  0x14   :  { %58 = dma.hbm_to_vmem [thread:$0]  %s54_s8, 16, %s56_s24, [#allocation5]  }
  0x15   :  { %s101_s27 = sshll.u32 %s6400_s7, 4  ;;  %s6178_s2 = smov [#allocation9]   ;;  %s102_s27 = int_to_ptr.hbm [resolvable:$true] %s101_s27 }
  0x16   :  { %s79_s28 = sshll.u32 %s6178_s2, 4  ;;  %s6179_s3 = smov [#allocation12]   ;;  %s80_s28 = int_to_ptr.vmem [resolvable:$true] %s79_s28 }
  0x17   :  { %82 = dma.hbm_to_vmem [thread:$0]  %s78_s1, 16, %s80_s28, [#allocation8]  }
  0x18   :  { %s103_s29 = sshll.u32 %s6179_s3, 4  ;;  %s125_s4 = sshll.u32 %s6402_s9, 4  ;;  %s104_s29 = int_to_ptr.vmem [resolvable:$true] %s103_s29  ;;  %s126_s4 = int_to_ptr.hbm [resolvable:$true] %s125_s4 }
  0x19   :  { %106 = dma.hbm_to_vmem [thread:$0]  %s102_s27, 16, %s104_s29, [#allocation11]  }
  0x1a   :  { %s6180_s5 = smov [#allocation15]  }
  0x1b   :  { %s127_s12 = sshll.u32 %s6180_s5, 4  ;;  %s128_s12 = int_to_ptr.vmem [resolvable:$true] %s127_s12 }
  0x1c   :  { %130 = dma.hbm_to_vmem [thread:$0]  %s126_s4, 16, %s128_s12, [#allocation14]  }
  0x1d   :  { %6158 = dma.done.wait [#allocation3], 43904  }
  0x1e   :  { %6159 = vsyncadd [#allocation3], 4294923392 }
  0x1f   :  { %6160 = dma.done.wait [#allocation5], 7184  }
  0x20   :  { %6161 = vsyncadd [#allocation5], 4294960112 }
  0x21   :  { %6162 = dma.done.wait [#allocation8], 1040  }
  0x22   :  { %6163 = vsyncadd [#allocation8], 4294966256 }
  0x23   :  { %6164 = dma.done.wait [#allocation11], 1040  }
  0x24   :  { %6165 = vsyncadd [#allocation11], 4294966256 }
  0x25   :  { %6166 = dma.done.wait [#allocation14], 1040  }
  0x26   :  { %6167 = vsyncadd [#allocation14], 4294966256  ;;  %v4001_v0 = vld [vmem:[#allocation2 + $0x188] sm:$0xf]  ;;  %v5554_v1 = vld [vmem:[#allocation2 + $0x1a0] sm:$0xf0] }
  0x27   :  { %v4225_v2 = vld [vmem:[#allocation2 + $0x348] sm:$0xf]  ;;  %v4002_v3 = vor.u32 %v5554_v1, %v4001_v0  ;;  %v5610_v4 = vld [vmem:[#allocation2 + $0x360] sm:$0xf0]  ;;  %v3973_v11 = vld [vmem:[#allocation2 + $0x150] sm:$0xf] }
  0x28   :  { %v4449_v5 = vld [vmem:[#allocation2 + $0x508] sm:$0xf]  ;;  %v5666_v6 = vld [vmem:[#allocation2 + $0x520] sm:$0xf0]  ;;  %v4226_v7 = vor.u32 %v5610_v4, %v4225_v2  ;;  %v5547_v13 = vld [vmem:[#allocation2 + $0x168] sm:$0xf0] }
  0x29   :  { %v4450_v8 = vor.u32 %v5666_v6, %v4449_v5  ;;  %v4673_v9 = vld [vmem:[#allocation2 + $0x6c8] sm:$0xf]  ;;  %v5722_v10 = vld [vmem:[#allocation2 + $0x6e0] sm:$0xf0]  ;;  %2356 = vmatpush.bf16.msra.mxu0 %v4002_v3  ;;  %v4197_v14 = vld [vmem:[#allocation2 + $0x310] sm:$0xf]  ;;  %v3974_v16 = vor.u32 %v5547_v13, %v3973_v11 }
  0x2a   :  { %v4674_v12 = vor.u32 %v5722_v10, %v4673_v9  ;;  %v5603_v15 = vld [vmem:[#allocation2 + $0x328] sm:$0xf0]  ;;  %2369 = vmatpush.bf16.msra.mxu1 %v4226_v7  ;;  %v4421_v18 = vld [vmem:[#allocation2 + $0x4d0] sm:$0xf]  ;;  %v3945_v23 = vld [vmem:[#allocation2 + $0x118] sm:$0xf] }
  0x2b   :  { %2382 = vmatpush.bf16.msra.mxu2 %v4450_v8  ;;  %v4198_v17 = vor.u32 %v5603_v15, %v4197_v14  ;;  %v5659_v19 = vld [vmem:[#allocation2 + $0x4e8] sm:$0xf0]  ;;  %v4645_v20 = vld [vmem:[#allocation2 + $0x690] sm:$0xf]  ;;  %v5540_v24 = vld [vmem:[#allocation2 + $0x130] sm:$0xf0] }
  0x2c   :  { %2395 = vmatpush.bf16.msra.mxu3 %v4674_v12  ;;  %v4422_v21 = vor.u32 %v5659_v19, %v4421_v18  ;;  %v5715_v22 = vld [vmem:[#allocation2 + $0x6a8] sm:$0xf0]  ;;  %v4169_v26 = vld [vmem:[#allocation2 + $0x2d8] sm:$0xf]  ;;  %v5596_v27 = vld [vmem:[#allocation2 + $0x2f0] sm:$0xf0]  ;;  %v3946_v29 = vor.u32 %v5540_v24, %v3945_v23 }
  0x2d   :  { %v4646_v25 = vor.u32 %v5715_v22, %v4645_v20  ;;  %v4393_v28 = vld [vmem:[#allocation2 + $0x498] sm:$0xf]  ;;  %2357 = vmatpush.bf16.msra.mxu0 %v3974_v16  ;;  %v5652_v30 = vld [vmem:[#allocation2 + $0x4b0] sm:$0xf0]  ;;  %v4170_v33 = vor.u32 %v5596_v27, %v4169_v26  ;;  %v3917_v35 = vld [vmem:[#allocation2 + $0xe0] sm:$0xf] }
  0x2e   :  { %v4617_v31 = vld [vmem:[#allocation2 + $0x658] sm:$0xf]  ;;  %v5708_v32 = vld [vmem:[#allocation2 + $0x670] sm:$0xf0]  ;;  %2370 = vmatpush.bf16.msra.mxu1 %v4198_v17  ;;  %v4394_v34 = vor.u32 %v5652_v30, %v4393_v28  ;;  %v5533_v36 = vld [vmem:[#allocation2 + $0xf8] sm:$0xf0] }
  0x2f   :  { %2383 = vmatpush.bf16.msra.mxu2 %v4422_v21  ;;  %v4141_v37 = vld [vmem:[#allocation2 + $0x2a0] sm:$0xf]  ;;  %v4618_v38 = vor.u32 %v5708_v32, %v4617_v31  ;;  %v5589_v39 = vld [vmem:[#allocation2 + $0x2b8] sm:$0xf0]  ;;  %v3918_v44 = vor.u32 %v5533_v36, %v3917_v35  ;;  %v3889_v47 = vld [vmem:[#allocation2 + $0xa8] sm:$0xf] }
  0x30   :  { %2396 = vmatpush.bf16.msra.mxu3 %v4646_v25  ;;  %v4365_v40 = vld [vmem:[#allocation2 + $0x460] sm:$0xf]  ;;  %v5645_v41 = vld [vmem:[#allocation2 + $0x478] sm:$0xf0]  ;;  %v4142_v45 = vor.u32 %v5589_v39, %v4141_v37  ;;  %v5526_v48 = vld [vmem:[#allocation2 + $0xc0] sm:$0xf0] }
  0x31   :  { %v4589_v42 = vld [vmem:[#allocation2 + $0x620] sm:$0xf]  ;;  %v5701_v43 = vld [vmem:[#allocation2 + $0x638] sm:$0xf0]  ;;  %2358 = vmatpush.bf16.msra.mxu0 %v3946_v29  ;;  %v4366_v46 = vor.u32 %v5645_v41, %v4365_v40  ;;  %v4113_v49 = vld [vmem:[#allocation2 + $0x268] sm:$0xf]  ;;  %v3890_v56 = vor.u32 %v5526_v48, %v3889_v47 }
  0x32   :  { %2371 = vmatpush.bf16.msra.mxu1 %v4170_v33  ;;  %v4590_v50 = vor.u32 %v5701_v43, %v4589_v42  ;;  %v5582_v51 = vld [vmem:[#allocation2 + $0x280] sm:$0xf0]  ;;  %v4337_v52 = vld [vmem:[#allocation2 + $0x428] sm:$0xf]  ;;  %v3861_v59 = vld [vmem:[#allocation2 + $0x70] sm:$0xf] }
  0x33   :  { %2384 = vmatpush.bf16.msra.mxu2 %v4394_v34  ;;  %v5638_v53 = vld [vmem:[#allocation2 + $0x440] sm:$0xf0]  ;;  %v4561_v54 = vld [vmem:[#allocation2 + $0x5e8] sm:$0xf]  ;;  %v4114_v57 = vor.u32 %v5582_v51, %v4113_v49  ;;  %v5519_v60 = vld [vmem:[#allocation2 + $0x88] sm:$0xf0] }
  0x34   :  { %2397 = vmatpush.bf16.msra.mxu3 %v4618_v38  ;;  %v5694_v55 = vld [vmem:[#allocation2 + $0x600] sm:$0xf0]  ;;  %v4338_v58 = vor.u32 %v5638_v53, %v4337_v52  ;;  %v4085_v61 = vld [vmem:[#allocation2 + $0x230] sm:$0xf]  ;;  %v5575_v63 = vld [vmem:[#allocation2 + $0x248] sm:$0xf0]  ;;  %v3862_v4 = vor.u32 %v5519_v60, %v3861_v59 }
  0x35   :  { %2359 = vmatpush.bf16.msra.mxu0 %v3918_v44  ;;  %v4562_v62 = vor.u32 %v5694_v55, %v4561_v54  ;;  %v4309_v0 = vld [vmem:[#allocation2 + $0x3f0] sm:$0xf]  ;;  %v5631_v1 = vld [vmem:[#allocation2 + $0x408] sm:$0xf0]  ;;  %v4086_v5 = vor.u32 %v5575_v63, %v4085_v61  ;;  %v3833_v7 = vld [vmem:[#allocation2 + $0x38] sm:$0xf] }
  0x36   :  { %2372 = vmatpush.bf16.msra.mxu1 %v4142_v45  ;;  %v4533_v2 = vld [vmem:[#allocation2 + $0x5b0] sm:$0xf]  ;;  %v5687_v3 = vld [vmem:[#allocation2 + $0x5c8] sm:$0xf0]  ;;  %v4310_v6 = vor.u32 %v5631_v1, %v4309_v0  ;;  %v5512_v8 = vld [vmem:[#allocation2 + $0x50] sm:$0xf0] }
  0x37   :  { %2385 = vmatpush.bf16.msra.mxu2 %v4366_v46  ;;  %v4057_v9 = vld [vmem:[#allocation2 + $0x1f8] sm:$0xf]  ;;  %v4534_v10 = vor.u32 %v5687_v3, %v4533_v2  ;;  %v5568_v11 = vld [vmem:[#allocation2 + $0x210] sm:$0xf0]  ;;  %v3834_v16 = vor.u32 %v5512_v8, %v3833_v7  ;;  %v3805_v17 = vld [vmem:[#allocation2] sm:$0xf] }
  0x38   :  { %2398 = vmatpush.bf16.msra.mxu3 %v4590_v50  ;;  %v4281_v12 = vld [vmem:[#allocation2 + $0x3b8] sm:$0xf]  ;;  %v5624_v13 = vld [vmem:[#allocation2 + $0x3d0] sm:$0xf0]  ;;  %v5505_v18 = vld [vmem:[#allocation2 + $0x18] sm:$0xf0]  ;;  %v4058_v20 = vor.u32 %v5568_v11, %v4057_v9 }
  0x39   :  { %2360 = vmatpush.bf16.msra.mxu0 %v3890_v56  ;;  %v4505_v14 = vld [vmem:[#allocation2 + $0x578] sm:$0xf]  ;;  %v5680_v15 = vld [vmem:[#allocation2 + $0x590] sm:$0xf0]  ;;  %v4029_v19 = vld [vmem:[#allocation2 + $0x1c0] sm:$0xf]  ;;  %v4282_v21 = vor.u32 %v5624_v13, %v4281_v12  ;;  %v3806_v32 = vor.u32 %v5505_v18, %v3805_v17 }
  0x3a   :  { %2373 = vmatpush.bf16.msra.mxu1 %v4114_v57  ;;  %v5561_v22 = vld [vmem:[#allocation2 + $0x1d8] sm:$0xf0]  ;;  %v4253_v23 = vld [vmem:[#allocation2 + $0x380] sm:$0xf]  ;;  %v4506_v25 = vor.u32 %v5680_v15, %v4505_v14  ;;  %v169_v28 = vld [vmem:[%s6393_s0 + $0x8] sm:$0xff]  ;;  %vm2352_vm0 = vcmask 130048  }
  0x3b   :  { %2386 = vmatpush.bf16.msra.mxu2 %v4338_v58  ;;  %v5617_v24 = vld [vmem:[#allocation2 + $0x398] sm:$0xf0]  ;;  %v4477_v26 = vld [vmem:[#allocation2 + $0x540] sm:$0xf]  ;;  %v4897_v29 = vld [vmem:[#allocation2 + $0x888] sm:$0xf]  ;;  %v4030_v36 = vor.u32 %v5561_v22, %v4029_v19  ;;  %v570_v40 = vunpack.c.l.b16 %v169_v28  ;;  %v571_v41 = vunpack.c.h.b16 %v169_v28 }
  0x3c   :  { %2399 = vmatpush.bf16.msra.mxu3 %v4562_v62  ;;  %v5673_v27 = vld [vmem:[#allocation2 + $0x558] sm:$0xf0]  ;;  %v5778_v30 = vld [vmem:[#allocation2 + $0x8a0] sm:$0xf0]  ;;  %v5121_v31 = vld [vmem:[#allocation2 + $0xa48] sm:$0xf]  ;;  %v4254_v37 = vor.u32 %v5617_v24, %v4253_v23 }
  0x3d   :  { %2361 = vmatpush.bf16.msra.mxu0 %v3862_v4  ;;  %v5834_v33 = vld [vmem:[#allocation2 + $0xa60] sm:$0xf0]  ;;  %v5551_v34 = vld [vmem:[#allocation2 + $0x18c] sm:$0xf]  ;;  %v4003_v35 = vld [vmem:[#allocation2 + $0x1a4] sm:$0xf0]  ;;  %v4478_v42 = vor.u32 %v5673_v27, %v4477_v26  ;;  %v4898_v43 = vor.u32 %v5778_v30, %v4897_v29  ;;  %v6266_v55 = vpack.c.b16 %v570_v40, %v570_v40  ;;  %v6268_v56 = vpack.c.b16 %v571_v41, %v571_v41 }
  0x3e   :  { %2374 = vmatpush.bf16.msra.mxu1 %v4086_v5  ;;  %v5149_v38 = vld [vmem:[#allocation2 + $0xa80] sm:$0xf]  ;;  %v5841_v39 = vld [vmem:[#allocation2 + $0xa98] sm:$0xf0]  ;;  %v5607_v44 = vld [vmem:[#allocation2 + $0x34c] sm:$0xf]  ;;  %v5122_v46 = vor.u32 %v5834_v33, %v5121_v31  ;;  %v4006_v47 = vor.u32 %v5551_v34, %v4003_v35 }
  0x3f   :  { %2387 = vmatpush.bf16.msra.mxu2 %v4310_v6  ;;  %v4227_v45 = vld [vmem:[#allocation2 + $0x364] sm:$0xf0]  ;;  %v4869_v48 = vld [vmem:[#allocation2 + $0x850] sm:$0xf]  ;;  %v5771_v49 = vld [vmem:[#allocation2 + $0x868] sm:$0xf0]  ;;  %v5150_v51 = vor.u32 %v5841_v39, %v5149_v38 }
  0x40   :  { %2400 = vmatpush.bf16.msra.mxu3 %v4534_v10  ;;  %v5093_v50 = vld [vmem:[#allocation2 + $0xa10] sm:$0xf]  ;;  %v5827_v52 = vld [vmem:[#allocation2 + $0xa28] sm:$0xf0]  ;;  %v5544_v53 = vld [vmem:[#allocation2 + $0x154] sm:$0xf]  ;;  %v4230_v57 = vor.u32 %v5607_v44, %v4227_v45  ;;  %v4870_v58 = vor.u32 %v5771_v49, %v4869_v48 }
  0x41   :  { %2362 = vmatpush.bf16.msra.mxu0 %v3834_v16  ;;  %v3975_v54 = vld [vmem:[#allocation2 + $0x16c] sm:$0xf0]  ;;  %v5600_v59 = vld [vmem:[#allocation2 + $0x314] sm:$0xf]  ;;  %v4841_v61 = vld [vmem:[#allocation2 + $0x818] sm:$0xf]  ;;  %v5094_v62 = vor.u32 %v5827_v52, %v5093_v50 }
  0x42   :  { %2375 = vmatpush.bf16.msra.mxu1 %v4058_v20  ;;  %v4199_v60 = vld [vmem:[#allocation2 + $0x32c] sm:$0xf0]  ;;  %v3978_v63 = vor.u32 %v5544_v53, %v3975_v54  ;;  %v5764_v0 = vld [vmem:[#allocation2 + $0x830] sm:$0xf0]  ;;  %v5065_v1 = vld [vmem:[#allocation2 + $0x9d8] sm:$0xf] }
  0x43   :  { %2388 = vmatpush.bf16.msra.mxu2 %v4282_v21  ;;  %v5820_v2 = vld [vmem:[#allocation2 + $0x9f0] sm:$0xf0]  ;;  %v5537_v3 = vld [vmem:[#allocation2 + $0x11c] sm:$0xf]  ;;  %v3947_v4 = vld [vmem:[#allocation2 + $0x134] sm:$0xf0]  ;;  %v4202_v8 = vor.u32 %v5600_v59, %v4199_v60  ;;  %v4842_v9 = vor.u32 %v5764_v0, %v4841_v61 }
  0x44   :  { %2401 = vmatpush.bf16.msra.mxu3 %v4506_v25  ;;  %v168_v5 = vld [vmem:[%s6393_s0] sm:$0xff]  ;;  %v5593_v10 = vld [vmem:[#allocation2 + $0x2dc] sm:$0xf]  ;;  %v4171_v11 = vld [vmem:[#allocation2 + $0x2f4] sm:$0xf0]  ;;  %v5066_v12 = vor.u32 %v5820_v2, %v5065_v1  ;;  %v3950_v13 = vor.u32 %v5537_v3, %v3947_v4 }
  0x45   :  { %2363 = vmatpush.bf16.msra.mxu0 %v3806_v32  ;;  %v568_v6 = vunpack.c.l.b16 %v168_v5  ;;  %v569_v7 = vunpack.c.h.b16 %v168_v5  ;;  %v4813_v14 = vld [vmem:[#allocation2 + $0x7e0] sm:$0xf]  ;;  %v5757_v15 = vld [vmem:[#allocation2 + $0x7f8] sm:$0xf0]  ;;  %v5530_v19 = vld [vmem:[#allocation2 + $0xe4] sm:$0xf]  ;;  %v4174_v22 = vor.u32 %v5593_v10, %v4171_v11 }
  0x46   :  { %2376 = vmatpush.bf16.msra.mxu1 %v4030_v36  ;;  %v5037_v16 = vld [vmem:[#allocation2 + $0x9a0] sm:$0xf]  ;;  %v5813_v18 = vld [vmem:[#allocation2 + $0x9b8] sm:$0xf0]  ;;  %v4814_v23 = vor.u32 %v5757_v15, %v4813_v14  ;;  %v5586_v24 = vld [vmem:[#allocation2 + $0x2a4] sm:$0xf] }
  0x47   :  { %2389 = vmatpush.bf16.msra.mxu2 %v4254_v37  ;;  %v6275_v17 = vpack.c.b16 %v568_v6, %v568_v6  ;;  %v3919_v20 = vld [vmem:[#allocation2 + $0xfc] sm:$0xf0]  ;;  %v6277_v21 = vpack.c.b16 %v569_v7, %v569_v7  ;;  %v5038_v26 = vor.u32 %v5813_v18, %v5037_v16  ;;  %v4785_v28 = vld [vmem:[#allocation2 + $0x7a8] sm:$0xf]  ;;  %v5750_v29 = vld [vmem:[#allocation2 + $0x7c0] sm:$0xf0] }
  0x48   :  { %2402 = vmatpush.bf16.msra.mxu3 %v4478_v42  ;;  %v4143_v25 = vld [vmem:[#allocation2 + $0x2bc] sm:$0xf0]  ;;  %v3922_v27 = vor.u32 %v5530_v19, %v3919_v20  ;;  %v5009_v30 = vld [vmem:[#allocation2 + $0x968] sm:$0xf]  ;;  %v5806_v31 = vld [vmem:[#allocation2 + $0x980] sm:$0xf0]  ;;  %v4786_v35 = vor.u32 %v5750_v29, %v4785_v28 }
  0x49   :  { %2408 = vmatpush.bf16.msrb.mxu0 %v4898_v43  ;;  %v5523_v32 = vld [vmem:[#allocation2 + $0xac] sm:$0xf]  ;;  %v3891_v33 = vld [vmem:[#allocation2 + $0xc4] sm:$0xf0]  ;;  %2377 = vmatmul.bf16.vlgmr.msra.gmra.mxu1 %v6277_v21  ;;  %v4146_v34 = vor.u32 %v5586_v24, %v4143_v25  ;;  %v171_v38 = vld [vmem:[%s6393_s0 + $0x18] sm:$0xf]  ;;  %v5010_v39 = vor.u32 %v5806_v31, %v5009_v30 }
  0x4a   :  { %2421 = vmatpush.bf16.msrb.mxu1 %v5122_v46  ;;  %2390 = vmatmul.bf16.vlgmr.msra.gmra.mxu2 %v6266_v55  ;;  %v5579_v36 = vld [vmem:[#allocation2 + $0x26c] sm:$0xf]  ;;  %v4115_v37 = vld [vmem:[#allocation2 + $0x284] sm:$0xf0]  ;;  %v3894_v40 = vor.u32 %v5523_v32, %v3891_v33  ;;  %v4757_v41 = vld [vmem:[#allocation2 + $0x770] sm:$0xf]  ;;  %v574_v44 = vunpack.c.l.b16 %v171_v38 }
  0x4b   :  { %2441 = vmatpush.bf16.msrb.mxu2 %v5150_v51  ;;  %2403 = vmatmul.bf16.vlgmr.msra.gmra.mxu3 %v6268_v56  ;;  %v5743_v42 = vld [vmem:[#allocation2 + $0x788] sm:$0xf0]  ;;  %v4981_v43 = vld [vmem:[#allocation2 + $0x930] sm:$0xf]  ;;  %v5516_v46 = vld [vmem:[#allocation2 + $0x74] sm:$0xf]  ;;  %v4118_v49 = vor.u32 %v5579_v36, %v4115_v37 }
  0x4c   :  { %2447 = vmatpush.bf16.msrb.mxu3 %v4006_v47  ;;  %2364 = vmatmul.bf16.vlgmr.msra.gmra.mxu0 %v6275_v17  ;;  %v5799_v45 = vld [vmem:[#allocation2 + $0x948] sm:$0xf0]  ;;  %v3863_v47 = vld [vmem:[#allocation2 + $0x8c] sm:$0xf0]  ;;  %v6284_v48 = vpack.c.b16 %v574_v44, %v574_v44  ;;  %v4758_v50 = vor.u32 %v5743_v42, %v4757_v41  ;;  %v5572_v51 = vld [vmem:[#allocation2 + $0x234] sm:$0xf] }
  0x4d   :  { %2409 = vmatpush.bf16.msrb.mxu0 %v4870_v58  ;;  %v4087_v52 = vld [vmem:[#allocation2 + $0x24c] sm:$0xf0]  ;;  %v4982_v53 = vor.u32 %v5799_v45, %v4981_v43  ;;  %v3866_v54 = vor.u32 %v5516_v46, %v3863_v47  ;;  %v5736_v58 = vld [vmem:[#allocation2 + $0x750] sm:$0xf0]  ;;  %v4953_v59 = vld [vmem:[#allocation2 + $0x8f8] sm:$0xf] }
  0x4e   :  { %2422 = vmatpush.bf16.msrb.mxu1 %v5094_v62  ;;  %v5792_v60 = vld [vmem:[#allocation2 + $0x910] sm:$0xf0]  ;;  %v5509_v61 = vld [vmem:[#allocation2 + $0x3c] sm:$0xf]  ;;  %v3835_v62 = vld [vmem:[#allocation2 + $0x54] sm:$0xf0]  ;;  %v4090_v0 = vor.u32 %v5572_v51, %v4087_v52 }
  0x4f   :  { %2460 = vmatpush.bf16.msra.mxu2 %v4230_v57  ;;  %v4729_v57 = vld [vmem:[#allocation2 + $0x738] sm:$0xf]  ;;  %v4701_v3 = vld [vmem:[#allocation2 + $0x700] sm:$0xf]  ;;  %v170_v4 = vld [vmem:[%s6393_s0 + $0x10] sm:$0xff]  ;;  %v4954_v5 = vor.u32 %v5792_v60, %v4953_v59  ;;  %v3838_v6 = vor.u32 %v5509_v61, %v3835_v62 }
  0x50   :  { %2448 = vmatpush.bf16.msrb.mxu3 %v3978_v63  ;;  %v5565_v63 = vld [vmem:[#allocation2 + $0x1fc] sm:$0xf]  ;;  %v4730_v1 = vor.u32 %v5736_v58, %v4729_v57  ;;  %v4059_v2 = vld [vmem:[#allocation2 + $0x214] sm:$0xf0]  ;;  %v5502_v10 = vld [vmem:[#allocation2 + $0x4] sm:$0xf]  ;;  %v572_v16 = vunpack.c.l.b16 %v170_v4 }
  0x51   :  { %2410 = vmatpush.bf16.msrb.mxu0 %v4842_v9  ;;  %v5729_v7 = vld [vmem:[#allocation2 + $0x718] sm:$0xf0]  ;;  %v3807_v11 = vld [vmem:[#allocation2 + $0x1c] sm:$0xf0]  ;;  %v5719_v14 = vld [vmem:[#allocation2 + $0x6cc] sm:$0xf]  ;;  %v4062_v18 = vor.u32 %v5565_v63, %v4059_v2 }
  0x52   :  { %2423 = vmatpush.bf16.msrb.mxu1 %v5066_v12  ;;  %v5785_v9 = vld [vmem:[#allocation2 + $0x8d8] sm:$0xf0]  ;;  %v5663_v12 = vld [vmem:[#allocation2 + $0x50c] sm:$0xf]  ;;  %v4675_v15 = vld [vmem:[#allocation2 + $0x6e4] sm:$0xf0]  ;;  %v4702_v19 = vor.u32 %v5729_v7, %v4701_v3  ;;  %v3810_v25 = vor.u32 %v5502_v10, %v3807_v11  ;;  %v6291_v37 = vpack.c.b16 %v572_v16, %v572_v16 }
  0x53   :  { %2461 = vmatpush.bf16.msra.mxu2 %v4202_v8  ;;  %v4925_v8 = vld [vmem:[#allocation2 + $0x8c0] sm:$0xf]  ;;  %v5775_v20 = vld [vmem:[#allocation2 + $0x88c] sm:$0xf]  ;;  %v4678_v29 = vor.u32 %v5719_v14, %v4675_v15  ;;  %v5123_v31 = vld [vmem:[#allocation2 + $0xa64] sm:$0xf0] }
  0x54   :  { %2449 = vmatpush.bf16.msrb.mxu3 %v3950_v13  ;;  %v4451_v13 = vld [vmem:[#allocation2 + $0x524] sm:$0xf0]  ;;  %v4926_v24 = vor.u32 %v5785_v9, %v4925_v8  ;;  %v5831_v30 = vld [vmem:[#allocation2 + $0xa4c] sm:$0xf]  ;;  %v5656_v32 = vld [vmem:[#allocation2 + $0x4d4] sm:$0xf] }
  0x55   :  { %2411 = vmatpush.bf16.msrb.mxu0 %v4814_v23  ;;  %v573_v23 = vunpack.c.h.b16 %v170_v4  ;;  %v4454_v28 = vor.u32 %v5663_v12, %v4451_v13  ;;  %v4647_v36 = vld [vmem:[#allocation2 + $0x6ac] sm:$0xf0]  ;;  %v5126_v42 = vor.u32 %v5831_v30, %v5123_v31  ;;  %v5824_v45 = vld [vmem:[#allocation2 + $0xa14] sm:$0xf]  ;;  %v5649_v47 = vld [vmem:[#allocation2 + $0x49c] sm:$0xf] }
  0x56   :  { %2424 = vmatpush.bf16.msrb.mxu1 %v5038_v26  ;;  %v5558_v26 = vld [vmem:[#allocation2 + $0x1c4] sm:$0xf]  ;;  %v5095_v46 = vld [vmem:[#allocation2 + $0xa2c] sm:$0xf0]  ;;  %v5705_v51 = vld [vmem:[#allocation2 + $0x65c] sm:$0xf] }
  0x57   :  { %2462 = vmatpush.bf16.msra.mxu2 %v4174_v22  ;;  %v4899_v22 = vld [vmem:[#allocation2 + $0x8a4] sm:$0xf0]  ;;  %v6293_v41 = vpack.c.b16 %v573_v23, %v573_v23  ;;  %v4619_v52 = vld [vmem:[#allocation2 + $0x674] sm:$0xf0]  ;;  %v5098_v57 = vor.u32 %v5824_v45, %v5095_v46  ;;  %v5817_v60 = vld [vmem:[#allocation2 + $0x9dc] sm:$0xf] }
  0x58   :  { %2450 = vmatpush.bf16.msrb.mxu3 %v3922_v27  ;;  %v4031_v27 = vld [vmem:[#allocation2 + $0x1dc] sm:$0xf0]  ;;  %v4902_v33 = vor.u32 %v5775_v20, %v4899_v22  ;;  %v4622_v59 = vor.u32 %v5705_v51, %v4619_v52  ;;  %v5067_v61 = vld [vmem:[#allocation2 + $0x9f4] sm:$0xf0]  ;;  %v5642_v62 = vld [vmem:[#allocation2 + $0x464] sm:$0xf] }
  0x59   :  { %2412 = vmatpush.bf16.msrb.mxu0 %v4786_v35  ;;  %v5712_v35 = vld [vmem:[#allocation2 + $0x694] sm:$0xf]  ;;  %v4034_v38 = vor.u32 %v5558_v26, %v4031_v27  ;;  %v4591_v2 = vld [vmem:[#allocation2 + $0x63c] sm:$0xf0]  ;;  %v5754_v3 = vld [vmem:[#allocation2 + $0x7e4] sm:$0xf] }
  0x5a   :  { %2425 = vmatpush.bf16.msrb.mxu1 %v5010_v39  ;;  %5175 = vmatmul.msk.bf16.vlgmr.msrb.gmra.mxu2 %vm2352_vm0, %v6284_v48  ;;  %v5768_v39 = vld [vmem:[#allocation2 + $0x854] sm:$0xf]  ;;  %v4650_v44 = vor.u32 %v5712_v35, %v4647_v36  ;;  %v4815_v4 = vld [vmem:[#allocation2 + $0x7fc] sm:$0xf0]  ;;  %v5810_v8 = vld [vmem:[#allocation2 + $0x9a4] sm:$0xf] }
  0x5b   :  { %2463 = vmatpush.bf16.msra.mxu2 %v4146_v34  ;;  %v4423_v34 = vld [vmem:[#allocation2 + $0x4ec] sm:$0xf0]  ;;  %v5039_v9 = vld [vmem:[#allocation2 + $0x9bc] sm:$0xf0]  ;;  %v5635_v10 = vld [vmem:[#allocation2 + $0x42c] sm:$0xf]  ;;  %v4818_v11 = vor.u32 %v5754_v3, %v4815_v4 }
  0x5c   :  { %2451 = vmatpush.bf16.msrb.mxu3 %v3894_v40  ;;  %v4871_v40 = vld [vmem:[#allocation2 + $0x86c] sm:$0xf0]  ;;  %v4426_v43 = vor.u32 %v5656_v32, %v4423_v34  ;;  %v4339_v12 = vld [vmem:[#allocation2 + $0x444] sm:$0xf0]  ;;  %v5691_v13 = vld [vmem:[#allocation2 + $0x5ec] sm:$0xf] }
  0x5d   :  { %2413 = vmatpush.bf16.msrb.mxu0 %v4758_v50  ;;  %v4395_v50 = vld [vmem:[#allocation2 + $0x4b4] sm:$0xf0]  ;;  %v4563_v14 = vld [vmem:[#allocation2 + $0x604] sm:$0xf0]  ;;  %v5747_v15 = vld [vmem:[#allocation2 + $0x7ac] sm:$0xf] }
  0x5e   :  { %2426 = vmatpush.bf16.msrb.mxu1 %v4982_v53  ;;  %v5761_v53 = vld [vmem:[#allocation2 + $0x81c] sm:$0xf]  ;;  %v4398_v58 = vor.u32 %v5649_v47, %v4395_v50  ;;  %v4787_v16 = vld [vmem:[#allocation2 + $0x7c4] sm:$0xf0]  ;;  %v4566_v20 = vor.u32 %v5691_v13, %v4563_v14  ;;  %v5803_v22 = vld [vmem:[#allocation2 + $0x96c] sm:$0xf] }
  0x5f   :  { %2464 = vmatpush.bf16.msra.mxu2 %v4118_v49  ;;  %v4874_v49 = vor.u32 %v5768_v39, %v4871_v40  ;;  %v5011_v23 = vld [vmem:[#allocation2 + $0x984] sm:$0xf0]  ;;  %v4311_v26 = vld [vmem:[#allocation2 + $0x40c] sm:$0xf0]  ;;  %v5684_v27 = vld [vmem:[#allocation2 + $0x5b4] sm:$0xf] }
  0x60   :  { %2452 = vmatpush.bf16.msrb.mxu3 %v3866_v54  ;;  %v4843_v54 = vld [vmem:[#allocation2 + $0x834] sm:$0xf0]  ;;  %v4759_v30 = vld [vmem:[#allocation2 + $0x78c] sm:$0xf0]  ;;  %v5014_v31 = vor.u32 %v5803_v22, %v5011_v23  ;;  %v5796_v32 = vld [vmem:[#allocation2 + $0x934] sm:$0xf] }
  0x61   :  { %2414 = vmatpush.bf16.msrb.mxu0 %v4730_v1  ;;  %v4846_v63 = vor.u32 %v5761_v53, %v4843_v54  ;;  %v5698_v1 = vld [vmem:[#allocation2 + $0x624] sm:$0xf]  ;;  %v4983_v35 = vld [vmem:[#allocation2 + $0x94c] sm:$0xf0]  ;;  %v5621_v36 = vld [vmem:[#allocation2 + $0x3bc] sm:$0xf] }
  0x62   :  { %2427 = vmatpush.bf16.msrb.mxu1 %v4954_v5  ;;  %v5070_v5 = vor.u32 %v5817_v60, %v5067_v61  ;;  %v4594_v7 = vor.u32 %v5698_v1, %v4591_v2  ;;  %v5677_v40 = vld [vmem:[#allocation2 + $0x57c] sm:$0xf]  ;;  %v4955_v46 = vld [vmem:[#allocation2 + $0x914] sm:$0xf0]  ;;  %v4986_v47 = vor.u32 %v5796_v32, %v4983_v35  ;;  %v4255_v50 = vld [vmem:[#allocation2 + $0x39c] sm:$0xf0] }
  0x63   :  { %2465 = vmatpush.bf16.msra.mxu2 %v4090_v0  ;;  %v4367_v0 = vld [vmem:[#allocation2 + $0x47c] sm:$0xf0]  ;;  %v5789_v45 = vld [vmem:[#allocation2 + $0x8fc] sm:$0xf]  ;;  %v5670_v51 = vld [vmem:[#allocation2 + $0x544] sm:$0xf] }
  0x64   :  { %2453 = vmatpush.bf16.msrb.mxu3 %v3838_v6  ;;  %v4370_v6 = vor.u32 %v5642_v62, %v4367_v0  ;;  %v4479_v54 = vld [vmem:[#allocation2 + $0x55c] sm:$0xf0]  ;;  %v4233_v60 = vld [vmem:[#allocation2 + $0x350] sm:$0xf]  ;;  %v5667_v62 = vld [vmem:[#allocation2 + $0x528] sm:$0xf0] }
  0x65   :  { %2415 = vmatpush.bf16.msrb.mxu0 %v4702_v19  ;;  %v4342_v19 = vor.u32 %v5635_v10, %v4339_v12  ;;  %v4457_v61 = vld [vmem:[#allocation2 + $0x510] sm:$0xf]  ;;  %v5611_v0 = vld [vmem:[#allocation2 + $0x368] sm:$0xf0]  ;;  %v5838_v1 = vld [vmem:[#allocation2 + $0xa84] sm:$0xf]  ;;  %v4482_v4 = vor.u32 %v5670_v51, %v4479_v54 }
  0x66   :  { %2428 = vmatpush.bf16.msrb.mxu1 %v4926_v24  ;;  %v5628_v24 = vld [vmem:[#allocation2 + $0x3f4] sm:$0xf]  ;;  %v5151_v2 = vld [vmem:[#allocation2 + $0xa9c] sm:$0xf0]  ;;  %v5555_v10 = vld [vmem:[#allocation2 + $0x1a8] sm:$0xf0] }
  0x67   :  { %2466 = vmatpush.bf16.msra.mxu2 %v4062_v18  ;;  %v5042_v18 = vor.u32 %v5810_v8, %v5039_v9  ;;  %v4458_v8 = vor.u32 %v5667_v62, %v4457_v61  ;;  %v4009_v9 = vld [vmem:[#allocation2 + $0x190] sm:$0xf]  ;;  %v5154_v12 = vor.u32 %v5838_v1, %v5151_v2  ;;  %v5723_v14 = vld [vmem:[#allocation2 + $0x6e8] sm:$0xf0]  ;;  %v4401_v32 = vld [vmem:[#allocation2 + $0x4a0] sm:$0xf] }
  0x68   :  { %2454 = vmatpush.bf16.msrb.mxu3 %v3810_v25  ;;  %2416 = vmatmul.bf16.vlgmr.msrb.gmra.mxu0 %v6291_v37  ;;  %v4790_v25 = vor.u32 %v5747_v15, %v4787_v16  ;;  %v4681_v13 = vld [vmem:[#allocation2 + $0x6d0] sm:$0xf]  ;;  %v4205_v15 = vld [vmem:[#allocation2 + $0x318] sm:$0xf]  ;;  %v5604_v16 = vld [vmem:[#allocation2 + $0x330] sm:$0xf0]  ;;  %v4010_v22 = vor.u32 %v5555_v10, %v4009_v9 }
  0x69   :  { %2473 = vmatpush.bf16.msra.mxu0 %v4454_v28  ;;  %2429 = vmatmul.bf16.vlgmr.msrb.gmra.mxu1 %v6293_v41  ;;  %v4535_v28 = vld [vmem:[#allocation2 + $0x5cc] sm:$0xf0]  ;;  %v4682_v23 = vor.u32 %v5723_v14, %v4681_v13  ;;  %v3925_v51 = vld [vmem:[#allocation2 + $0xe8] sm:$0xf]  ;;  %v5639_v62 = vld [vmem:[#allocation2 + $0x448] sm:$0xf0] }
  0x6a   :  { %2486 = vmatpush.bf16.msra.mxu1 %v4678_v29  ;;  %v5740_v29 = vld [vmem:[#allocation2 + $0x774] sm:$0xf]  ;;  %v4538_v34 = vor.u32 %v5684_v27, %v4535_v28  ;;  %v4653_v28 = vld [vmem:[#allocation2 + $0x698] sm:$0xf]  ;;  %v4345_v61 = vld [vmem:[#allocation2 + $0x430] sm:$0xf] }
  0x6b   :  { %2467 = vmatpush.bf16.msra.mxu2 %v4034_v38  ;;  %2455 = vmatmul.bf16.vlgmr.msrb.gmra.mxu3 %v6275_v17  ;;  %v4283_v38 = vld [vmem:[#allocation2 + $0x3d4] sm:$0xf0]  ;;  %v4762_v39 = vor.u32 %v5740_v29, %v4759_v30  ;;  %v5716_v29 = vld [vmem:[#allocation2 + $0x6b0] sm:$0xf0]  ;;  %v4177_v30 = vld [vmem:[#allocation2 + $0x2e0] sm:$0xf] }
  0x6c   :  { %2499 = vmatpush.bf16.msra.mxu3 %v4902_v33  ;;  %v4314_v33 = vor.u32 %v5628_v24, %v4311_v26  ;;  %v4286_v52 = vor.u32 %v5621_v36, %v4283_v38  ;;  %v3981_v24 = vld [vmem:[#allocation2 + $0x158] sm:$0xf]  ;;  %v4206_v26 = vor.u32 %v5604_v16, %v4205_v15  ;;  %v4654_v35 = vor.u32 %v5716_v29, %v4653_v28  ;;  %v3953_v36 = vld [vmem:[#allocation2 + $0x120] sm:$0xf]  ;;  %v5541_v38 = vld [vmem:[#allocation2 + $0x138] sm:$0xf0] }
  0x6d   :  { %2474 = vmatpush.bf16.msra.mxu0 %v4426_v43  ;;  %v5733_v43 = vld [vmem:[#allocation2 + $0x73c] sm:$0xf]  ;;  %v3897_v1 = vld [vmem:[#allocation2 + $0xb0] sm:$0xf]  ;;  %v5527_v2 = vld [vmem:[#allocation2 + $0xc8] sm:$0xf0] }
  0x6e   :  { %2487 = vmatpush.bf16.msra.mxu1 %v4650_v44  ;;  %2468 = vmatmul.bf16.vlgmr.msra.gmra.mxu2 %v6277_v21  ;;  %v4731_v44 = vld [vmem:[#allocation2 + $0x754] sm:$0xf0]  ;;  %v5632_v10 = vld [vmem:[#allocation2 + $0x410] sm:$0xf0]  ;;  %v5513_v28 = vld [vmem:[#allocation2 + $0x58] sm:$0xf0] }
  0x6f   :  { %2512 = vmatpush.bf16.msrb.mxu2 %v5126_v42  ;;  %v4507_v42 = vld [vmem:[#allocation2 + $0x594] sm:$0xf0]  ;;  %v5520_v14 = vld [vmem:[#allocation2 + $0x90] sm:$0xf0]  ;;  %v4513_v29 = vld [vmem:[#allocation2 + $0x580] sm:$0xf] }
  0x70   :  { %2500 = vmatpush.bf16.msra.mxu3 %v4874_v49  ;;  %v5614_v49 = vld [vmem:[#allocation2 + $0x384] sm:$0xf]  ;;  %v4510_v53 = vor.u32 %v5677_v40, %v4507_v42  ;;  %v4625_v42 = vld [vmem:[#allocation2 + $0x660] sm:$0xf]  ;;  %v4317_v9 = vld [vmem:[#allocation2 + $0x3f8] sm:$0xf] }
  0x71   :  { %2475 = vmatpush.bf16.msra.mxu0 %v4398_v58  ;;  %v4703_v58 = vld [vmem:[#allocation2 + $0x71c] sm:$0xf0]  ;;  %v4258_v3 = vor.u32 %v5614_v49, %v4255_v50  ;;  %v3954_v49 = vor.u32 %v5541_v38, %v3953_v36  ;;  %v3869_v13 = vld [vmem:[#allocation2 + $0x78] sm:$0xf]  ;;  %v4318_v16 = vor.u32 %v5632_v10, %v4317_v9  ;;  %v5618_v36 = vld [vmem:[#allocation2 + $0x3a0] sm:$0xf0] }
  0x72   :  { %2488 = vmatpush.bf16.msra.mxu1 %v4622_v59  ;;  %v4734_v59 = vor.u32 %v5733_v43, %v4731_v44  ;;  %v5709_v43 = vld [vmem:[#allocation2 + $0x678] sm:$0xf0]  ;;  %v4149_v44 = vld [vmem:[#allocation2 + $0x2a8] sm:$0xf]  ;;  %v5129_v38 = vld [vmem:[#allocation2 + $0xa50] sm:$0xf] }
  0x73   :  { %2513 = vmatpush.bf16.msrb.mxu2 %v5098_v57  ;;  %v5726_v57 = vld [vmem:[#allocation2 + $0x704] sm:$0xf]  ;;  %v4626_v50 = vor.u32 %v5709_v43, %v4625_v42  ;;  %v3983_v9 = vld [vmem:[#allocation2 + $0x174] sm:$0xf0]  ;;  %v5601_v10 = vld [vmem:[#allocation2 + $0x31c] sm:$0xf] }
  0x74   :  { %2501 = vmatpush.bf16.msra.mxu3 %v4846_v63  ;;  %v4958_v63 = vor.u32 %v5789_v45, %v4955_v46  ;;  %v5590_v45 = vld [vmem:[#allocation2 + $0x2c0] sm:$0xf0]  ;;  %v4373_v46 = vld [vmem:[#allocation2 + $0x468] sm:$0xf] }
  0x75   :  { %2476 = vmatpush.bf16.msra.mxu0 %v4370_v6  ;;  %v4927_v6 = vld [vmem:[#allocation2 + $0x8dc] sm:$0xf0]  ;;  %v5842_v42 = vld [vmem:[#allocation2 + $0xaa0] sm:$0xf0] }
  0x76   :  { %2489 = vmatpush.bf16.msra.mxu1 %v4594_v7  ;;  %v4706_v7 = vor.u32 %v5726_v57, %v4703_v58  ;;  %v4597_v57 = vld [vmem:[#allocation2 + $0x628] sm:$0xf]  ;;  %v5702_v58 = vld [vmem:[#allocation2 + $0x640] sm:$0xf0] }
  0x77   :  { %2514 = vmatpush.bf16.msrb.mxu2 %v5070_v5  ;;  %v5782_v5 = vld [vmem:[#allocation2 + $0x8c4] sm:$0xf] }
  0x78   :  { %2502 = vmatpush.bf16.msra.mxu3 %v4818_v11  ;;  %v4234_v11 = vor.u32 %v5611_v0, %v4233_v60  ;;  %v5583_v60 = vld [vmem:[#allocation2 + $0x288] sm:$0xf0]  ;;  %v4598_v0 = vor.u32 %v5702_v58, %v4597_v57  ;;  %v5552_v58 = vld [vmem:[#allocation2 + $0x194] sm:$0xf] }
  0x79   :  { %2477 = vmatpush.bf16.msra.mxu0 %v4342_v19  ;;  %v5660_v19 = vld [vmem:[#allocation2 + $0x4f0] sm:$0xf0]  ;;  %v5779_v57 = vld [vmem:[#allocation2 + $0x8a8] sm:$0xf0] }
  0x7a   :  { %2490 = vmatpush.bf16.msra.mxu1 %v4566_v20  ;;  %v4930_v20 = vor.u32 %v5782_v5, %v4927_v6  ;;  %v4569_v5 = vld [vmem:[#allocation2 + $0x5f0] sm:$0xf]  ;;  %v5695_v6 = vld [vmem:[#allocation2 + $0x608] sm:$0xf0] }
  0x7b   :  { %2515 = vmatpush.bf16.msrb.mxu2 %v5042_v18  ;;  %v4429_v18 = vld [vmem:[#allocation2 + $0x4d8] sm:$0xf] }
  0x7c   :  { %2503 = vmatpush.bf16.msra.mxu3 %v4790_v25  ;;  %v5548_v25 = vld [vmem:[#allocation2 + $0x170] sm:$0xf0]  ;;  %v4430_v27 = vor.u32 %v5660_v19, %v4429_v18  ;;  %v4541_v18 = vld [vmem:[#allocation2 + $0x5b8] sm:$0xf] }
  0x7d   :  { %2478 = vmatpush.bf16.msra.mxu0 %v4314_v33  ;;  %v5653_v33 = vld [vmem:[#allocation2 + $0x4b8] sm:$0xf0]  ;;  %v5688_v19 = vld [vmem:[#allocation2 + $0x5d0] sm:$0xf0] }
  0x7e   :  { %2491 = vmatpush.bf16.msra.mxu1 %v4538_v34  ;;  %v3982_v34 = vor.u32 %v5548_v25, %v3981_v24  ;;  %v4402_v40 = vor.u32 %v5653_v33, %v4401_v32  ;;  %v5625_v24 = vld [vmem:[#allocation2 + $0x3d8] sm:$0xf0]  ;;  %v3870_v25 = vor.u32 %v5520_v14, %v3869_v13  ;;  %v4037_v33 = vld [vmem:[#allocation2 + $0x1c8] sm:$0xf] }
  0x7f   :  { %2516 = vmatpush.bf16.msrb.mxu2 %v5014_v31  ;;  %v5597_v31 = vld [vmem:[#allocation2 + $0x2f8] sm:$0xf0] }
  0x80   :  { %2504 = vmatpush.bf16.msra.mxu3 %v4762_v39  ;;  %v4178_v39 = vor.u32 %v5597_v31, %v4177_v30  ;;  %v5681_v32 = vld [vmem:[#allocation2 + $0x598] sm:$0xf0] }
  0x81   :  { %2479 = vmatpush.bf16.msra.mxu0 %v4286_v52  ;;  %v5534_v52 = vld [vmem:[#allocation2 + $0x100] sm:$0xf0]  ;;  %v5821_v13 = vld [vmem:[#allocation2 + $0x9f8] sm:$0xf0] }
  0x82   :  { %2492 = vmatpush.bf16.msra.mxu1 %v4510_v53  ;;  %v4150_v53 = vor.u32 %v5590_v45, %v4149_v44  ;;  %v4514_v44 = vor.u32 %v5681_v32, %v4513_v29  ;;  %v3813_v45 = vld [vmem:[#allocation2 + $0x8] sm:$0xf]  ;;  %v5758_v32 = vld [vmem:[#allocation2 + $0x800] sm:$0xf0] }
  0x83   :  { %2517 = vmatpush.bf16.msrb.mxu2 %v4986_v47  ;;  %v5646_v47 = vld [vmem:[#allocation2 + $0x480] sm:$0xf0] }
  0x84   :  { %2505 = vmatpush.bf16.msra.mxu3 %v4734_v59  ;;  %v4374_v54 = vor.u32 %v5646_v47, %v4373_v46  ;;  %v4121_v59 = vld [vmem:[#allocation2 + $0x270] sm:$0xf] }
  0x85   :  { %2480 = vmatpush.bf16.msra.mxu0 %v4258_v3  ;;  %v4122_v3 = vor.u32 %v5583_v60, %v4121_v59  ;;  %v4011_v59 = vld [vmem:[#allocation2 + $0x1ac] sm:$0xf0]  ;;  %v5608_v60 = vld [vmem:[#allocation2 + $0x354] sm:$0xf] }
  0x86   :  { %2493 = vmatpush.bf16.msra.mxu1 %v4482_v4  ;;  %v4346_v4 = vor.u32 %v5639_v62, %v4345_v61  ;;  %v4235_v61 = vld [vmem:[#allocation2 + $0x36c] sm:$0xf0] }
  0x87   :  { %2518 = vmatpush.bf16.msrb.mxu2 %v4958_v63  ;;  %v3926_v63 = vor.u32 %v5534_v52, %v3925_v51  ;;  %v5674_v51 = vld [vmem:[#allocation2 + $0x560] sm:$0xf0] }
  0x88   :  { %2506 = vmatpush.bf16.msra.mxu3 %v4706_v7  ;;  %2481 = vmatmul.bf16.vlgmr.msra.gmra.mxu0 %v6266_v55  ;;  %v4093_v7 = vld [vmem:[#allocation2 + $0x238] sm:$0xf] }
  0x89   :  { %2564 = vmatpush.bf16.msrb.mxu0 %v4458_v8  ;;  %2494 = vmatmul.bf16.vlgmr.msra.gmra.mxu1 %v6268_v56  ;;  %v5576_v8 = vld [vmem:[#allocation2 + $0x250] sm:$0xf0] }
  0x8a   :  { %2532 = vmatpush.bf16.msrb.mxu1 %v5154_v12  ;;  %v4570_v12 = vor.u32 %v5695_v6, %v4569_v5  ;;  %v4094_v15 = vor.u32 %v5576_v8, %v4093_v7  ;;  %v4877_v5 = vld [vmem:[#allocation2 + $0x858] sm:$0xf]  ;;  %v5772_v6 = vld [vmem:[#allocation2 + $0x870] sm:$0xf0]  ;;  %v5545_v7 = vld [vmem:[#allocation2 + $0x15c] sm:$0xf] }
  0x8b   :  { %2507 = vmatmul.bf16.vlgmr.msra.gmra.mxu3 %v6291_v37  ;;  %2519 = vmatpush.bf16.msrb.mxu2 %v4930_v20  ;;  %v4065_v20 = vld [vmem:[#allocation2 + $0x200] sm:$0xf]  ;;  %v4878_v14 = vor.u32 %v5772_v6, %v4877_v5 }
  0x8c   :  { %2551 = vmatpush.bf16.msrb.mxu3 %v4234_v11  ;;  %v3898_v11 = vor.u32 %v5527_v2, %v3897_v1  ;;  %v5828_v1 = vld [vmem:[#allocation2 + $0xa30] sm:$0xf0] }
  0x8d   :  { %2565 = vmatpush.bf16.msrb.mxu0 %v4430_v27  ;;  %v3841_v27 = vld [vmem:[#allocation2 + $0x40] sm:$0xf] }
  0x8e   :  { %2538 = vmatpush.bf16.msra.mxu1 %v4010_v22  ;;  %2520 = vmatmul.bf16.vlgmr.msrb.gmra.mxu2 %v6293_v41  ;;  %v5569_v22 = vld [vmem:[#allocation2 + $0x218] sm:$0xf0]  ;;  %v3842_v43 = vor.u32 %v5513_v28, %v3841_v27  ;;  %v5814_v27 = vld [vmem:[#allocation2 + $0x9c0] sm:$0xf0] }
  0x8f   :  { %2577 = vmatpush.bf16.msra.mxu2 %v4682_v23  ;;  %v4289_v23 = vld [vmem:[#allocation2 + $0x3c0] sm:$0xf]  ;;  %v4066_v30 = vor.u32 %v5569_v22, %v4065_v20  ;;  %v5538_v20 = vld [vmem:[#allocation2 + $0x124] sm:$0xf] }
  0x90   :  { %2552 = vmatpush.bf16.msrb.mxu3 %v4206_v26  ;;  %v4542_v26 = vor.u32 %v5688_v19, %v4541_v18  ;;  %v4290_v31 = vor.u32 %v5625_v24, %v4289_v23  ;;  %v4849_v18 = vld [vmem:[#allocation2 + $0x820] sm:$0xf]  ;;  %v5765_v19 = vld [vmem:[#allocation2 + $0x838] sm:$0xf0]  ;;  %v5594_v24 = vld [vmem:[#allocation2 + $0x2e4] sm:$0xf] }
  0x91   :  { %2566 = vmatpush.bf16.msrb.mxu0 %v4402_v40  ;;  %v5157_v40 = vld [vmem:[#allocation2 + $0xa88] sm:$0xf]  ;;  %v3955_v23 = vld [vmem:[#allocation2 + $0x13c] sm:$0xf0]  ;;  %v4850_v28 = vor.u32 %v5765_v19, %v4849_v18  ;;  %v5720_v19 = vld [vmem:[#allocation2 + $0x6d4] sm:$0xf] }
  0x92   :  { %2539 = vmatpush.bf16.msra.mxu1 %v3982_v34  ;;  %v5562_v34 = vld [vmem:[#allocation2 + $0x1e0] sm:$0xf0]  ;;  %v3958_v29 = vor.u32 %v5538_v20, %v3955_v23  ;;  %v4683_v20 = vld [vmem:[#allocation2 + $0x6ec] sm:$0xf0] }
  0x93   :  { %2578 = vmatpush.bf16.msra.mxu2 %v4654_v35  ;;  %v4261_v35 = vld [vmem:[#allocation2 + $0x388] sm:$0xf]  ;;  %v4038_v46 = vor.u32 %v5562_v34, %v4037_v33  ;;  %v5531_v33 = vld [vmem:[#allocation2 + $0xec] sm:$0xf] }
  0x94   :  { %2553 = vmatpush.bf16.msrb.mxu3 %v4178_v39  ;;  %v5835_v39 = vld [vmem:[#allocation2 + $0xa68] sm:$0xf0]  ;;  %v4262_v47 = vor.u32 %v5618_v36, %v4261_v35  ;;  %v3927_v35 = vld [vmem:[#allocation2 + $0x104] sm:$0xf0] }
  0x95   :  { %2567 = vmatpush.bf16.msrb.mxu0 %v4374_v54  ;;  %v5130_v52 = vor.u32 %v5835_v39, %v5129_v38  ;;  %v4905_v54 = vld [vmem:[#allocation2 + $0x890] sm:$0xf]  ;;  %v5587_v36 = vld [vmem:[#allocation2 + $0x2ac] sm:$0xf]  ;;  %v4151_v38 = vld [vmem:[#allocation2 + $0x2c4] sm:$0xf0] }
  0x96   :  { %2540 = vmatpush.bf16.msra.mxu1 %v3954_v49  ;;  %v5506_v49 = vld [vmem:[#allocation2 + $0x20] sm:$0xf0]  ;;  %v4906_v2 = vor.u32 %v5779_v57, %v4905_v54  ;;  %v5017_v39 = vld [vmem:[#allocation2 + $0x970] sm:$0xf]  ;;  %v5800_v54 = vld [vmem:[#allocation2 + $0x950] sm:$0xf0] }
  0x97   :  { %2579 = vmatpush.bf16.msra.mxu2 %v4626_v50  ;;  %v4485_v50 = vld [vmem:[#allocation2 + $0x548] sm:$0xf]  ;;  %v3814_v62 = vor.u32 %v5506_v49, %v3813_v45  ;;  %v4793_v45 = vld [vmem:[#allocation2 + $0x7b0] sm:$0xf] }
  0x98   :  { %2554 = vmatpush.bf16.msrb.mxu3 %v4150_v53  ;;  %v5158_v53 = vor.u32 %v5842_v42, %v5157_v40  ;;  %v5807_v40 = vld [vmem:[#allocation2 + $0x988] sm:$0xf0] }
  0x99   :  { %2568 = vmatpush.bf16.msrb.mxu0 %v4346_v4  ;;  %5176 = vmatmul.msk.bf16.vlgmr.msrb.gmra.mxu1 %vm2352_vm0, %v6284_v48  ;;  %v4238_v4 = vor.u32 %v5608_v60, %v4235_v61  ;;  %v5018_v49 = vor.u32 %v5807_v40, %v5017_v39  ;;  %v4765_v60 = vld [vmem:[#allocation2 + $0x778] sm:$0xf]  ;;  %v5744_v61 = vld [vmem:[#allocation2 + $0x790] sm:$0xf0]  ;;  %v5131_v39 = vld [vmem:[#allocation2 + $0xa6c] sm:$0xf0] }
  0x9a   :  { %2541 = vmatpush.bf16.msra.mxu1 %v3926_v63  ;;  %v4486_v63 = vor.u32 %v5674_v51, %v4485_v50  ;;  %v3899_v50 = vld [vmem:[#allocation2 + $0xcc] sm:$0xf0]  ;;  %v5580_v51 = vld [vmem:[#allocation2 + $0x274] sm:$0xf]  ;;  %v4766_v5 = vor.u32 %v5744_v61, %v4765_v60 }
  0x9b   :  { %2580 = vmatpush.bf16.msra.mxu2 %v4598_v0  ;;  %v5101_v0 = vld [vmem:[#allocation2 + $0xa18] sm:$0xf] }
  0x9c   :  { %2555 = vmatpush.bf16.msrb.mxu3 %v4122_v3  ;;  %v4014_v3 = vor.u32 %v5552_v58, %v4011_v59  ;;  %v5102_v8 = vor.u32 %v5828_v1, %v5101_v0  ;;  %v3871_v0 = vld [vmem:[#allocation2 + $0x94] sm:$0xf0]  ;;  %v5573_v1 = vld [vmem:[#allocation2 + $0x23c] sm:$0xf] }
  0x9d   :  { %2569 = vmatpush.bf16.msrb.mxu0 %v4318_v16 }
  0x9e   :  { %2542 = vmatpush.bf16.msra.mxu1 %v3898_v11  ;;  %v4207_v11 = vld [vmem:[#allocation2 + $0x334] sm:$0xf0] }
  0x9f   :  { %2581 = vmatpush.bf16.msra.mxu2 %v4570_v12  ;;  %v5073_v12 = vld [vmem:[#allocation2 + $0x9e0] sm:$0xf]  ;;  %v4210_v16 = vor.u32 %v5601_v10, %v4207_v11  ;;  %v5510_v10 = vld [vmem:[#allocation2 + $0x44] sm:$0xf] }
  0xa0   :  { %2556 = vmatpush.bf16.msrb.mxu3 %v4094_v15  ;;  %v3986_v15 = vor.u32 %v5545_v7, %v3983_v9  ;;  %v5074_v22 = vor.u32 %v5821_v13, %v5073_v12  ;;  %v5737_v9 = vld [vmem:[#allocation2 + $0x758] sm:$0xf0]  ;;  %v3843_v12 = vld [vmem:[#allocation2 + $0x5c] sm:$0xf0]  ;;  %v5566_v13 = vld [vmem:[#allocation2 + $0x204] sm:$0xf] }
  0xa1   :  { %2570 = vmatpush.bf16.msrb.mxu0 %v4290_v31  ;;  %v4821_v31 = vld [vmem:[#allocation2 + $0x7e8] sm:$0xf] }
  0xa2   :  { %2543 = vmatpush.bf16.msra.mxu1 %v3870_v25  ;;  %v4179_v25 = vld [vmem:[#allocation2 + $0x2fc] sm:$0xf0]  ;;  %v4822_v42 = vor.u32 %v5758_v32, %v4821_v31  ;;  %v4686_v31 = vor.u32 %v5720_v19, %v4683_v20  ;;  %v5664_v32 = vld [vmem:[#allocation2 + $0x514] sm:$0xf]  ;;  %v4571_v20 = vld [vmem:[#allocation2 + $0x60c] sm:$0xf0] }
  0xa3   :  { %2582 = vmatpush.bf16.msra.mxu2 %v4542_v26  ;;  %v5045_v26 = vld [vmem:[#allocation2 + $0x9a8] sm:$0xf]  ;;  %v5692_v19 = vld [vmem:[#allocation2 + $0x5f4] sm:$0xf] }
  0xa4   :  { %2557 = vmatpush.bf16.msrb.mxu3 %v4066_v30  ;;  %v4182_v30 = vor.u32 %v5594_v24, %v4179_v25  ;;  %v5046_v34 = vor.u32 %v5814_v27, %v5045_v26  ;;  %v4709_v24 = vld [vmem:[#allocation2 + $0x708] sm:$0xf]  ;;  %v5730_v25 = vld [vmem:[#allocation2 + $0x720] sm:$0xf0]  ;;  %v5503_v26 = vld [vmem:[#allocation2 + $0xc] sm:$0xf] }
  0xa5   :  { %2571 = vmatpush.bf16.msrb.mxu0 %v4262_v47  ;;  %v5524_v47 = vld [vmem:[#allocation2 + $0xb4] sm:$0xf] }
  0xa6   :  { %2544 = vmatpush.bf16.msra.mxu1 %v3842_v43  ;;  %v3930_v43 = vor.u32 %v5531_v33, %v3927_v35  ;;  %v3902_v58 = vor.u32 %v5524_v47, %v3899_v50  ;;  %v4459_v33 = vld [vmem:[#allocation2 + $0x52c] sm:$0xf0]  ;;  %v4710_v35 = vor.u32 %v5730_v25, %v4709_v24  ;;  %v4431_v50 = vld [vmem:[#allocation2 + $0x4f4] sm:$0xf0]  ;;  %v5636_v25 = vld [vmem:[#allocation2 + $0x434] sm:$0xf] }
  0xa7   :  { %2583 = vmatpush.bf16.msra.mxu2 %v4514_v44  ;;  %v4154_v44 = vor.u32 %v5587_v36, %v4151_v38  ;;  %v4907_v36 = vld [vmem:[#allocation2 + $0x8ac] sm:$0xf0]  ;;  %v5832_v38 = vld [vmem:[#allocation2 + $0xa54] sm:$0xf] }
  0xa8   :  { %2558 = vmatpush.bf16.msrb.mxu3 %v4038_v46  ;;  %2572 = vmatmul.bf16.vlgmr.msrb.gmra.mxu0 %v6266_v55  ;;  %v5751_v46 = vld [vmem:[#allocation2 + $0x7c8] sm:$0xf0]  ;;  %v5134_v47 = vor.u32 %v5832_v38, %v5131_v39 }
  0xa9   :  { %2623 = vmatpush.bf16.msra.mxu0 %v5158_v53  ;;  %v4989_v53 = vld [vmem:[#allocation2 + $0x938] sm:$0xf]  ;;  %v4794_v57 = vor.u32 %v5751_v46, %v4793_v45  ;;  %v4462_v45 = vor.u32 %v5664_v32, %v4459_v33  ;;  %v5685_v33 = vld [vmem:[#allocation2 + $0x5bc] sm:$0xf] }
  0xaa   :  { %2545 = vmatpush.bf16.msra.mxu1 %v3814_v62  ;;  %v5517_v62 = vld [vmem:[#allocation2 + $0x7c] sm:$0xf] }
  0xab   :  { %2584 = vmatpush.bf16.msra.mxu2 %v4486_v63  ;;  %2559 = vmatmul.bf16.vlgmr.msrb.gmra.mxu3 %v6277_v21  ;;  %v4990_v63 = vor.u32 %v5800_v54, %v4989_v53  ;;  %v3874_v6 = vor.u32 %v5517_v62, %v3871_v0  ;;  %v4879_v53 = vld [vmem:[#allocation2 + $0x874] sm:$0xf0]  ;;  %v5825_v54 = vld [vmem:[#allocation2 + $0xa1c] sm:$0xf]  ;;  %v4403_v0 = vld [vmem:[#allocation2 + $0x4bc] sm:$0xf0] }
  0xac   :  { %2603 = vmatpush.bf16.msra.mxu3 %v5130_v52  ;;  %v4123_v52 = vld [vmem:[#allocation2 + $0x28c] sm:$0xf0] }
  0xad   :  { %2642 = vmatpush.bf16.msrb.mxu0 %v4238_v4  ;;  %2546 = vmatmul.bf16.vlgmr.msra.gmra.mxu1 %v6275_v17  ;;  %v4126_v59 = vor.u32 %v5580_v51, %v4123_v52  ;;  %v5793_v4 = vld [vmem:[#allocation2 + $0x918] sm:$0xf0] }
  0xae   :  { %2590 = vmatpush.bf16.msrb.mxu1 %v4906_v2  ;;  %2585 = vmatmul.bf16.vlgmr.msra.gmra.mxu2 %v6268_v56  ;;  %v4095_v2 = vld [vmem:[#allocation2 + $0x254] sm:$0xf0]  ;;  %v5769_v51 = vld [vmem:[#allocation2 + $0x85c] sm:$0xf] }
  0xaf   :  { %2629 = vmatpush.bf16.msrb.mxu2 %v4014_v3  ;;  %v4961_v3 = vld [vmem:[#allocation2 + $0x900] sm:$0xf]  ;;  %v4098_v7 = vor.u32 %v5573_v1, %v4095_v2  ;;  %v4882_v61 = vor.u32 %v5769_v51, %v4879_v53  ;;  %v5762_v1 = vld [vmem:[#allocation2 + $0x824] sm:$0xf] }
  0xb0   :  { %2604 = vmatpush.bf16.msra.mxu3 %v5102_v8  ;;  %v4737_v8 = vld [vmem:[#allocation2 + $0x740] sm:$0xf]  ;;  %v4962_v11 = vor.u32 %v5793_v4, %v4961_v3  ;;  %v5818_v4 = vld [vmem:[#allocation2 + $0x9e4] sm:$0xf] }
  0xb1   :  { %2643 = vmatpush.bf16.msrb.mxu0 %v4210_v16  ;;  %v5786_v16 = vld [vmem:[#allocation2 + $0x8e0] sm:$0xf0]  ;;  %v4738_v18 = vor.u32 %v5737_v9, %v4737_v8  ;;  %v4851_v3 = vld [vmem:[#allocation2 + $0x83c] sm:$0xf0] }
  0xb2   :  { %2591 = vmatpush.bf16.msrb.mxu1 %v4878_v14  ;;  %v4067_v14 = vld [vmem:[#allocation2 + $0x21c] sm:$0xf0]  ;;  %v4854_v9 = vor.u32 %v5762_v1, %v4851_v3  ;;  %v5790_v1 = vld [vmem:[#allocation2 + $0x904] sm:$0xf] }
  0xb3   :  { %2630 = vmatpush.bf16.msrb.mxu2 %v3986_v15  ;;  %v4933_v15 = vld [vmem:[#allocation2 + $0x8c8] sm:$0xf]  ;;  %v4070_v23 = vor.u32 %v5566_v13, %v4067_v14  ;;  %v5755_v13 = vld [vmem:[#allocation2 + $0x7ec] sm:$0xf]  ;;  %v4515_v53 = vld [vmem:[#allocation2 + $0x59c] sm:$0xf0] }
  0xb4   :  { %2605 = vmatpush.bf16.msra.mxu3 %v5074_v22  ;;  %v3846_v22 = vor.u32 %v5510_v10, %v3843_v12  ;;  %v4934_v27 = vor.u32 %v5786_v16, %v4933_v15  ;;  %v4375_v12 = vld [vmem:[#allocation2 + $0x484] sm:$0xf0]  ;;  %v5811_v16 = vld [vmem:[#allocation2 + $0x9ac] sm:$0xf] }
  0xb5   :  { %2644 = vmatpush.bf16.msrb.mxu0 %v4182_v30  ;;  %v4039_v30 = vld [vmem:[#allocation2 + $0x1e4] sm:$0xf0] }
  0xb6   :  { %2592 = vmatpush.bf16.msrb.mxu1 %v4850_v28  ;;  %v3815_v28 = vld [vmem:[#allocation2 + $0x24] sm:$0xf0] }
  0xb7   :  { %2631 = vmatpush.bf16.msrb.mxu2 %v3958_v29  ;;  %v5559_v29 = vld [vmem:[#allocation2 + $0x1cc] sm:$0xf]  ;;  %v3818_v40 = vor.u32 %v5503_v26, %v3815_v28  ;;  %v4823_v15 = vld [vmem:[#allocation2 + $0x804] sm:$0xf0]  ;;  %v4347_v26 = vld [vmem:[#allocation2 + $0x44c] sm:$0xf0]  ;;  %v4574_v28 = vor.u32 %v5692_v19, %v4571_v20 }
  0xb8   :  { %2606 = vmatpush.bf16.msra.mxu3 %v5046_v34  ;;  %5177 = vmatmul.msk.bf16.vlgmr.msra.gmra.mxu0 %vm2352_vm0, %v6284_v48  ;;  %v5776_v34 = vld [vmem:[#allocation2 + $0x894] sm:$0xf]  ;;  %v4711_v20 = vld [vmem:[#allocation2 + $0x724] sm:$0xf0] }
  0xb9   :  { %2645 = vmatpush.bf16.msrb.mxu0 %v4154_v44  ;;  %v4042_v44 = vor.u32 %v5559_v29, %v4039_v30  ;;  %v4910_v46 = vor.u32 %v5776_v34, %v4907_v36  ;;  %v4795_v29 = vld [vmem:[#allocation2 + $0x7cc] sm:$0xf0]  ;;  %v5804_v30 = vld [vmem:[#allocation2 + $0x974] sm:$0xf]  ;;  %v4543_v34 = vld [vmem:[#allocation2 + $0x5d4] sm:$0xf0] }
  0xba   :  { %2593 = vmatpush.bf16.msrb.mxu1 %v4822_v42  ;;  %v5713_v42 = vld [vmem:[#allocation2 + $0x69c] sm:$0xf] }
  0xbb   :  { %2632 = vmatpush.bf16.msrb.mxu2 %v3930_v43  ;;  %v4655_v43 = vld [vmem:[#allocation2 + $0x6b4] sm:$0xf0] }
  0xbc   :  { %2607 = vmatpush.bf16.msra.mxu3 %v5018_v49  ;;  %v5657_v49 = vld [vmem:[#allocation2 + $0x4dc] sm:$0xf]  ;;  %v4658_v52 = vor.u32 %v5713_v42, %v4655_v43  ;;  %v4319_v43 = vld [vmem:[#allocation2 + $0x414] sm:$0xf0] }
  0xbd   :  { %2646 = vmatpush.bf16.msrb.mxu0 %v4126_v59  ;;  %v4627_v59 = vld [vmem:[#allocation2 + $0x67c] sm:$0xf0]  ;;  %v4434_v60 = vor.u32 %v5657_v49, %v4431_v50  ;;  %v5629_v42 = vld [vmem:[#allocation2 + $0x3fc] sm:$0xf]  ;;  %v4991_v50 = vld [vmem:[#allocation2 + $0x954] sm:$0xf0] }
  0xbe   :  { %2594 = vmatpush.bf16.msrb.mxu1 %v4794_v57  ;;  %v5103_v57 = vld [vmem:[#allocation2 + $0xa34] sm:$0xf0]  ;;  %v5797_v49 = vld [vmem:[#allocation2 + $0x93c] sm:$0xf] }
  0xbf   :  { %2633 = vmatpush.bf16.msrb.mxu2 %v3902_v58  ;;  %v5706_v58 = vld [vmem:[#allocation2 + $0x664] sm:$0xf]  ;;  %v5106_v62 = vor.u32 %v5825_v54, %v5103_v57  ;;  %v4322_v54 = vor.u32 %v5629_v42, %v4319_v43  ;;  %v4437_v43 = vld [vmem:[#allocation2 + $0x4e0] sm:$0xf] }
  0xc0   :  { %2608 = vmatpush.bf16.msra.mxu3 %v4990_v63  ;;  %v5650_v63 = vld [vmem:[#allocation2 + $0x4a4] sm:$0xf]  ;;  %v4630_v2 = vor.u32 %v5706_v58, %v4627_v59  ;;  %v4994_v59 = vor.u32 %v5797_v49, %v4991_v50 }
  0xc1   :  { %2647 = vmatpush.bf16.msrb.mxu0 %v4098_v7  ;;  %v4599_v7 = vld [vmem:[#allocation2 + $0x644] sm:$0xf0]  ;;  %v4406_v8 = vor.u32 %v5650_v63, %v4403_v0  ;;  %v4739_v0 = vld [vmem:[#allocation2 + $0x75c] sm:$0xf0]  ;;  %v5542_v49 = vld [vmem:[#allocation2 + $0x140] sm:$0xf0] }
  0xc2   :  { %2595 = vmatpush.bf16.msrb.mxu1 %v4766_v5  ;;  %v5075_v5 = vld [vmem:[#allocation2 + $0x9fc] sm:$0xf0] }
  0xc3   :  { %2634 = vmatpush.bf16.msrb.mxu2 %v3874_v6  ;;  %v5699_v6 = vld [vmem:[#allocation2 + $0x62c] sm:$0xf]  ;;  %v5078_v10 = vor.u32 %v5818_v4, %v5075_v5 }
  0xc4   :  { %2609 = vmatpush.bf16.msra.mxu3 %v4962_v11  ;;  %v5643_v11 = vld [vmem:[#allocation2 + $0x46c] sm:$0xf]  ;;  %v4602_v14 = vor.u32 %v5699_v6, %v4599_v7  ;;  %v4487_v6 = vld [vmem:[#allocation2 + $0x564] sm:$0xf0] }
  0xc5   :  { %2648 = vmatpush.bf16.msrb.mxu0 %v4070_v23  ;;  %v4826_v23 = vor.u32 %v5755_v13, %v4823_v15  ;;  %v5671_v5 = vld [vmem:[#allocation2 + $0x54c] sm:$0xf]  ;;  %v4263_v15 = vld [vmem:[#allocation2 + $0x3a4] sm:$0xf0] }
  0xc6   :  { %2596 = vmatpush.bf16.msrb.mxu1 %v4738_v18  ;;  %v5047_v18 = vld [vmem:[#allocation2 + $0x9c4] sm:$0xf0]  ;;  %v4490_v19 = vor.u32 %v5671_v5, %v4487_v6  ;;  %v5598_v6 = vld [vmem:[#allocation2 + $0x300] sm:$0xf0] }
  0xc7   :  { %2635 = vmatpush.bf16.msrb.mxu2 %v3846_v22  ;;  %v4378_v22 = vor.u32 %v5643_v11, %v4375_v12  ;;  %v5050_v24 = vor.u32 %v5811_v16, %v5047_v18  ;;  %v5727_v16 = vld [vmem:[#allocation2 + $0x70c] sm:$0xf]  ;;  %v4185_v5 = vld [vmem:[#allocation2 + $0x2e8] sm:$0xf] }
  0xc8   :  { %2610 = vmatpush.bf16.msra.mxu3 %v4934_v27  ;;  %v5748_v27 = vld [vmem:[#allocation2 + $0x7b4] sm:$0xf] }
  0xc9   :  { %2649 = vmatpush.bf16.msrb.mxu0 %v4042_v44  ;;  %v2365_v32 = vpop.f32.mrf.mxu0  ;;  %v4798_v39 = vor.u32 %v5748_v27, %v4795_v29  ;;  %v5741_v44 = vld [vmem:[#allocation2 + $0x77c] sm:$0xf]  ;;  %v4689_v27 = vld [vmem:[#allocation2 + $0x6d8] sm:$0xf]  ;;  %v5724_v29 = vld [vmem:[#allocation2 + $0x6f0] sm:$0xf0] }
  0xca   :  { %2597 = vmatpush.bf16.msrb.mxu1 %v4710_v35  ;;  %v4350_v35 = vor.u32 %v5636_v25, %v4347_v26  ;;  %v4465_v25 = vld [vmem:[#allocation2 + $0x518] sm:$0xf]  ;;  %v5668_v26 = vld [vmem:[#allocation2 + $0x530] sm:$0xf0] }
  0xcb   :  { %2611 = vmatmul.bf16.vlgmr.msra.gmra.mxu3 %v6293_v41  ;;  %2636 = vmatpush.bf16.msrb.mxu2 %v3818_v40 }
  0xcc   :  { %2668 = vmatpush.bf16.msrb.mxu3 %v4686_v31  ;;  %2650 = vmatmul.bf16.vlgmr.msrb.gmra.mxu0 %v6277_v21  ;;  %v5019_v31 = vld [vmem:[#allocation2 + $0x98c] sm:$0xf0] }
  0xcd   :  { %2694 = vmatpush.bf16.msra.mxu0 %v5134_v47  ;;  %2598 = vmatmul.bf16.vlgmr.msrb.gmra.mxu1 %v6291_v37  ;;  %v2391_v36 = vpop.f32.mrf.mxu2  ;;  %v5022_v40 = vor.u32 %v5804_v30, %v5019_v31  ;;  %v4767_v47 = vld [vmem:[#allocation2 + $0x794] sm:$0xf0]  ;;  %v3989_v30 = vld [vmem:[#allocation2 + $0x160] sm:$0xf]  ;;  %v5549_v31 = vld [vmem:[#allocation2 + $0x178] sm:$0xf0] }
  0xce   :  { %2655 = vmatpush.bf16.msra.mxu1 %v4462_v45  ;;  %2637 = vmatmul.bf16.vlgmr.msrb.gmra.mxu2 %v6275_v17  ;;  %v2404_v38 = vpop.f32.mrf.mxu3  ;;  %v2378_v45 = vpop.f32.mrf.mxu1  ;;  %v4770_v58 = vor.u32 %v5741_v44, %v4767_v47  ;;  %v3990_v42 = vor.u32 %v5549_v31, %v3989_v30  ;;  %v5661_v44 = vld [vmem:[#allocation2 + $0x4f8] sm:$0xf0]  ;;  %v3961_v47 = vld [vmem:[#allocation2 + $0x128] sm:$0xf]  ;;  %v4577_v30 = vld [vmem:[#allocation2 + $0x5f8] sm:$0xf] }
  0xcf   :  { %2681 = vmatpush.bf16.msra.mxu2 %v4910_v46  ;;  %v4546_v46 = vor.u32 %v5685_v33, %v4543_v34  ;;  %v2379_v51 = vadd.f32 %v2378_v45, %v2365_v32  ;;  %v4714_v32 = vor.u32 %v5727_v16, %v4711_v20  ;;  %v5839_v34 = vld [vmem:[#allocation2 + $0xa8c] sm:$0xf]  ;;  %v4661_v45 = vld [vmem:[#allocation2 + $0x6a0] sm:$0xf]  ;;  %v3905_v16 = vld [vmem:[#allocation2 + $0xb8] sm:$0xf] }
  0xd0   :  { %2669 = vmatpush.bf16.msrb.mxu3 %v4658_v52  ;;  %v5678_v52 = vld [vmem:[#allocation2 + $0x584] sm:$0xf]  ;;  %v5696_v31 = vld [vmem:[#allocation2 + $0x610] sm:$0xf0] }
  0xd1   :  { %2695 = vmatpush.bf16.msra.mxu0 %v5106_v62  ;;  %v2392_v57 = vadd.f32 %v2391_v36, %v2379_v51  ;;  %v5734_v62 = vld [vmem:[#allocation2 + $0x744] sm:$0xf]  ;;  %v4518_v63 = vor.u32 %v5678_v52, %v4515_v53  ;;  %v2367_v3 = vpop.f32.mrf.mxu0  ;;  %v5159_v36 = vld [vmem:[#allocation2 + $0xaa4] sm:$0xf0]  ;;  %v4438_v53 = vor.u32 %v5661_v44, %v4437_v43  ;;  %v4325_v44 = vld [vmem:[#allocation2 + $0x400] sm:$0xf] }
  0xd2   :  { %2656 = vmatpush.bf16.msra.mxu1 %v4434_v60  ;;  %v5622_v60 = vld [vmem:[#allocation2 + $0x3c4] sm:$0xf]  ;;  %v4742_v12 = vor.u32 %v5734_v62, %v4739_v0  ;;  %v5162_v51 = vor.u32 %v5839_v34, %v5159_v36  ;;  %v4633_v62 = vld [vmem:[#allocation2 + $0x668] sm:$0xf]  ;;  %v3933_v0 = vld [vmem:[#allocation2 + $0xf0] sm:$0xf] }
  0xd3   :  { %2682 = vmatpush.bf16.msra.mxu2 %v4882_v61  ;;  %v4291_v61 = vld [vmem:[#allocation2 + $0x3dc] sm:$0xf0]  ;;  %v6315_v4 = vadd.f32 %v2404_v38, %v2392_v57  ;;  %v4241_v38 = vld [vmem:[#allocation2 + $0x358] sm:$0xf]  ;;  %v5605_v57 = vld [vmem:[#allocation2 + $0x338] sm:$0xf0] }
  0xd4   :  { %2670 = vmatpush.bf16.msrb.mxu3 %v4630_v2  ;;  %v4963_v2 = vld [vmem:[#allocation2 + $0x91c] sm:$0xf0]  ;;  %v4294_v7 = vor.u32 %v5622_v60, %v4291_v61  ;;  %v4409_v60 = vld [vmem:[#allocation2 + $0x4a8] sm:$0xf]  ;;  %v5654_v61 = vld [vmem:[#allocation2 + $0x4c0] sm:$0xf0] }
  0xd5   :  { %2696 = vmatpush.bf16.msra.mxu0 %v5078_v10  ;;  %v2393_v10 = vpop.f32.mrf.mxu2  ;;  %v4966_v13 = vor.u32 %v5790_v1, %v4963_v2  ;;  %v5535_v1 = vld [vmem:[#allocation2 + $0x108] sm:$0xf0]  ;;  %v4410_v3 = vor.u32 %v5654_v61, %v4409_v60  ;;  %v4129_v36 = vld [vmem:[#allocation2 + $0x278] sm:$0xf] }
  0xd6   :  { %2657 = vmatpush.bf16.msra.mxu1 %v4406_v8  ;;  %v4017_v8 = vld [vmem:[#allocation2 + $0x198] sm:$0xf]  ;;  %v2406_v11 = vpop.f32.mrf.mxu3  ;;  %v2380_v18 = vpop.f32.mrf.mxu1 }
  0xd7   :  { %2683 = vmatpush.bf16.msra.mxu2 %v4854_v9  ;;  %v5556_v9 = vld [vmem:[#allocation2 + $0x1b0] sm:$0xf0]  ;;  %v4381_v11 = vld [vmem:[#allocation2 + $0x470] sm:$0xf] }
  0xd8   :  { %2671 = vmatpush.bf16.msrb.mxu3 %v4602_v14  ;;  %v5615_v14 = vld [vmem:[#allocation2 + $0x38c] sm:$0xf]  ;;  %v5528_v18 = vld [vmem:[#allocation2 + $0xd0] sm:$0xf0] }
  0xd9   :  { %2697 = vmatpush.bf16.msra.mxu0 %v5050_v24  ;;  %v4018_v24 = vor.u32 %v5556_v9, %v4017_v8  ;;  %v3934_v9 = vor.u32 %v5535_v1, %v3933_v0  ;;  %v4521_v0 = vld [vmem:[#allocation2 + $0x588] sm:$0xf]  ;;  %v5682_v1 = vld [vmem:[#allocation2 + $0x5a0] sm:$0xf0] }
  0xda   :  { %2658 = vmatpush.bf16.msra.mxu1 %v4378_v22  ;;  %v5783_v22 = vld [vmem:[#allocation2 + $0x8cc] sm:$0xf] }
  0xdb   :  { %2684 = vmatpush.bf16.msra.mxu2 %v4826_v23  ;;  %v4935_v23 = vld [vmem:[#allocation2 + $0x8e4] sm:$0xf0] }
  0xdc   :  { %2672 = vmatpush.bf16.msrb.mxu3 %v4574_v28  ;;  %v4266_v28 = vor.u32 %v5615_v14, %v4263_v15  ;;  %v4938_v33 = vor.u32 %v5783_v22, %v4935_v23  ;;  %v5703_v15 = vld [vmem:[#allocation2 + $0x648] sm:$0xf0]  ;;  %v4186_v22 = vor.u32 %v5598_v6, %v4185_v5  ;;  %v4913_v5 = vld [vmem:[#allocation2 + $0x898] sm:$0xf]  ;;  %v5780_v6 = vld [vmem:[#allocation2 + $0x8b0] sm:$0xf0] }
  0xdd   :  { %2698 = vmatpush.bf16.msra.mxu0 %v5022_v40  ;;  %v4690_v40 = vor.u32 %v5724_v29, %v4689_v27  ;;  %v2443_v50 = vpop.f32.mrf.mxu2  ;;  %v3906_v27 = vor.u32 %v5528_v18, %v3905_v16  ;;  %v5640_v29 = vld [vmem:[#allocation2 + $0x450] sm:$0xf0]  ;;  %v4493_v16 = vld [vmem:[#allocation2 + $0x550] sm:$0xf]  ;;  %v5675_v18 = vld [vmem:[#allocation2 + $0x568] sm:$0xf0] }
  0xde   :  { %2659 = vmatpush.bf16.msra.mxu1 %v4350_v35  ;;  %v4466_v35 = vor.u32 %v5668_v26, %v4465_v25  ;;  %v5591_v25 = vld [vmem:[#allocation2 + $0x2c8] sm:$0xf0] }
  0xdf   :  { %2685 = vmatpush.bf16.msra.mxu2 %v4798_v39  ;;  %v5612_v39 = vld [vmem:[#allocation2 + $0x370] sm:$0xf0] }
  0xe0   :  { %2673 = vmatpush.bf16.msrb.mxu3 %v4546_v46  ;;  %v5717_v46 = vld [vmem:[#allocation2 + $0x6b8] sm:$0xf0]  ;;  %v4242_v52 = vor.u32 %v5612_v39, %v4241_v38  ;;  %v5584_v38 = vld [vmem:[#allocation2 + $0x290] sm:$0xf0] }
  0xe1   :  { %2699 = vmatpush.bf16.msra.mxu0 %v4994_v59  ;;  %v3962_v59 = vor.u32 %v5542_v49, %v3961_v47  ;;  %v5689_v49 = vld [vmem:[#allocation2 + $0x5d8] sm:$0xf0] }
  0xe2   :  { %2660 = vmatpush.bf16.msra.mxu1 %v4322_v54  ;;  %v4213_v54 = vld [vmem:[#allocation2 + $0x320] sm:$0xf] }
  0xe3   :  { %2686 = vmatpush.bf16.msra.mxu2 %v4770_v58  ;;  %v4662_v58 = vor.u32 %v5717_v46, %v4661_v45  ;;  %v4214_v2 = vor.u32 %v5605_v57, %v4213_v54  ;;  %v5633_v45 = vld [vmem:[#allocation2 + $0x418] sm:$0xf0]  ;;  %v4549_v46 = vld [vmem:[#allocation2 + $0x5c0] sm:$0xf]  ;;  %v4130_v54 = vor.u32 %v5584_v38, %v4129_v36 }
  0xe4   :  { %2674 = vmatpush.bf16.msrb.mxu3 %v4518_v63  ;;  %v5710_v63 = vld [vmem:[#allocation2 + $0x680] sm:$0xf0]  ;;  %v4326_v57 = vor.u32 %v5633_v45, %v4325_v44  ;;  %v4550_v60 = vor.u32 %v5689_v49, %v4549_v46  ;;  %v4857_v44 = vld [vmem:[#allocation2 + $0x828] sm:$0xf] }
  0xe5   :  { %2700 = vmatpush.bf16.msra.mxu0 %v4966_v13  ;;  %v4634_v8 = vor.u32 %v5710_v63, %v4633_v62  ;;  %v4605_v13 = vld [vmem:[#allocation2 + $0x630] sm:$0xf]  ;;  %v4297_v62 = vld [vmem:[#allocation2 + $0x3c8] sm:$0xf]  ;;  %v5626_v63 = vld [vmem:[#allocation2 + $0x3e0] sm:$0xf0] }
  0xe6   :  { %2661 = vmatpush.bf16.msra.mxu1 %v4294_v7  ;;  %v2417_v7 = vpop.f32.mrf.mxu0  ;;  %v2430_v14 = vpop.f32.mrf.mxu1  ;;  %v4606_v26 = vor.u32 %v5703_v15, %v4605_v13  ;;  %v4522_v13 = vor.u32 %v5682_v1, %v4521_v0  ;;  %v5619_v15 = vld [vmem:[#allocation2 + $0x3a8] sm:$0xf0]  ;;  %v5766_v45 = vld [vmem:[#allocation2 + $0x840] sm:$0xf0] }
  0xe7   :  { %2687 = vmatpush.bf16.msra.mxu2 %v4742_v12  ;;  %v2418_v10 = vadd.f32 %v2417_v7, %v6315_v4  ;;  %v5647_v12 = vld [vmem:[#allocation2 + $0x488] sm:$0xf0] }
  0xe8   :  { %2675 = vmatpush.bf16.msrb.mxu3 %v4490_v19  ;;  %v2445_v19 = vpop.f32.mrf.mxu2  ;;  %v4382_v23 = vor.u32 %v5647_v12, %v4381_v11  ;;  %v4269_v11 = vld [vmem:[#allocation2 + $0x390] sm:$0xf]  ;;  %v5595_v1 = vld [vmem:[#allocation2 + $0x2ec] sm:$0xf] }
  0xe9   :  { %2701 = vmatpush.bf16.msra.mxu0 %v4938_v33  ;;  %v2431_v20 = vadd.f32 %v2430_v14, %v2418_v10  ;;  %v5521_v33 = vld [vmem:[#allocation2 + $0x98] sm:$0xf0]  ;;  %v5570_v10 = vld [vmem:[#allocation2 + $0x220] sm:$0xf0]  ;;  %v4914_v19 = vor.u32 %v5780_v6, %v4913_v5 }
  0xea   :  { %2662 = vmatpush.bf16.msra.mxu1 %v4266_v28  ;;  %v4353_v28 = vld [vmem:[#allocation2 + $0x438] sm:$0xf] }
  0xeb   :  { %2688 = vmatpush.bf16.msra.mxu2 %v4714_v32  ;;  %2676 = vmatmul.bf16.vlgmr.msrb.gmra.mxu3 %v6268_v56  ;;  %v6322_v4 = vadd.f32 %v2443_v50, %v2431_v20  ;;  %v3877_v32 = vld [vmem:[#allocation2 + $0x80] sm:$0xf]  ;;  %v3849_v50 = vld [vmem:[#allocation2 + $0x48] sm:$0xf]  ;;  %v5553_v20 = vld [vmem:[#allocation2 + $0x19c] sm:$0xf] }
  0xec   :  { %2720 = vmatpush.bf16.msra.mxu3 %v4018_v24  ;;  %2702 = vmatmul.bf16.vlgmr.msra.gmra.mxu0 %v6293_v41  ;;  %v4157_v24 = vld [vmem:[#allocation2 + $0x2b0] sm:$0xf]  ;;  %v3878_v43 = vor.u32 %v5521_v33, %v3877_v32  ;;  %v5563_v32 = vld [vmem:[#allocation2 + $0x1e8] sm:$0xf0] }
  0xed   :  { %2759 = vmatpush.bf16.msrb.mxu0 %v4690_v40  ;;  %2663 = vmatmul.bf16.vlgmr.msra.gmra.mxu1 %v6266_v55  ;;  %v4158_v34 = vor.u32 %v5591_v25, %v4157_v24  ;;  %v4019_v25 = vld [vmem:[#allocation2 + $0x1b4] sm:$0xf0] }
  0xee   :  { %2689 = vmatmul.bf16.vlgmr.msra.gmra.mxu2 %v6291_v37  ;;  %2714 = vmatpush.bf16.msrb.mxu1 %v5162_v51  ;;  %v2456_v39 = vpop.f32.mrf.mxu3  ;;  %v2419_v40 = vpop.f32.mrf.mxu0  ;;  %v5514_v51 = vld [vmem:[#allocation2 + $0x60] sm:$0xf0]  ;;  %v4022_v36 = vor.u32 %v5553_v20, %v4019_v25  ;;  %v4159_v20 = vld [vmem:[#allocation2 + $0x2cc] sm:$0xf0]  ;;  %v5815_v25 = vld [vmem:[#allocation2 + $0x9c8] sm:$0xf0] }
  0xef   :  { %2746 = vmatpush.bf16.msrb.mxu2 %v4466_v35  ;;  %v4354_v35 = vor.u32 %v5640_v29, %v4353_v28  ;;  %v2432_v47 = vpop.f32.mrf.mxu1  ;;  %v3850_v61 = vor.u32 %v5514_v51, %v3849_v50  ;;  %v4270_v29 = vor.u32 %v5619_v15, %v4269_v11  ;;  %v5836_v40 = vld [vmem:[#allocation2 + $0xa70] sm:$0xf0]  ;;  %v5602_v50 = vld [vmem:[#allocation2 + $0x324] sm:$0xf]  ;;  %v4215_v51 = vld [vmem:[#allocation2 + $0x33c] sm:$0xf0] }
  0xf0   :  { %2721 = vmatpush.bf16.msra.mxu3 %v3990_v42  ;;  %v4578_v42 = vor.u32 %v5696_v31, %v4577_v30  ;;  %v4045_v30 = vld [vmem:[#allocation2 + $0x1d0] sm:$0xf]  ;;  %v4494_v31 = vor.u32 %v5675_v18, %v4493_v16 }
  0xf1   :  { %2760 = vmatpush.bf16.msrb.mxu0 %v4662_v58  ;;  %v4101_v58 = vld [vmem:[#allocation2 + $0x240] sm:$0xf]  ;;  %v4046_v46 = vor.u32 %v5563_v32, %v4045_v30  ;;  %v5581_v32 = vld [vmem:[#allocation2 + $0x27c] sm:$0xf] }
  0xf2   :  { %2733 = vmatpush.bf16.msra.mxu1 %v4242_v52  ;;  %v2469_v52 = vpop.f32.mrf.mxu2 }
  0xf3   :  { %2747 = vmatpush.bf16.msrb.mxu2 %v4438_v53  ;;  %v6324_v53 = vadd.f32 %v2469_v52, %v2456_v39  ;;  %v5137_v39 = vld [vmem:[#allocation2 + $0xa58] sm:$0xf] }
  0xf4   :  { %2722 = vmatpush.bf16.msra.mxu3 %v3962_v59  ;;  %v5577_v59 = vld [vmem:[#allocation2 + $0x258] sm:$0xf0]  ;;  %v5138_v49 = vor.u32 %v5836_v40, %v5137_v39  ;;  %v5025_v39 = vld [vmem:[#allocation2 + $0x978] sm:$0xf]  ;;  %v5808_v40 = vld [vmem:[#allocation2 + $0x990] sm:$0xf0] }
  0xf5   :  { %2761 = vmatpush.bf16.msrb.mxu0 %v4634_v8  ;;  %v4102_v7 = vor.u32 %v5577_v59, %v4101_v58  ;;  %v4298_v8 = vor.u32 %v5626_v63, %v4297_v62  ;;  %v5829_v58 = vld [vmem:[#allocation2 + $0xa38] sm:$0xf0]  ;;  %v5539_v59 = vld [vmem:[#allocation2 + $0x12c] sm:$0xf]  ;;  %v4218_v63 = vor.u32 %v5602_v50, %v4215_v51  ;;  %v5026_v51 = vor.u32 %v5808_v40, %v5025_v39  ;;  %v4887_v40 = vld [vmem:[#allocation2 + $0x87c] sm:$0xf0] }
  0xf6   :  { %2734 = vmatpush.bf16.msra.mxu1 %v4214_v2  ;;  %v3821_v2 = vld [vmem:[#allocation2 + $0x10] sm:$0xf]  ;;  %v2458_v12 = vpop.f32.mrf.mxu3  ;;  %v5759_v62 = vld [vmem:[#allocation2 + $0x808] sm:$0xf0] }
  0xf7   :  { %2748 = vmatpush.bf16.msrb.mxu2 %v4410_v3  ;;  %v5507_v3 = vld [vmem:[#allocation2 + $0x28] sm:$0xf0]  ;;  %v3935_v12 = vld [vmem:[#allocation2 + $0x10c] sm:$0xf0] }
  0xf8   :  { %2723 = vmatpush.bf16.msra.mxu3 %v3934_v9  ;;  %v4073_v9 = vld [vmem:[#allocation2 + $0x208] sm:$0xf]  ;;  %v3822_v14 = vor.u32 %v5507_v3, %v3821_v2 }
  0xf9   :  { %2762 = vmatpush.bf16.msrb.mxu0 %v4606_v26  ;;  %v4885_v26 = vld [vmem:[#allocation2 + $0x860] sm:$0xf]  ;;  %v4074_v28 = vor.u32 %v5570_v10, %v4073_v9  ;;  %v4187_v2 = vld [vmem:[#allocation2 + $0x304] sm:$0xf0]  ;;  %v5822_v9 = vld [vmem:[#allocation2 + $0xa00] sm:$0xf0] }
  0xfa   :  { %2735 = vmatpush.bf16.msra.mxu1 %v4186_v22  ;;  %v5165_v22 = vld [vmem:[#allocation2 + $0xa90] sm:$0xf]  ;;  %v2471_v24 = vpop.f32.mrf.mxu2  ;;  %v5532_v10 = vld [vmem:[#allocation2 + $0xf4] sm:$0xf]  ;;  %v4190_v15 = vor.u32 %v5595_v1, %v4187_v2  ;;  %v5665_v2 = vld [vmem:[#allocation2 + $0x51c] sm:$0xf] }
  0xfb   :  { %2749 = vmatpush.bf16.msrb.mxu2 %v4382_v23  ;;  %v5843_v23 = vld [vmem:[#allocation2 + $0xaa8] sm:$0xf0]  ;;  %v5053_v24 = vld [vmem:[#allocation2 + $0x9b0] sm:$0xf] }
  0xfc   :  { %2724 = vmatpush.bf16.msra.mxu3 %v3906_v27  ;;  %v5773_v27 = vld [vmem:[#allocation2 + $0x878] sm:$0xf0]  ;;  %v5166_v33 = vor.u32 %v5843_v23, %v5165_v22  ;;  %v3938_v22 = vor.u32 %v5532_v10, %v3935_v12  ;;  %v4969_v12 = vld [vmem:[#allocation2 + $0x908] sm:$0xf] }
  0xfd   :  { %2763 = vmatpush.bf16.msrb.mxu0 %v4578_v42  ;;  %5178 = vmatmul.msk.bf16.vlgmr.msrb.gmra.mxu1 %vm2352_vm0, %v6284_v48  ;;  %v4886_v38 = vor.u32 %v5773_v27, %v4885_v26  ;;  %v5546_v42 = vld [vmem:[#allocation2 + $0x164] sm:$0xf]  ;;  %v5525_v26 = vld [vmem:[#allocation2 + $0xbc] sm:$0xf]  ;;  %v4773_v27 = vld [vmem:[#allocation2 + $0x780] sm:$0xf] }
  0xfe   :  { %2736 = vmatpush.bf16.msra.mxu1 %v4158_v34  ;;  %v5609_v34 = vld [vmem:[#allocation2 + $0x35c] sm:$0xf] }
  0xff   :  { %2750 = vmatpush.bf16.msrb.mxu2 %v4354_v35  ;;  %v4243_v35 = vld [vmem:[#allocation2 + $0x374] sm:$0xf0] }
 0x100   :  { %2725 = vmatpush.bf16.msra.mxu3 %v3878_v43  ;;  %v3991_v43 = vld [vmem:[#allocation2 + $0x17c] sm:$0xf0]  ;;  %v4246_v47 = vor.u32 %v5609_v34, %v4243_v35 }
 0x101   :  { %2764 = vmatpush.bf16.msrb.mxu0 %v4550_v60  ;;  %v3994_v52 = vor.u32 %v5546_v42, %v3991_v43  ;;  %v3963_v60 = vld [vmem:[#allocation2 + $0x144] sm:$0xf0]  ;;  %v5518_v42 = vld [vmem:[#allocation2 + $0x84] sm:$0xf] }
 0x102   :  { %2737 = vmatpush.bf16.msra.mxu1 %v4130_v54  ;;  %v4858_v54 = vor.u32 %v5766_v45, %v4857_v44  ;;  %v3966_v6 = vor.u32 %v5539_v59, %v3963_v60  ;;  %v3879_v44 = vld [vmem:[#allocation2 + $0x9c] sm:$0xf0]  ;;  %v4745_v45 = vld [vmem:[#allocation2 + $0x748] sm:$0xf]  ;;  %v5801_v60 = vld [vmem:[#allocation2 + $0x958] sm:$0xf0] }
 0x103   :  { %2751 = vmatpush.bf16.msrb.mxu2 %v4326_v57  ;;  %v5109_v57 = vld [vmem:[#allocation2 + $0xa20] sm:$0xf] }
 0x104   :  { %2726 = vmatpush.bf16.msra.mxu3 %v3850_v61  ;;  %v4829_v61 = vld [vmem:[#allocation2 + $0x7f0] sm:$0xf]  ;;  %v5110_v0 = vor.u32 %v5829_v58, %v5109_v57  ;;  %v3882_v57 = vor.u32 %v5518_v42, %v3879_v44  ;;  %v4997_v59 = vld [vmem:[#allocation2 + $0x940] sm:$0xf]  ;;  %v5651_v42 = vld [vmem:[#allocation2 + $0x4ac] sm:$0xf] }
 0x105   :  { %2765 = vmatpush.bf16.msrb.mxu0 %v4522_v13  ;;  %v2482_v3 = vpop.f32.mrf.mxu0  ;;  %v4801_v13 = vld [vmem:[#allocation2 + $0x7b8] sm:$0xf] }
 0x106   :  { %2738 = vmatpush.bf16.msra.mxu1 %v4102_v7  ;;  %v2495_v5 = vpop.f32.mrf.mxu1  ;;  %v4830_v7 = vor.u32 %v5759_v62, %v4829_v61  ;;  %v2483_v11 = vadd.f32 %v2482_v3, %v6324_v53  ;;  %v3907_v53 = vld [vmem:[#allocation2 + $0xd4] sm:$0xf0]  ;;  %v5511_v61 = vld [vmem:[#allocation2 + $0x4c] sm:$0xf]  ;;  %v3851_v62 = vld [vmem:[#allocation2 + $0x64] sm:$0xf0] }
 0x107   :  { %2752 = vmatpush.bf16.msrb.mxu2 %v4298_v8  ;;  %v5081_v8 = vld [vmem:[#allocation2 + $0x9e8] sm:$0xf]  ;;  %v4467_v3 = vld [vmem:[#allocation2 + $0x534] sm:$0xf0]  ;;  %v3854_v10 = vor.u32 %v5511_v61, %v3851_v62  ;;  %v4383_v61 = vld [vmem:[#allocation2 + $0x48c] sm:$0xf0] }
 0x108   :  { %2727 = vmatpush.bf16.msra.mxu3 %v3822_v14  ;;  %v5752_v14 = vld [vmem:[#allocation2 + $0x7d0] sm:$0xf0]  ;;  %v2496_v16 = vadd.f32 %v2495_v5, %v2483_v11  ;;  %v5082_v18 = vor.u32 %v5822_v9, %v5081_v8  ;;  %v4998_v5 = vor.u32 %v5801_v60, %v4997_v59  ;;  %v4859_v59 = vld [vmem:[#allocation2 + $0x844] sm:$0xf0] }
 0x109   :  { %2766 = vmatpush.bf16.msrb.mxu0 %v4494_v31  ;;  %v4802_v23 = vor.u32 %v5752_v14, %v4801_v13  ;;  %v5054_v31 = vor.u32 %v5815_v25, %v5053_v24  ;;  %v5794_v13 = vld [vmem:[#allocation2 + $0x920] sm:$0xf0]  ;;  %v4439_v24 = vld [vmem:[#allocation2 + $0x4fc] sm:$0xf0]  ;;  %v5644_v60 = vld [vmem:[#allocation2 + $0x474] sm:$0xf] }
 0x10a   :  { %2739 = vmatpush.bf16.msra.mxu1 %v4074_v28  ;;  %v5745_v28 = vld [vmem:[#allocation2 + $0x798] sm:$0xf0] }
 0x10b   :  { %2753 = vmatpush.bf16.msrb.mxu2 %v4270_v29  ;;  %2728 = vmatmul.bf16.vlgmr.msra.gmra.mxu3 %v6275_v17 }
 0x10c   :  { %2772 = vmatpush.bf16.msrb.mxu3 %v4914_v19  ;;  %2767 = vmatmul.bf16.vlgmr.msrb.gmra.mxu0 %v6268_v56  ;;  %v5588_v19 = vld [vmem:[#allocation2 + $0x2b4] sm:$0xf] }
 0x10d   :  { %2811 = vmatpush.bf16.msra.mxu0 %v4022_v36  ;;  %v4162_v29 = vor.u32 %v5588_v19, %v4159_v20  ;;  %v3910_v36 = vor.u32 %v5525_v26, %v3907_v53  ;;  %v2484_v43 = vpop.f32.mrf.mxu0  ;;  %v5777_v19 = vld [vmem:[#allocation2 + $0x89c] sm:$0xf]  ;;  %v4970_v26 = vor.u32 %v5794_v13, %v4969_v12  ;;  %v4941_v53 = vld [vmem:[#allocation2 + $0x8d0] sm:$0xf] }
 0x10e   :  { %2754 = vmatmul.bf16.vlgmr.msrb.gmra.mxu2 %v6266_v55  ;;  %2740 = vmatpush.bf16.msra.mxu1 %v4046_v46  ;;  %v2508_v30 = vpop.f32.mrf.mxu3  ;;  %v2497_v35 = vpop.f32.mrf.mxu1  ;;  %v5738_v46 = vld [vmem:[#allocation2 + $0x760] sm:$0xf0]  ;;  %v4411_v43 = vld [vmem:[#allocation2 + $0x4c4] sm:$0xf0] }
 0x10f   :  { %2805 = vmatpush.bf16.msra.mxu2 %v5166_v33  ;;  %v4131_v33 = vld [vmem:[#allocation2 + $0x294] sm:$0xf0]  ;;  %v2509_v34 = vadd.f32 %v2508_v30, %v2496_v16  ;;  %v4746_v58 = vor.u32 %v5738_v46, %v4745_v45  ;;  %v5504_v16 = vld [vmem:[#allocation2 + $0x14] sm:$0xf]  ;;  %v5787_v30 = vld [vmem:[#allocation2 + $0x8e8] sm:$0xf0] }
 0x110   :  { %2773 = vmatpush.bf16.msrb.mxu3 %v4886_v38  ;;  %v4774_v38 = vor.u32 %v5745_v28, %v4773_v27  ;;  %v5560_v27 = vld [vmem:[#allocation2 + $0x1d4] sm:$0xf]  ;;  %v4047_v28 = vld [vmem:[#allocation2 + $0x1ec] sm:$0xf0]  ;;  %v5721_v35 = vld [vmem:[#allocation2 + $0x6dc] sm:$0xf]  ;;  %v4942_v44 = vor.u32 %v5787_v30, %v4941_v53 }
 0x111   :  { %2812 = vmatpush.bf16.msra.mxu0 %v3994_v52  ;;  %2741 = vmatmul.bf16.vlgmr.msra.gmra.mxu1 %v6277_v21  ;;  %v5574_v52 = vld [vmem:[#allocation2 + $0x244] sm:$0xf]  ;;  %v4050_v39 = vor.u32 %v5560_v27, %v4047_v28  ;;  %v4327_v53 = vld [vmem:[#allocation2 + $0x41c] sm:$0xf0]  ;;  %v5027_v30 = vld [vmem:[#allocation2 + $0x994] sm:$0xf0] }
 0x112   :  { %2785 = vmatpush.bf16.msrb.mxu1 %v5138_v49  ;;  %v4134_v49 = vor.u32 %v5581_v32, %v4131_v33  ;;  %v5139_v32 = vld [vmem:[#allocation2 + $0xa74] sm:$0xf0] }
 0x113   :  { %2824 = vmatpush.bf16.msrb.mxu2 %v4246_v47  ;;  %v2521_v47 = vpop.f32.mrf.mxu2 }
 0x114   :  { %2774 = vmatpush.bf16.msrb.mxu3 %v4858_v54  ;;  %v2522_v50 = vadd.f32 %v2521_v47, %v2509_v34  ;;  %v4103_v54 = vld [vmem:[#allocation2 + $0x25c] sm:$0xf0]  ;;  %v5826_v47 = vld [vmem:[#allocation2 + $0xa24] sm:$0xf] }
 0x115   :  { %2813 = vmatpush.bf16.msra.mxu0 %v3966_v6  ;;  %v4106_v1 = vor.u32 %v5574_v52, %v4103_v54  ;;  %v5567_v6 = vld [vmem:[#allocation2 + $0x20c] sm:$0xf]  ;;  %v4414_v52 = vor.u32 %v5651_v42, %v4411_v43  ;;  %v5714_v54 = vld [vmem:[#allocation2 + $0x6a4] sm:$0xf] }
 0x116   :  { %2786 = vmatpush.bf16.msrb.mxu1 %v5110_v0  ;;  %v5731_v0 = vld [vmem:[#allocation2 + $0x728] sm:$0xf0]  ;;  %v2510_v8 = vpop.f32.mrf.mxu3  ;;  %v2534_v9 = vpop.f32.mrf.mxu1 }
 0x117   :  { %2825 = vmatpush.bf16.msrb.mxu2 %v4218_v63  ;;  %v4717_v63 = vld [vmem:[#allocation2 + $0x710] sm:$0xf]  ;;  %v6335_v14 = vadd.f32 %v2534_v9, %v2522_v50  ;;  %v5637_v9 = vld [vmem:[#allocation2 + $0x43c] sm:$0xf] }
 0x118   :  { %2775 = vmatpush.bf16.msrb.mxu3 %v4830_v7  ;;  %v4075_v7 = vld [vmem:[#allocation2 + $0x224] sm:$0xf0]  ;;  %v4718_v11 = vor.u32 %v5731_v0, %v4717_v63  ;;  %v5819_v0 = vld [vmem:[#allocation2 + $0x9ec] sm:$0xf]  ;;  %v4831_v8 = vld [vmem:[#allocation2 + $0x80c] sm:$0xf0] }
 0x119   :  { %2814 = vmatpush.bf16.msra.mxu0 %v3938_v22  ;;  %v4078_v20 = vor.u32 %v5567_v6, %v4075_v7  ;;  %v4915_v22 = vld [vmem:[#allocation2 + $0x8b4] sm:$0xf0]  ;;  %v4635_v6 = vld [vmem:[#allocation2 + $0x684] sm:$0xf0]  ;;  %v5756_v7 = vld [vmem:[#allocation2 + $0x7f4] sm:$0xf] }
 0x11a   :  { %2787 = vmatpush.bf16.msrb.mxu1 %v5082_v18  ;;  %v3823_v18 = vld [vmem:[#allocation2 + $0x2c] sm:$0xf0]  ;;  %v4918_v33 = vor.u32 %v5777_v19, %v4915_v22 }
 0x11b   :  { %2826 = vmatpush.bf16.msrb.mxu2 %v4190_v15  ;;  %v4470_v15 = vor.u32 %v5665_v2, %v4467_v3  ;;  %v2523_v25 = vpop.f32.mrf.mxu2  ;;  %v4386_v3 = vor.u32 %v5644_v60, %v4383_v61  ;;  %v4607_v22 = vld [vmem:[#allocation2 + $0x64c] sm:$0xf0]  ;;  %v5616_v60 = vld [vmem:[#allocation2 + $0x394] sm:$0xf] }
 0x11c   :  { %2776 = vmatpush.bf16.msrb.mxu3 %v4802_v23  ;;  %v5658_v23 = vld [vmem:[#allocation2 + $0x4e4] sm:$0xf]  ;;  %v4803_v25 = vld [vmem:[#allocation2 + $0x7d4] sm:$0xf0]  ;;  %v4271_v61 = vld [vmem:[#allocation2 + $0x3ac] sm:$0xf0] }
 0x11d   :  { %2815 = vmatpush.bf16.msra.mxu0 %v3910_v36  ;;  %v4442_v34 = vor.u32 %v5658_v23, %v4439_v24  ;;  %v4691_v36 = vld [vmem:[#allocation2 + $0x6f4] sm:$0xf0]  ;;  %v5749_v23 = vld [vmem:[#allocation2 + $0x7bc] sm:$0xf] }
 0x11e   :  { %2788 = vmatpush.bf16.msrb.mxu1 %v5054_v31  ;;  %5179 = vmatmul.msk.bf16.vlgmr.msra.gmra.mxu2 %vm2352_vm0, %v6284_v48  ;;  %v5833_v31 = vld [vmem:[#allocation2 + $0xa5c] sm:$0xf]  ;;  %v4694_v46 = vor.u32 %v5721_v35, %v4691_v36  ;;  %v2536_v50 = vpop.f32.mrf.mxu1  ;;  %v5742_v35 = vld [vmem:[#allocation2 + $0x784] sm:$0xf]  ;;  %v4775_v36 = vld [vmem:[#allocation2 + $0x79c] sm:$0xf0] }
 0x11f   :  { %2827 = vmatpush.bf16.msrb.mxu2 %v4162_v29  ;;  %v3826_v29 = vor.u32 %v5504_v16, %v3823_v18  ;;  %v5142_v45 = vor.u32 %v5833_v31, %v5139_v32  ;;  %v5055_v16 = vld [vmem:[#allocation2 + $0x9cc] sm:$0xf0]  ;;  %v4834_v18 = vor.u32 %v5756_v7, %v4831_v8  ;;  %v4806_v31 = vor.u32 %v5749_v23, %v4803_v25  ;;  %v5679_v8 = vld [vmem:[#allocation2 + $0x58c] sm:$0xf] }
 0x120   :  { %2777 = vmatpush.bf16.msrb.mxu3 %v4774_v38  ;;  %v5770_v38 = vld [vmem:[#allocation2 + $0x864] sm:$0xf]  ;;  %v4274_v7 = vor.u32 %v5616_v60, %v4271_v61  ;;  %v4495_v25 = vld [vmem:[#allocation2 + $0x56c] sm:$0xf0] }
 0x121   :  { %2816 = vmatpush.bf16.msra.mxu0 %v3882_v57  ;;  %v4663_v57 = vld [vmem:[#allocation2 + $0x6bc] sm:$0xf0] }
 0x122   :  { %2789 = vmatpush.bf16.msrb.mxu1 %v5026_v51  ;;  %v4890_v51 = vor.u32 %v5770_v38, %v4887_v40  ;;  %v4666_v63 = vor.u32 %v5714_v54, %v4663_v57  ;;  %v5623_v38 = vld [vmem:[#allocation2 + $0x3cc] sm:$0xf] }
 0x123   :  { %2828 = vmatpush.bf16.msrb.mxu2 %v4134_v49  ;;  %v5111_v49 = vld [vmem:[#allocation2 + $0xa3c] sm:$0xf0]  ;;  %v5735_v54 = vld [vmem:[#allocation2 + $0x74c] sm:$0xf] }
 0x124   :  { %2778 = vmatpush.bf16.msrb.mxu3 %v4746_v58  ;;  %v5763_v58 = vld [vmem:[#allocation2 + $0x82c] sm:$0xf]  ;;  %v5114_v62 = vor.u32 %v5826_v47, %v5111_v49  ;;  %v4778_v49 = vor.u32 %v5742_v35, %v4775_v36  ;;  %v5557_v35 = vld [vmem:[#allocation2 + $0x1b8] sm:$0xf0]  ;;  %v4221_v36 = vld [vmem:[#allocation2 + $0x328] sm:$0xf] }
 0x125   :  { %2817 = vmatpush.bf16.msra.mxu0 %v3854_v10  ;;  %v4862_v2 = vor.u32 %v5763_v58, %v4859_v59  ;;  %v4355_v10 = vld [vmem:[#allocation2 + $0x454] sm:$0xf0]  ;;  %v2573_v12 = vpop.f32.mrf.mxu0  ;;  %v4747_v59 = vld [vmem:[#allocation2 + $0x764] sm:$0xf0] }
 0x126   :  { %2790 = vmatpush.bf16.msrb.mxu1 %v4998_v5  ;;  %v5707_v5 = vld [vmem:[#allocation2 + $0x66c] sm:$0xf]  ;;  %v4358_v19 = vor.u32 %v5637_v9, %v4355_v10  ;;  %v4523_v9 = vld [vmem:[#allocation2 + $0x5a4] sm:$0xf0]  ;;  %v5728_v10 = vld [vmem:[#allocation2 + $0x714] sm:$0xf] }
 0x127   :  { %2829 = vmatpush.bf16.msrb.mxu2 %v4106_v1  ;;  %v5083_v1 = vld [vmem:[#allocation2 + $0xa04] sm:$0xf0]  ;;  %v4638_v13 = vor.u32 %v5707_v5, %v4635_v6  ;;  %v4750_v6 = vor.u32 %v5735_v54, %v4747_v59  ;;  %v4193_v54 = vld [vmem:[#allocation2 + $0x2f0] sm:$0xf]  ;;  %v5655_v59 = vld [vmem:[#allocation2 + $0x4c8] sm:$0xf0] }
 0x128   :  { %2779 = vmatpush.bf16.msrb.mxu3 %v4718_v11  ;;  %v5086_v11 = vor.u32 %v5819_v0, %v5083_v1  ;;  %v5167_v0 = vld [vmem:[#allocation2 + $0xaac] sm:$0xf0]  ;;  %v4971_v5 = vld [vmem:[#allocation2 + $0x924] sm:$0xf0] }
 0x129   :  { %2818 = vmatpush.bf16.msra.mxu0 %v3826_v29  ;;  %v5805_v29 = vld [vmem:[#allocation2 + $0x97c] sm:$0xf] }
 0x12a   :  { %2791 = vmatpush.bf16.msrb.mxu1 %v4970_v26  ;;  %v2547_v24 = vpop.f32.mrf.mxu1  ;;  %v5630_v26 = vld [vmem:[#allocation2 + $0x404] sm:$0xf]  ;;  %v5030_v40 = vor.u32 %v5805_v29, %v5027_v30 }
 0x12b   :  { %2830 = vmatpush.bf16.msrb.mxu2 %v4078_v20  ;;  %2780 = vmatmul.bf16.vlgmr.msrb.gmra.mxu3 %v6291_v37  ;;  %v5700_v20 = vld [vmem:[#allocation2 + $0x634] sm:$0xf]  ;;  %v4330_v32 = vor.u32 %v5630_v26, %v4327_v53  ;;  %v4943_v53 = vld [vmem:[#allocation2 + $0x8ec] sm:$0xf0] }
 0x12c   :  { %2837 = vmatpush.bf16.msra.mxu3 %v4470_v15  ;;  %2819 = vmatmul.bf16.vlgmr.msra.gmra.mxu0 %v6275_v17  ;;  %v5812_v15 = vld [vmem:[#allocation2 + $0x9b4] sm:$0xf]  ;;  %v4610_v28 = vor.u32 %v5700_v20, %v4607_v22  ;;  %v5669_v20 = vld [vmem:[#allocation2 + $0x538] sm:$0xf0] }
 0x12d   :  { %2863 = vmatpush.bf16.msrb.mxu0 %v4918_v33  ;;  %v5058_v27 = vor.u32 %v5812_v15, %v5055_v16  ;;  %v5693_v33 = vld [vmem:[#allocation2 + $0x5fc] sm:$0xf]  ;;  %v2575_v42 = vpop.f32.mrf.mxu0  ;;  %v4249_v16 = vld [vmem:[#allocation2 + $0x360] sm:$0xf]  ;;  %v5672_v22 = vld [vmem:[#allocation2 + $0x554] sm:$0xf] }
 0x12e   :  { %2792 = vmatpush.bf16.msrb.mxu1 %v4942_v44  ;;  %v5798_v44 = vld [vmem:[#allocation2 + $0x944] sm:$0xf]  ;;  %v5784_v26 = vld [vmem:[#allocation2 + $0x8d4] sm:$0xf] }
 0x12f   :  { %2831 = vmatpush.bf16.msrb.mxu2 %v4050_v39  ;;  %v4299_v39 = vld [vmem:[#allocation2 + $0x3e4] sm:$0xf0]  ;;  %v5662_v42 = vld [vmem:[#allocation2 + $0x500] sm:$0xf0] }
 0x130   :  { %2838 = vmatpush.bf16.msra.mxu3 %v4442_v34  ;;  %v4579_v34 = vld [vmem:[#allocation2 + $0x614] sm:$0xf0]  ;;  %v4302_v50 = vor.u32 %v5623_v38, %v4299_v39  ;;  %v5606_v38 = vld [vmem:[#allocation2 + $0x340] sm:$0xf0]  ;;  %v4946_v39 = vor.u32 %v5784_v26, %v4943_v53  ;;  %v4361_v26 = vld [vmem:[#allocation2 + $0x440] sm:$0xf] }
 0x131   :  { %2864 = vmatpush.bf16.msrb.mxu0 %v4890_v51  ;;  %2793 = vmatmul.bf16.vlgmr.msrb.gmra.mxu1 %v6293_v41  ;;  %v4582_v43 = vor.u32 %v5693_v33, %v4579_v34  ;;  %v2586_v47 = vpop.f32.mrf.mxu2  ;;  %v5686_v51 = vld [vmem:[#allocation2 + $0x5c4] sm:$0xf]  ;;  %v5725_v33 = vld [vmem:[#allocation2 + $0x6f8] sm:$0xf0] }
 0x132   :  { %2850 = vmatpush.bf16.msra.mxu1 %v4694_v46  ;;  %2832 = vmatmul.bf16.vlgmr.msrb.gmra.mxu2 %v6277_v21  ;;  %v2560_v46 = vpop.f32.mrf.mxu3  ;;  %v2549_v58 = vpop.f32.mrf.mxu1  ;;  %v5641_v53 = vld [vmem:[#allocation2 + $0x458] sm:$0xf0] }
 0x133   :  { %2876 = vmatpush.bf16.msra.mxu2 %v5142_v45  ;;  %v4999_v45 = vld [vmem:[#allocation2 + $0x95c] sm:$0xf0]  ;;  %v2561_v57 = vadd.f32 %v2560_v46, %v2547_v24  ;;  %v4526_v24 = vor.u32 %v5679_v8, %v4523_v9  ;;  %v4222_v46 = vor.u32 %v5606_v38, %v4221_v36  ;;  %v4417_v58 = vld [vmem:[#allocation2 + $0x4b0] sm:$0xf]  ;;  %v4389_v8 = vld [vmem:[#allocation2 + $0x478] sm:$0xf]  ;;  %v4362_v36 = vor.u32 %v5641_v53, %v4361_v26 }
 0x134   :  { %2839 = vmatpush.bf16.msra.mxu3 %v4414_v52  ;;  %v4551_v52 = vld [vmem:[#allocation2 + $0x5dc] sm:$0xf0]  ;;  %v5648_v9 = vld [vmem:[#allocation2 + $0x490] sm:$0xf0]  ;;  %v5529_v38 = vld [vmem:[#allocation2 + $0xd8] sm:$0xf0] }
 0x135   :  { %2865 = vmatpush.bf16.msrb.mxu0 %v4862_v2  ;;  %v2574_v1 = vadd.f32 %v2573_v12, %v2561_v57  ;;  %v4554_v2 = vor.u32 %v5686_v51, %v4551_v52  ;;  %v4473_v12 = vld [vmem:[#allocation2 + $0x520] sm:$0xf]  ;;  %v6343_v23 = vpop.f32.mrf.mxu0  ;;  %v5550_v52 = vld [vmem:[#allocation2 + $0x180] sm:$0xf0]  ;;  %v5599_v57 = vld [vmem:[#allocation2 + $0x308] sm:$0xf0] }
 0x136   :  { %2851 = vmatpush.bf16.msra.mxu1 %v4666_v63  ;;  %v5840_v63 = vld [vmem:[#allocation2 + $0xa94] sm:$0xf]  ;;  %v4474_v34 = vor.u32 %v5669_v20, %v4473_v12  ;;  %v4390_v12 = vor.u32 %v5648_v9, %v4389_v8  ;;  %v4053_v8 = vld [vmem:[#allocation2 + $0x1d8] sm:$0xf] }
 0x137   :  { %2877 = vmatpush.bf16.msra.mxu2 %v5114_v62  ;;  %v5002_v62 = vor.u32 %v5798_v44, %v4999_v45  ;;  %v5170_v15 = vor.u32 %v5840_v63, %v5167_v0  ;;  %v4194_v63 = vor.u32 %v5599_v57, %v4193_v54  ;;  %v3969_v0 = vld [vmem:[#allocation2 + $0x130] sm:$0xf]  ;;  %v5536_v20 = vld [vmem:[#allocation2 + $0x110] sm:$0xf0]  ;;  %v5522_v54 = vld [vmem:[#allocation2 + $0xa0] sm:$0xf0] }
 0x138   :  { %2840 = vmatpush.bf16.msra.mxu3 %v4386_v3  ;;  %v5791_v3 = vld [vmem:[#allocation2 + $0x90c] sm:$0xf]  ;;  %v4081_v57 = vld [vmem:[#allocation2 + $0x210] sm:$0xf]  ;;  %v5564_v9 = vld [vmem:[#allocation2 + $0x1f0] sm:$0xf0] }
 0x139   :  { %2866 = vmatpush.bf16.msrb.mxu0 %v4834_v18  ;;  %v5613_v18 = vld [vmem:[#allocation2 + $0x378] sm:$0xf0]  ;;  %v5676_v26 = vld [vmem:[#allocation2 + $0x570] sm:$0xf0] }
 0x13a   :  { %2852 = vmatpush.bf16.msra.mxu1 %v4638_v13  ;;  %v4719_v13 = vld [vmem:[#allocation2 + $0x72c] sm:$0xf0]  ;;  %v4250_v30 = vor.u32 %v5613_v18, %v4249_v16  ;;  %v3941_v16 = vld [vmem:[#allocation2 + $0xf8] sm:$0xf] }
 0x13b   :  { %2878 = vmatpush.bf16.msra.mxu2 %v5086_v11  ;;  %v6341_v11 = vadd.f32 %v2586_v47, %v2574_v1  ;;  %v4722_v29 = vor.u32 %v5728_v10, %v4719_v13  ;;  %v3997_v47 = vld [vmem:[#allocation2 + $0x168] sm:$0xf]  ;;  %v4641_v1 = vld [vmem:[#allocation2 + $0x670] sm:$0xf]  ;;  %v4613_v18 = vld [vmem:[#allocation2 + $0x638] sm:$0xf] }
 0x13c   :  { %2841 = vmatpush.bf16.msra.mxu3 %v4358_v19  ;;  %v4974_v19 = vor.u32 %v5791_v3, %v4971_v5  ;;  %v4418_v3 = vor.u32 %v5655_v59, %v4417_v58  ;;  %v5543_v5 = vld [vmem:[#allocation2 + $0x148] sm:$0xf0] }
 0x13d   :  { %2867 = vmatpush.bf16.msrb.mxu0 %v4806_v31  ;;  %v4025_v31 = vld [vmem:[#allocation2 + $0x1a0] sm:$0xf]  ;;  %v2627_v60 = vpop.f32.mrf.mxu0  ;;  %v3970_v13 = vor.u32 %v5543_v5, %v3969_v0  ;;  %v5571_v58 = vld [vmem:[#allocation2 + $0x228] sm:$0xf0]  ;;  %v4529_v5 = vld [vmem:[#allocation2 + $0x590] sm:$0xf] }
 0x13e   :  { %2853 = vmatpush.bf16.msra.mxu1 %v4610_v28  ;;  %v2588_v28 = vpop.f32.mrf.mxu2  ;;  %v4026_v45 = vor.u32 %v5557_v35, %v4025_v31  ;;  %v4305_v60 = vld [vmem:[#allocation2 + $0x3d0] sm:$0xf] }
 0x13f   :  { %2879 = vmatpush.bf16.msra.mxu2 %v5058_v27  ;;  %v2562_v27 = vpop.f32.mrf.mxu3 }
 0x140   :  { %2842 = vmatpush.bf16.msra.mxu3 %v4330_v32  ;;  %v4697_v32 = vld [vmem:[#allocation2 + $0x6e0] sm:$0xf] }
 0x141   :  { %2868 = vmatpush.bf16.msrb.mxu0 %v4778_v49  ;;  %v4698_v44 = vor.u32 %v5725_v33, %v4697_v32  ;;  %v4669_v49 = vld [vmem:[#allocation2 + $0x6a8] sm:$0xf]  ;;  %v3913_v32 = vld [vmem:[#allocation2 + $0xc0] sm:$0xf] }
 0x142   :  { %2854 = vmatpush.bf16.msra.mxu1 %v4582_v43  ;;  %v4498_v43 = vor.u32 %v5672_v22, %v4495_v25  ;;  %v4137_v22 = vld [vmem:[#allocation2 + $0x280] sm:$0xf] }
 0x143   :  { %2880 = vmatpush.bf16.msra.mxu2 %v5030_v40  ;;  %v4445_v40 = vld [vmem:[#allocation2 + $0x4e8] sm:$0xf]  ;;  %v4585_v33 = vld [vmem:[#allocation2 + $0x600] sm:$0xf] }
 0x144   :  { %2843 = vmatpush.bf16.msra.mxu3 %v4302_v50  ;;  %v5718_v50 = vld [vmem:[#allocation2 + $0x6c0] sm:$0xf0]  ;;  %v4446_v51 = vor.u32 %v5662_v42, %v4445_v40 }
 0x145   :  { %2869 = vmatpush.bf16.msrb.mxu0 %v4750_v6  ;;  %v4670_v61 = vor.u32 %v5718_v50, %v4669_v49  ;;  %v4165_v6 = vld [vmem:[#allocation2 + $0x2b8] sm:$0xf]  ;;  %v5578_v40 = vld [vmem:[#allocation2 + $0x260] sm:$0xf0]  ;;  %v3885_v49 = vld [vmem:[#allocation2 + $0x88] sm:$0xf] }
 0x146   :  { %2855 = vmatpush.bf16.msra.mxu1 %v4554_v2  ;;  %v5711_v2 = vld [vmem:[#allocation2 + $0x688] sm:$0xf0]  ;;  %v4557_v50 = vld [vmem:[#allocation2 + $0x5c8] sm:$0xf] }
 0x147   :  { %2881 = vmatpush.bf16.msra.mxu2 %v5002_v62  ;;  %v3998_v62 = vor.u32 %v5550_v52, %v3997_v47  ;;  %v4642_v10 = vor.u32 %v5711_v2, %v4641_v1  ;;  %v3886_v1 = vor.u32 %v5522_v54, %v3885_v49  ;;  %v4082_v2 = vor.u32 %v5571_v58, %v4081_v57  ;;  %v5823_v49 = vld [vmem:[#allocation2 + $0xa08] sm:$0xf0]  ;;  %v4865_v57 = vld [vmem:[#allocation2 + $0x830] sm:$0xf] }
 0x148   :  { %2844 = vmatpush.bf16.msra.mxu3 %v4274_v7  ;;  %v5592_v7 = vld [vmem:[#allocation2 + $0x2d0] sm:$0xf0]  ;;  %v5767_v58 = vld [vmem:[#allocation2 + $0x848] sm:$0xf0] }
 0x149   :  { %2870 = vmatpush.bf16.msrb.mxu0 %v4722_v29  ;;  %v6350_v29 = vpop.f32.mrf.mxu0 }
 0x14a   :  { %2856 = vmatpush.bf16.msra.mxu1 %v4526_v24  ;;  %v5585_v24 = vld [vmem:[#allocation2 + $0x298] sm:$0xf0]  ;;  %v2599_v25 = vpop.f32.mrf.mxu1 }
 0x14b   :  { %2882 = vmatpush.bf16.msra.mxu2 %v4974_v19  ;;  %2845 = vmatmul.bf16.vlgmr.msra.gmra.mxu3 %v6266_v55  ;;  %v5704_v19 = vld [vmem:[#allocation2 + $0x650] sm:$0xf0]  ;;  %v2600_v27 = vadd.f32 %v2599_v25, %v6341_v11  ;;  %v4138_v31 = vor.u32 %v5585_v24, %v4137_v22  ;;  %v5634_v11 = vld [vmem:[#allocation2 + $0x420] sm:$0xf0]  ;;  %v4054_v24 = vor.u32 %v5564_v9, %v4053_v8  ;;  %v4501_v25 = vld [vmem:[#allocation2 + $0x558] sm:$0xf] }
 0x14c   :  { %2896 = vmatpush.bf16.msrb.mxu3 %v5170_v15  ;;  %2871 = vmatmul.bf16.vlgmr.msrb.gmra.mxu0 %v6291_v37  ;;  %v4166_v15 = vor.u32 %v5592_v7, %v4165_v6  ;;  %v4614_v28 = vor.u32 %v5704_v19, %v4613_v18  ;;  %v5683_v6 = vld [vmem:[#allocation2 + $0x5a8] sm:$0xf0]  ;;  %v5837_v18 = vld [vmem:[#allocation2 + $0xa78] sm:$0xf0]  ;;  %v4809_v8 = vld [vmem:[#allocation2 + $0x7c0] sm:$0xf] }
 0x14d   :  { %2928 = vmatpush.bf16.msra.mxu0 %v4474_v34  ;;  %v5697_v34 = vld [vmem:[#allocation2 + $0x618] sm:$0xf0]  ;;  %v4530_v19 = vor.u32 %v5683_v6, %v4529_v5 }
 0x14e   :  { %2857 = vmatpush.bf16.msra.mxu1 %v4498_v43  ;;  %v2612_v35 = vpop.f32.mrf.mxu3  ;;  %v4333_v43 = vld [vmem:[#allocation2 + $0x408] sm:$0xf]  ;;  %v5849_v5 = vld [vmem:[#allocation4 + $0x20] sm:$0xff] }
 0x14f   :  { %2883 = vmatpush.bf16.msra.mxu2 %v4946_v39  ;;  %v4109_v39 = vld [vmem:[#allocation2 + $0x248] sm:$0xf]  ;;  %v2613_v42 = vadd.f32 %v2612_v35, %v2600_v27  ;;  %v4334_v52 = vor.u32 %v5634_v11, %v4333_v43  ;;  %v4502_v35 = vor.u32 %v5676_v26, %v4501_v25  ;;  %v5860_v43 = vld [vmem:[#allocation4 + $0x78] sm:$0xff]  ;;  %v5753_v9 = vld [vmem:[#allocation2 + $0x7d8] sm:$0xf0] }
 0x150   :  { %2915 = vmatpush.bf16.msra.mxu3 %v4250_v30  ;;  %v3942_v30 = vor.u32 %v5536_v20, %v3941_v16  ;;  %v4110_v47 = vor.u32 %v5578_v40, %v4109_v39  ;;  %v5145_v16 = vld [vmem:[#allocation2 + $0xa60] sm:$0xf]  ;;  %v5844_v20 = vld [vmem:[#allocation2 + $0xab0] sm:$0xf0]  ;;  %v4977_v25 = vld [vmem:[#allocation2 + $0x910] sm:$0xf] }
 0x151   :  { %2929 = vmatpush.bf16.msra.mxu0 %v4446_v51  ;;  %2858 = vmatmul.bf16.vlgmr.msra.gmra.mxu1 %v6268_v56  ;;  %v5690_v51 = vld [vmem:[#allocation2 + $0x5e0] sm:$0xf0]  ;;  %v6357_v59 = vpop.f32.mrf.mxu2  ;;  %v2653_v0 = vpop.f32.mrf.mxu0  ;;  %v5146_v27 = vor.u32 %v5837_v18, %v5145_v16  ;;  %v4810_v16 = vor.u32 %v5753_v9, %v4809_v8  ;;  %v5848_v18 = vld [vmem:[#allocation4 + $0x18] sm:$0xff]  ;;  %v5795_v26 = vld [vmem:[#allocation2 + $0x928] sm:$0xf0] }
 0x152   :  { %2902 = vmatpush.bf16.msrb.mxu1 %v4026_v45  ;;  %2884 = vmatmul.bf16.vlgmr.msra.gmra.mxu2 %v6293_v41  ;;  %v6355_v45 = vadd.f32 %v6343_v23, %v2613_v42  ;;  %v3857_v23 = vld [vmem:[#allocation2 + $0x50] sm:$0xf]  ;;  %v5760_v0 = vld [vmem:[#allocation2 + $0x810] sm:$0xf0] }
 0x153   :  { %2941 = vmatpush.bf16.msrb.mxu2 %v4698_v44  ;;  %v4586_v44 = vor.u32 %v5697_v34, %v4585_v33  ;;  %v4921_v33 = vld [vmem:[#allocation2 + $0x8a0] sm:$0xf]  ;;  %v5781_v34 = vld [vmem:[#allocation2 + $0x8b8] sm:$0xf0]  ;;  %v5852_v42 = vld [vmem:[#allocation4 + $0x38] sm:$0xff] }
 0x154   :  { %2916 = vmatpush.bf16.msra.mxu3 %v4222_v46  ;;  %v3914_v46 = vor.u32 %v5529_v38, %v3913_v32  ;;  %v5830_v38 = vld [vmem:[#allocation2 + $0xa40] sm:$0xf0]  ;;  %v4922_v40 = vor.u32 %v5781_v34, %v4921_v33  ;;  %v4753_v33 = vld [vmem:[#allocation2 + $0x750] sm:$0xf]  ;;  %v5739_v34 = vld [vmem:[#allocation2 + $0x768] sm:$0xf0] }
 0x155   :  { %2930 = vmatpush.bf16.msra.mxu0 %v4418_v3  ;;  %v5515_v3 = vld [vmem:[#allocation2 + $0x68] sm:$0xf0]  ;;  %v5880_v8 = vld [vmem:[#allocation4 + $0x118] sm:$0xff] }
 0x156   :  { %2903 = vmatpush.bf16.msrb.mxu1 %v3998_v62  ;;  %v2601_v62 = vpop.f32.mrf.mxu1  ;;  %v3858_v22 = vor.u32 %v5515_v3, %v3857_v23  ;;  %v4837_v23 = vld [vmem:[#allocation2 + $0x7f8] sm:$0xf]  ;;  %v5892_v9 = vld [vmem:[#allocation4 + $0x178] sm:$0xff] }
 0x157   :  { %2942 = vmatpush.bf16.msrb.mxu2 %v4670_v61  ;;  %v5627_v61 = vld [vmem:[#allocation2 + $0x3e8] sm:$0xf0]  ;;  %v5858_v62 = vld [vmem:[#allocation4 + $0x68] sm:$0xff] }
 0x158   :  { %2917 = vmatpush.bf16.msra.mxu3 %v4194_v63  ;;  %v4558_v63 = vor.u32 %v5690_v51, %v4557_v50  ;;  %v4306_v7 = vor.u32 %v5627_v61, %v4305_v60  ;;  %v5851_v51 = vld [vmem:[#allocation4 + $0x30] sm:$0xff]  ;;  %v5061_v60 = vld [vmem:[#allocation2 + $0x9b8] sm:$0xf]  ;;  %v5816_v61 = vld [vmem:[#allocation2 + $0x9d0] sm:$0xf0] }
 0x159   :  { %2931 = vmatpush.bf16.msra.mxu0 %v4390_v12  ;;  %v5173_v12 = vld [vmem:[#allocation2 + $0xa98] sm:$0xf] }
 0x15a   :  { %2904 = vmatpush.bf16.msrb.mxu1 %v3970_v13  ;;  %v2614_v13 = vpop.f32.mrf.mxu3  ;;  %v5174_v32 = vor.u32 %v5844_v20, %v5173_v12  ;;  %v5856_v12 = vld [vmem:[#allocation4 + $0x58] sm:$0xff] }
 0x15b   :  { %2943 = vmatpush.bf16.msrb.mxu2 %v4642_v10  ;;  %5180 = vmatmul.msk.bf16.vlgmr.msrb.gmra.mxu3 %vm2352_vm0, %v6284_v48  ;;  %v4277_v10 = vld [vmem:[#allocation2 + $0x398] sm:$0xf]  ;;  %v5802_v13 = vld [vmem:[#allocation2 + $0x960] sm:$0xf0] }
 0x15c   :  { %2918 = vmatpush.bf16.msra.mxu3 %v4166_v15  ;;  %v5620_v15 = vld [vmem:[#allocation2 + $0x3b0] sm:$0xf0] }
 0x15d   :  { %2932 = vmatpush.bf16.msra.mxu0 %v4362_v36  ;;  %v4278_v53 = vor.u32 %v5620_v15, %v4277_v10  ;;  %v5117_v36 = vld [vmem:[#allocation2 + $0xa28] sm:$0xf] }
 0x15e   :  { %2905 = vmatpush.bf16.msrb.mxu1 %v3942_v30  ;;  %v5508_v30 = vld [vmem:[#allocation2 + $0x30] sm:$0xf0]  ;;  %v5118_v11 = vor.u32 %v5830_v38, %v5117_v36  ;;  %v5005_v10 = vld [vmem:[#allocation2 + $0x948] sm:$0xf] }
 0x15f   :  { %2944 = vmatpush.bf16.msrb.mxu2 %v4614_v28  ;;  %v3829_v28 = vld [vmem:[#allocation2 + $0x18] sm:$0xf]  ;;  %v5006_v20 = vor.u32 %v5802_v13, %v5005_v10  ;;  %v5788_v36 = vld [vmem:[#allocation2 + $0x8f0] sm:$0xf0]  ;;  %v5863_v10 = vld [vmem:[#allocation4 + $0x90] sm:$0xff] }
 0x160   :  { %2919 = vmatpush.bf16.msra.mxu3 %v4138_v31  ;;  %v2640_v31 = vpop.f32.mrf.mxu2  ;;  %v3830_v39 = vor.u32 %v5508_v30, %v3829_v28  ;;  %v5847_v28 = vld [vmem:[#allocation4 + $0x10] sm:$0xff]  ;;  %v5870_v13 = vld [vmem:[#allocation4 + $0xc8] sm:$0xff] }
 0x161   :  { %2933 = vmatpush.bf16.msra.mxu0 %v4334_v52  ;;  %v5859_v52 = vld [vmem:[#allocation4 + $0x70] sm:$0xff] }
 0x162   :  { %2906 = vmatpush.bf16.msrb.mxu1 %v3914_v46  ;;  %v5774_v46 = vld [vmem:[#allocation2 + $0x880] sm:$0xf0]  ;;  %v5855_v31 = vld [vmem:[#allocation4 + $0x50] sm:$0xff] }
 0x163   :  { %2945 = vmatpush.bf16.msrb.mxu2 %v4586_v44  ;;  %v4893_v44 = vld [vmem:[#allocation2 + $0x868] sm:$0xf] }
 0x164   :  { %2920 = vmatpush.bf16.msra.mxu3 %v4110_v47  ;;  %v5089_v47 = vld [vmem:[#allocation2 + $0x9f0] sm:$0xf]  ;;  %v4894_v50 = vor.u32 %v5774_v46, %v4893_v44 }
 0x165   :  { %2934 = vmatpush.bf16.msra.mxu0 %v4306_v7  ;;  %v5090_v54 = vor.u32 %v5823_v49, %v5089_v47  ;;  %v5876_v46 = vld [vmem:[#allocation4 + $0xf8] sm:$0xff] }
 0x166   :  { %2907 = vmatpush.bf16.msrb.mxu1 %v3886_v1  ;;  %v5033_v1 = vld [vmem:[#allocation2 + $0x980] sm:$0xf] }
 0x167   :  { %2946 = vmatpush.bf16.msrb.mxu2 %v4558_v63  ;;  %v5062_v63 = vor.u32 %v5816_v61, %v5061_v60  ;;  %v2994_v60 = vpack.c.bf16 %v6335_v14, %v6335_v14  ;;  %v5867_v61 = vld [vmem:[#allocation4 + $0xb0] sm:$0xff]  ;;  %v5882_v14 = vld [vmem:[#allocation4 + $0x128] sm:$0xff] }
 0x168   :  { %2921 = vmatpush.bf16.msra.mxu3 %v4082_v2  ;;  %v5809_v2 = vld [vmem:[#allocation2 + $0x998] sm:$0xf0] }
 0x169   :  { %2935 = vmatpush.bf16.msra.mxu0 %v4278_v53  ;;  %v6365_v6 = vpop.f32.mrf.mxu0  ;;  %v5034_v7 = vor.u32 %v5809_v2, %v5033_v1  ;;  %v5881_v2 = vld [vmem:[#allocation4 + $0x120] sm:$0xff] }
 0x16a   :  { %2908 = vmatpush.bf16.msrb.mxu1 %v3858_v22  ;;  %v6363_v3 = vpop.f32.mrf.mxu1  ;;  %v4781_v22 = vld [vmem:[#allocation2 + $0x788] sm:$0xf] }
 0x16b   :  { %2947 = vmatpush.bf16.msrb.mxu2 %v4530_v19 }
 0x16c   :  { %2922 = vmatpush.bf16.msra.mxu3 %v4054_v24  ;;  %2936 = vmatmul.bf16.vlgmr.msra.gmra.mxu0 %v6266_v55  ;;  %v5850_v55 = vld [vmem:[#allocation4 + $0x28] sm:$0xff] }
 0x16d   :  { %2987 = vmatpush.bf16.msrb.mxu0 %v5174_v32  ;;  %v5746_v24 = vld [vmem:[#allocation2 + $0x7a0] sm:$0xf0]  ;;  %v4978_v32 = vor.u32 %v5795_v26, %v4977_v25 }
 0x16e   :  { %2909 = vmatpush.bf16.msrb.mxu1 %v3830_v39  ;;  %v6367_v15 = vpop.f32.mrf.mxu3  ;;  %v4754_v39 = vor.u32 %v5739_v34, %v4753_v33  ;;  %v2995_v33 = vpack.c.bf16 %v6355_v45, %v6355_v45 }
 0x16f   :  { %2948 = vmatpush.bf16.msrb.mxu2 %v4502_v35  ;;  %2923 = vmatmul.bf16.vlgmr.msra.gmra.mxu3 %v6277_v21  ;;  %v4866_v21 = vor.u32 %v5767_v58, %v4865_v57  ;;  %v4949_v35 = vld [vmem:[#allocation2 + $0x8d8] sm:$0xf]  ;;  %v5884_v57 = vld [vmem:[#allocation4 + $0x138] sm:$0xff]  ;;  %v2993_v58 = vpack.c.bf16 %v6322_v4, %v6322_v4  ;;  %v5866_v4 = vld [vmem:[#allocation4 + $0xa8] sm:$0xff] }
 0x170   :  { %2967 = vmatpush.bf16.msrb.mxu3 %v5146_v27  ;;  %v4782_v27 = vor.u32 %v5746_v24, %v4781_v22  ;;  %v5862_v22 = vld [vmem:[#allocation4 + $0x88] sm:$0xff]  ;;  %v5869_v24 = vld [vmem:[#allocation4 + $0xc0] sm:$0xff] }
 0x171   :  { %3465 = vmatpush.bf16.msra.mxu0 %v5860_v43  ;;  %2910 = vmatmul.bf16.vlgmr.msrb.gmra.mxu1 %v6275_v17  ;;  %v4838_v17 = vor.u32 %v5760_v0, %v4837_v23  ;;  %v6369_v19 = vpop.f32.mrf.mxu2  ;;  %v2705_v30 = vpop.f32.mrf.mxu0  ;;  %v4725_v43 = vld [vmem:[#allocation2 + $0x718] sm:$0xf] }
 0x172   :  { %2954 = vmatpush.bf16.msra.mxu1 %v4922_v40  ;;  %2949 = vmatmul.bf16.vlgmr.msrb.gmra.mxu2 %v6268_v56  ;;  %v5857_v56 = vld [vmem:[#allocation4 + $0x60] sm:$0xff]  ;;  %v2666_v53 = vpop.f32.mrf.mxu1  ;;  %v5846_v40 = vld [vmem:[#allocation4 + $0x8] sm:$0xff] }
 0x173   :  { %3452 = vmatpush.bf16.msra.mxu2 %v5852_v42  ;;  %v4950_v42 = vor.u32 %v5788_v36, %v4949_v35  ;;  %v5865_v0 = vld [vmem:[#allocation4 + $0xa0] sm:$0xff]  ;;  %v5878_v53 = vld [vmem:[#allocation4 + $0x108] sm:$0xff] }
 0x174   :  { %2968 = vmatpush.bf16.msrb.mxu3 %v5118_v11  ;;  %v5732_v11 = vld [vmem:[#allocation2 + $0x730] sm:$0xf0] }
 0x175   :  { %3466 = vmatpush.bf16.msra.mxu0 %v5859_v52  ;;  %v4726_v49 = vor.u32 %v5732_v11, %v4725_v43  ;;  %v5868_v52 = vld [vmem:[#allocation4 + $0xb8] sm:$0xff] }
 0x176   :  { %2955 = vmatpush.bf16.msra.mxu1 %v4894_v50  ;;  %v2679_v38 = vpop.f32.mrf.mxu3  ;;  %v5845_v50 = vld [vmem:[#allocation4] sm:$0xff]  ;;  %v5888_v43 = vld [vmem:[#allocation4 + $0x158] sm:$0xff] }
 0x177   :  { %3453 = vmatpush.bf16.msra.mxu2 %v5851_v51  ;;  %v5853_v51 = vld [vmem:[#allocation4 + $0x40] sm:$0xff] }
 0x178   :  { %2969 = vmatpush.bf16.msrb.mxu3 %v5090_v54  ;;  %v5875_v54 = vld [vmem:[#allocation4 + $0xf0] sm:$0xff]  ;;  %v5889_v38 = vld [vmem:[#allocation4 + $0x160] sm:$0xff] }
 0x179   :  { %3467 = vmatpush.bf16.msra.mxu0 %v5858_v62  ;;  %v2692_v44 = vpop.f32.mrf.mxu2  ;;  %v5883_v62 = vld [vmem:[#allocation4 + $0x130] sm:$0xff] }
 0x17a   :  { %2956 = vmatpush.bf16.msra.mxu1 %v4866_v21  ;;  %v6373_v47 = vpop.f32.mrf.mxu1  ;;  %v5874_v21 = vld [vmem:[#allocation4 + $0xe8] sm:$0xff] }
 0x17b   :  { %3454 = vmatpush.bf16.msra.mxu2 %v5850_v55 }
 0x17c   :  { %2970 = vmatpush.bf16.msrb.mxu3 %v5062_v63  ;;  %5181 = vmatmul.msk.bf16.vlgmr.msrb.gmra.mxu0 %vm2352_vm0, %v6284_v48  ;;  %v5854_v48 = vld [vmem:[#allocation4 + $0x48] sm:$0xff]  ;;  %v5873_v63 = vld [vmem:[#allocation4 + $0xe0] sm:$0xff] }
 0x17d   :  { %3468 = vmatpush.bf16.msra.mxu0 %v5857_v56 }
 0x17e   :  { %2957 = vmatpush.bf16.msra.mxu1 %v4838_v17 }
 0x17f   :  { %3455 = vmatpush.bf16.msra.mxu2 %v5849_v5 }
 0x180   :  { %2971 = vmatpush.bf16.msrb.mxu3 %v5034_v7 }
 0x181   :  { %3469 = vmatpush.bf16.msra.mxu0 %v5856_v12 }
 0x182   :  { %2958 = vmatpush.bf16.msra.mxu1 %v4810_v16  ;;  %v2718_v55 = vpop.f32.mrf.mxu1 }
 0x183   :  { %3456 = vmatpush.bf16.msra.mxu2 %v5848_v18  ;;  %v5879_v18 = vld [vmem:[#allocation4 + $0x110] sm:$0xff] }
 0x184   :  { %2972 = vmatpush.bf16.msrb.mxu3 %v5006_v20 }
 0x185   :  { %3470 = vmatpush.bf16.msra.mxu0 %v5855_v31  ;;  %v5877_v31 = vld [vmem:[#allocation4 + $0x100] sm:$0xff] }
 0x186   :  { %2959 = vmatpush.bf16.msra.mxu1 %v4782_v27  ;;  %v5890_v27 = vld [vmem:[#allocation4 + $0x168] sm:$0xff] }
 0x187   :  { %3457 = vmatpush.bf16.msra.mxu2 %v5847_v28  ;;  %v5861_v28 = vld [vmem:[#allocation4 + $0x80] sm:$0xff] }
 0x188   :  { %2973 = vmatpush.bf16.msrb.mxu3 %v4978_v32 }
 0x189   :  { %3471 = vmatpush.bf16.msra.mxu0 %v5854_v48  ;;  %v2768_v1 = vpop.f32.mrf.mxu0 }
 0x18a   :  { %2960 = vmatpush.bf16.msra.mxu1 %v4754_v39 }
 0x18b   :  { %3458 = vmatpush.bf16.msra.mxu2 %v5846_v40 }
 0x18c   :  { %2974 = vmatpush.bf16.msrb.mxu3 %v4950_v42 }
 0x18d   :  { %3472 = vmatpush.bf16.msra.mxu0 %v5853_v51  ;;  %v5886_v51 = vld [vmem:[#allocation4 + $0x148] sm:$0xff] }
 0x18e   :  { %2961 = vmatpush.bf16.msra.mxu1 %v4726_v49  ;;  %v2742_v17 = vpop.f32.mrf.mxu1  ;;  %v2729_v56 = vpop.f32.mrf.mxu3 }
 0x18f   :  { %2975 = vmatmul.bf16.vlgmr.msrb.gmra.mxu3 %v6293_v41  ;;  %3459 = vmatpush.bf16.msra.mxu2 %v5845_v50  ;;  %v2652_v41 = vadd.f32 %v6350_v29, %v6357_v59  ;;  %v5864_v29 = vld [vmem:[#allocation4 + $0x98] sm:$0xff]  ;;  %v5871_v59 = vld [vmem:[#allocation4 + $0xd0] sm:$0xff] }
 0x190   :  { %3491 = vmatpush.bf16.msra.mxu3 %v5876_v46  ;;  %3473 = vmatmul.bf16.vlgmr.msra.gmra.mxu0 %v2994_v60  ;;  %v5887_v46 = vld [vmem:[#allocation4 + $0x150] sm:$0xff] }
 0x191   :  { %2962 = vmatmul.bf16.vlgmr.msra.gmra.mxu1 %v6291_v37  ;;  %v2665_v23 = vadd.f32 %v6363_v3, %v2652_v41  ;;  %v5872_v37 = vld [vmem:[#allocation4 + $0xd8] sm:$0xff]  ;;  %v2755_v7 = vpop.f32.mrf.mxu2  ;;  %v2770_v16 = vpop.f32.mrf.mxu0  ;;  %3517 = vmatpush.bf16.msrb.mxu0 %v5892_v9  ;;  %v5899_v41 = vld [vmem:[#allocation4 + $0x1b0] sm:$0xff] }
 0x192   :  { %3478 = vmatpush.bf16.msrb.mxu1 %v5868_v52  ;;  %3460 = vmatmul.bf16.vlgmr.msra.gmra.mxu2 %v2993_v58 }
 0x193   :  { %3504 = vmatpush.bf16.msrb.mxu2 %v5884_v57  ;;  %v2678_v5 = vadd.f32 %v6367_v15, %v2665_v23  ;;  %v5891_v15 = vld [vmem:[#allocation4 + $0x170] sm:$0xff]  ;;  %v5885_v57 = vld [vmem:[#allocation4 + $0x140] sm:$0xff] }
 0x194   :  { %3492 = vmatpush.bf16.msra.mxu3 %v5875_v54 }
 0x195   :  { %v2691_v3 = vadd.f32 %v6369_v19, %v2678_v5  ;;  %3518 = vmatpush.bf16.msrb.mxu0 %v5891_v15 }
 0x196   :  { %3479 = vmatpush.bf16.msrb.mxu1 %v5867_v61  ;;  %v2744_v12 = vpop.f32.mrf.mxu1  ;;  %v2731_v25 = vpop.f32.mrf.mxu3 }
 0x197   :  { %3505 = vmatpush.bf16.msrb.mxu2 %v5883_v62  ;;  %v2704_v20 = vadd.f32 %v6365_v6, %v2691_v3  ;;  %v2743_v6 = vadd.f32 %v2742_v17, %v2729_v56  ;;  %v5900_v62 = vld [vmem:[#allocation4 + $0x1b8] sm:$0xff] }
 0x198   :  { %3493 = vmatpush.bf16.msra.mxu3 %v5874_v21 }
 0x199   :  { %v2757_v26 = vpop.f32.mrf.mxu2  ;;  %v2717_v19 = vadd.f32 %v6373_v47, %v2704_v20  ;;  %3519 = vmatpush.bf16.msrb.mxu0 %v5890_v27  ;;  %v2756_v34 = vadd.f32 %v2755_v7, %v2743_v6  ;;  %v5896_v7 = vld [vmem:[#allocation4 + $0x198] sm:$0xff] }
 0x19a   :  { %3480 = vmatpush.bf16.msrb.mxu1 %v5866_v4 }
 0x19b   :  { %3506 = vmatpush.bf16.msrb.mxu2 %v5882_v14  ;;  %v2996_v30 = vpack.c.bf16 %v2717_v19, %v2717_v19  ;;  %v2769_v35 = vadd.f32 %v2768_v1, %v2756_v34  ;;  %v5898_v1 = vld [vmem:[#allocation4 + $0x1a8] sm:$0xff] }
 0x19c   :  { %3494 = vmatpush.bf16.msra.mxu3 %v5873_v63 }
 0x19d   :  { %3520 = vmatpush.bf16.msrb.mxu0 %v5889_v38 }
 0x19e   :  { %3481 = vmatpush.bf16.msrb.mxu1 %v5865_v0 }
 0x19f   :  { %3507 = vmatpush.bf16.msrb.mxu2 %v5881_v2  ;;  %v5897_v2 = vld [vmem:[#allocation4 + $0x1a0] sm:$0xff] }
 0x1a0   :  { %3495 = vmatpush.bf16.msra.mxu3 %v5872_v37 }
 0x1a1   :  { %v2807_v32 = vpop.f32.mrf.mxu2  ;;  %3521 = vmatpush.bf16.msrb.mxu0 %v5888_v43 }
 0x1a2   :  { %3482 = vmatpush.bf16.msrb.mxu1 %v5864_v29 }
 0x1a3   :  { %3508 = vmatpush.bf16.msrb.mxu2 %v5880_v8  ;;  %v5895_v8 = vld [vmem:[#allocation4 + $0x190] sm:$0xff] }
 0x1a4   :  { %3496 = vmatpush.bf16.msra.mxu3 %v5871_v59 }
 0x1a5   :  { %3522 = vmatpush.bf16.msrb.mxu0 %v5887_v46 }
 0x1a6   :  { %3483 = vmatpush.bf16.msrb.mxu1 %v5863_v10  ;;  %v5894_v10 = vld [vmem:[#allocation4 + $0x188] sm:$0xff] }
 0x1a7   :  { %3509 = vmatpush.bf16.msrb.mxu2 %v5879_v18  ;;  %v5893_v18 = vld [vmem:[#allocation4 + $0x180] sm:$0xff] }
 0x1a8   :  { %3497 = vmatpush.bf16.msra.mxu3 %v5870_v13 }
 0x1a9   :  { %v2809_v36 = vpop.f32.mrf.mxu2  ;;  %v2820_v39 = vpop.f32.mrf.mxu0  ;;  %3523 = vmatpush.bf16.msrb.mxu0 %v5886_v51 }
 0x1aa   :  { %3484 = vmatpush.bf16.msrb.mxu1 %v5862_v22 }
 0x1ab   :  { %3510 = vmatpush.bf16.msrb.mxu2 %v5878_v53 }
 0x1ac   :  { %3498 = vmatpush.bf16.msra.mxu3 %v5869_v24 }
 0x1ad   :  { %3524 = vmatpush.bf16.msrb.mxu0 %v5885_v57  ;;  %v5907_v57 = vld [vmem:[#allocation7 + $0x30] sm:$0xff] }
 0x1ae   :  { %3485 = vmatpush.bf16.msrb.mxu1 %v5861_v28  ;;  %v2781_v40 = vpop.f32.mrf.mxu3  ;;  %v2794_v42 = vpop.f32.mrf.mxu1 }
 0x1af   :  { %3499 = vmatmul.bf16.vlgmr.msra.gmra.mxu3 %v2996_v30  ;;  %3511 = vmatpush.bf16.msrb.mxu2 %v5877_v31  ;;  %v2782_v48 = vadd.f32 %v2781_v40, %v2769_v35 }
 0x1b1   :  { %3486 = vmatmul.bf16.vlgmr.msrb.gmra.mxu1 %v2995_v33  ;;  %v2795_v11 = vadd.f32 %v2794_v42, %v2782_v48  ;;  %v2822_v50 = vpop.f32.mrf.mxu0  ;;  %v5938_v33 = vld [vmem:[#allocation6] ss:$0 sm:$0xff] }
 0x1b2   :  { %3530 = vmatpush.bf16.msra.mxu1 %v5900_v62 }
 0x1b3   :  { %v2808_v44 = vadd.f32 %v2807_v32, %v2795_v11 }
 0x1b5   :  { %v2997_v47 = vpack.c.bf16 %v2808_v44, %v2808_v44  ;;  %v2833_v49 = vpop.f32.mrf.mxu2 }
 0x1b6   :  { %v2783_v45 = vpop.f32.mrf.mxu3  ;;  %v2796_v52 = vpop.f32.mrf.mxu1  ;;  %v2834_v58 = vadd.f32 %v2833_v49, %v2820_v39  ;;  %3531 = vmatpush.bf16.msra.mxu1 %v5899_v41  ;;  %v5902_v41 = vld [vmem:[#allocation7 + $0x8] sm:$0xff] }
 0x1b7   :  { %3512 = vmatmul.bf16.vlgmr.msrb.gmra.mxu2 %v2997_v47 }
 0x1ba   :  { %3532 = vmatpush.bf16.msra.mxu1 %v5898_v1  ;;  %v5911_v1 = vld [vmem:[#allocation10 + $0x10] sm:$0xff] }
 0x1bd   :  { %v2835_v54 = vpop.f32.mrf.mxu2 }
 0x1be   :  { %3533 = vmatpush.bf16.msra.mxu1 %v5897_v2  ;;  %v5908_v54 = vld [vmem:[#allocation7 + $0x38] sm:$0xff] }
 0x1bf   :  { %3613 = vmatpush.bf16.msrb.mxu3 %v5908_v54 }
 0x1c2   :  { %3534 = vmatpush.bf16.msra.mxu1 %v5896_v7  ;;  %v5910_v7 = vld [vmem:[#allocation10 + $0x8] sm:$0xff] }
 0x1c3   :  { %3614 = vmatpush.bf16.msrb.mxu3 %v5907_v57 }
 0x1c6   :  { %3535 = vmatpush.bf16.msra.mxu1 %v5895_v8  ;;  %v5909_v8 = vld [vmem:[#allocation10] sm:$0xff] }
 0x1c9   :  { %v2872_v21 = vpop.f32.mrf.mxu0 }
 0x1ca   :  { %3536 = vmatpush.bf16.msra.mxu1 %v5894_v10  ;;  %v5922_v10 = vld [vmem:[#allocation13 + $0x28] sm:$0xff] }
 0x1ce   :  { %v2846_v60 = vpop.f32.mrf.mxu3  ;;  %v2859_v61 = vpop.f32.mrf.mxu1  ;;  %3537 = vmatpush.bf16.msra.mxu1 %v5893_v18  ;;  %v5919_v18 = vld [vmem:[#allocation13 + $0x10] sm:$0xff] }
 0x1cf   :  { %v2847_v55 = vadd.f32 %v2846_v60, %v2834_v58  ;;  %v5906_v58 = vld [vmem:[#allocation7 + $0x28] sm:$0xff]  ;;  %v5905_v60 = vld [vmem:[#allocation7 + $0x20] sm:$0xff] }
 0x1d0   :  { %3615 = vmatpush.bf16.msrb.mxu3 %v5906_v58 }
 0x1d1   :  { %v2860_v63 = vadd.f32 %v2859_v61, %v2847_v55  ;;  %v2874_v23 = vpop.f32.mrf.mxu0  ;;  %v5904_v61 = vld [vmem:[#allocation7 + $0x18] sm:$0xff] }
 0x1d2   :  { %v5914_v23 = vld [vmem:[#allocation10 + $0x28] sm:$0xff] }
 0x1d3   :  { %v2873_v37 = vadd.f32 %v2872_v21, %v2860_v63  ;;  %v5903_v21 = vld [vmem:[#allocation7 + $0x10] sm:$0xff]  ;;  %v5916_v63 = vld [vmem:[#allocation10 + $0x38] sm:$0xff] }
 0x1d4   :  { %3616 = vmatpush.bf16.msrb.mxu3 %v5905_v60  ;;  %3696 = vmatpush.bf16.msra.mxu2 %v5916_v63 }
 0x1d5   :  { %v2885_v4 = vpop.f32.mrf.mxu2 }
 0x1d6   :  { %v2848_v14 = vpop.f32.mrf.mxu3  ;;  %v2861_v0 = vpop.f32.mrf.mxu1  ;;  %v2886_v5 = vadd.f32 %v2885_v4, %v2873_v37  ;;  %v5901_v4 = vld [vmem:[#allocation7] sm:$0xff] }
 0x1d7   :  { %v5915_v14 = vld [vmem:[#allocation10 + $0x30] sm:$0xff]  ;;  %v5913_v0 = vld [vmem:[#allocation10 + $0x20] sm:$0xff]  ;;  %v5912_v37 = vld [vmem:[#allocation10 + $0x18] sm:$0xff] }
 0x1d8   :  { %3617 = vmatpush.bf16.msrb.mxu3 %v5904_v61  ;;  %3697 = vmatpush.bf16.msra.mxu2 %v5915_v14 }
 0x1dc   :  { %3618 = vmatpush.bf16.msrb.mxu3 %v5903_v21  ;;  %3698 = vmatpush.bf16.msra.mxu2 %v5914_v23 }
 0x1dd   :  { %v2887_v17 = vpop.f32.mrf.mxu2 }
 0x1de   :  { %v2898_v29 = vpop.f32.mrf.mxu3 }
 0x1df   :  { %v2899_v59 = vadd.f32 %v2898_v29, %v2886_v5 }
 0x1e0   :  { %3619 = vmatpush.bf16.msrb.mxu3 %v5902_v41  ;;  %3699 = vmatpush.bf16.msra.mxu2 %v5913_v0 }
 0x1e1   :  { %v2998_v56 = vpack.c.bf16 %v2899_v59, %v2899_v59 }
 0x1e3   :  { %3525 = vmatmul.bf16.vlgmr.msrb.gmra.mxu0 %v2998_v56 }
 0x1e4   :  { %3620 = vmatpush.bf16.msrb.mxu3 %v5901_v4  ;;  %3700 = vmatpush.bf16.msra.mxu2 %v5912_v37 }
 0x1e6   :  { %v2900_v3 = vpop.f32.mrf.mxu3 }
 0x1e7   :  { %v5924_v3 = vld [vmem:[#allocation13 + $0x38] sm:$0xff] }
 0x1e8   :  { %3701 = vmatpush.bf16.msra.mxu2 %v5911_v1  ;;  %3779 = vmatpush.bf16.msra.mxu0 %v5924_v3 }
 0x1e9   :  { %v2937_v9 = vpop.f32.mrf.mxu0 }
 0x1ec   :  { %3702 = vmatpush.bf16.msra.mxu2 %v5910_v7 }
 0x1ee   :  { %v2911_v13 = vpop.f32.mrf.mxu1 }
 0x1f0   :  { %3703 = vmatpush.bf16.msra.mxu2 %v5909_v8 }
 0x1f1   :  { %v2939_v15 = vpop.f32.mrf.mxu0 }
 0x1f2   :  { %v2924_v16 = vpop.f32.mrf.mxu3  ;;  %v5939_v15 = vld [vmem:[#allocation9] ss:$0 sm:$0xff] }
 0x1f3   :  { %v2925_v26 = vadd.f32 %v2924_v16, %v2911_v13  ;;  %v5921_v13 = vld [vmem:[#allocation13 + $0x20] sm:$0xff]  ;;  %v5920_v16 = vld [vmem:[#allocation13 + $0x18] sm:$0xff] }
 0x1f5   :  { %v2950_v12 = vpop.f32.mrf.mxu2  ;;  %v2938_v53 = vadd.f32 %v2937_v9, %v2925_v26  ;;  %v5923_v9 = vld [vmem:[#allocation13 + $0x30] sm:$0xff]  ;;  %v5918_v26 = vld [vmem:[#allocation13 + $0x8] sm:$0xff] }
 0x1f6   :  { %v2913_v20 = vpop.f32.mrf.mxu1  ;;  %3780 = vmatpush.bf16.msra.mxu0 %v5923_v9 }
 0x1f7   :  { %v2951_v27 = vadd.f32 %v2950_v12, %v2938_v53  ;;  %v5940_v53 = vld [vmem:[#allocation12] ss:$0 sm:$0xff] }
 0x1f9   :  { %v2989_v24 = vpop.f32.mrf.mxu0 }
 0x1fa   :  { %v2926_v22 = vpop.f32.mrf.mxu3  ;;  %3781 = vmatpush.bf16.msra.mxu0 %v5922_v10 }
 0x1fd   :  { %v2952_v25 = vpop.f32.mrf.mxu2 }
 0x1fe   :  { %3782 = vmatpush.bf16.msra.mxu0 %v5921_v13 }
 0x201   :  { %v2991_v19 = vpop.f32.mrf.mxu0 }
 0x202   :  { %3783 = vmatpush.bf16.msra.mxu0 %v5920_v16  ;;  %v5917_v19 = vld [vmem:[#allocation13] sm:$0xff] }
 0x206   :  { %3784 = vmatpush.bf16.msra.mxu0 %v5919_v18 }
 0x20a   :  { %3785 = vmatpush.bf16.msra.mxu0 %v5918_v26 }
 0x20d   :  { %v3474_v31 = vpop.f32.mrf.mxu0 }
 0x20e   :  { %v2963_v28 = vpop.f32.mrf.mxu1  ;;  %3786 = vmatpush.bf16.msra.mxu0 %v5917_v19 }
 0x20f   :  { %v2964_v30 = vadd.f32 %v2963_v28, %v2951_v27 }
 0x212   :  { %v2976_v6 = vpop.f32.mrf.mxu3 }
 0x213   :  { %v2977_v32 = vadd.f32 %v2976_v6, %v2964_v30 }
 0x215   :  { %v2990_v34 = vadd.f32 %v2989_v24, %v2977_v32  ;;  %v3461_v35 = vpop.f32.mrf.mxu2  ;;  %v3476_v40 = vpop.f32.mrf.mxu0  ;;  %v5941_v32 = vld [vmem:[#allocation15] ss:$0 sm:$0xff] }
 0x216   :  { %v3462_v38 = vadd.f32 %v5938_v33, %v3461_v35  ;;  %v2965_v39 = vpop.f32.mrf.mxu1 }
 0x217   :  { %v2999_v36 = vpack.c.bf16 %v2990_v34, %v2990_v34 }
 0x218   :  { %v3475_v48 = vadd.f32 %v3474_v31, %v3462_v38 }
 0x219   :  { %3538 = vmatmul.bf16.vlgmr.msra.gmra.mxu1 %v2999_v36 }
 0x21a   :  { %v2978_v42 = vpop.f32.mrf.mxu3 }
 0x21d   :  { %v3463_v43 = vpop.f32.mrf.mxu2 }
 0x22e   :  { %v3487_v11 = vpop.f32.mrf.mxu1 }
 0x22f   :  { %v3488_v44 = vadd.f32 %v3487_v11, %v3475_v48 }
 0x232   :  { %v3500_v46 = vpop.f32.mrf.mxu3 }
 0x233   :  { %v3501_v47 = vadd.f32 %v3500_v46, %v3488_v44 }
 0x236   :  { %v3489_v49 = vpop.f32.mrf.mxu1 }
 0x23a   :  { %v3502_v50 = vpop.f32.mrf.mxu3  ;;  %v3513_v45 = vpop.f32.mrf.mxu2 }
 0x23b   :  { %v3514_v51 = vadd.f32 %v3513_v45, %v3501_v47 }
 0x242   :  { %v3515_v52 = vpop.f32.mrf.mxu2 }
 0x260   :  { %v3526_v55 = vpop.f32.mrf.mxu0 }
 0x261   :  { %v3527_v2 = vadd.f32 %v3526_v55, %v3514_v51 }
 0x268   :  { %v3528_v62 = vpop.f32.mrf.mxu0 }
 0x296   :  { %v3539_v17 = vpop.f32.mrf.mxu1 }
 0x297   :  { %v3540_v5 = vadd.f32 %v3539_v17, %v3527_v2 }
 0x299   :  { %v3543_v29 = vmax.f32 %v3540_v5, 0.0 }
 0x29b   :  { %v3544_v59 = vpack.c.bf16 %v3543_v29, %v3543_v29 }
 0x29d   :  { %3621 = vmatmul.bf16.vlgmr.msrb.gmra.mxu3 %v3544_v59 }
 0x29e   :  { %v3541_v56 = vpop.f32.mrf.mxu1 }
 0x320   :  { %v3622_v12 = vpop.f32.mrf.mxu3 }
 0x321   :  { %v3623_v20 = vadd.f32 %v5939_v15, %v3622_v12 }
 0x323   :  { %v3626_v22 = vmax.f32 %v3623_v20, 0.0 }
 0x325   :  { %v3627_v24 = vpack.c.bf16 %v3626_v22, %v3626_v22 }
 0x327   :  { %3704 = vmatmul.bf16.vlgmr.msra.gmra.mxu2 %v3627_v24 }
 0x328   :  { %v3624_v25 = vpop.f32.mrf.mxu3 }
 0x3aa   :  { %v3705_v27 = vpop.f32.mrf.mxu2 }
 0x3ab   :  { %v3706_v28 = vadd.f32 %v5940_v53, %v3705_v27 }
 0x3ad   :  { %v3709_v30 = vmax.f32 %v3706_v28, 0.0 }
 0x3af   :  { %v3710_v31 = vpack.c.bf16 %v3709_v30, %v3709_v30 }
 0x3b1   :  { %3787 = vmatmul.bf16.vlgmr.msra.gmra.mxu0 %v3710_v31 }
 0x3b2   :  { %v3707_v6 = vpop.f32.mrf.mxu2 }
 0x42e   :  { %v3788_v33 = vpop.f32.mrf.mxu0 }
 0x42f   :  { %v3789_v34 = vadd.f32 %v5941_v32, %v3788_v33 }
 0x431   :  { %v3792_v35 = vmax.f32 %v3789_v34, 0.0 }
 0x433   :  { %3793 = vst [vmem:[%s6403_s10] sm:$0xff] %v3792_v35 }
 0x436   :  { %v3790_v36 = vpop.f32.mrf.mxu0 }
 0x437   :  { %3798 = vsyncpa [#allocation3], 1 }
 0x438   :  { %3799 = vsyncpa [#allocation5], 1 }
 0x439   :  { %3800 = vsyncpa [#allocation8], 1 }
 0x43a   :  { %3801 = vsyncpa [#allocation11], 1 }
 0x43b   :  { %3802 = vsyncpa [#allocation14], 1 }

</bundles_post_ra>
